<compile_context>
chip_gen: v7x
topology: tpu7x:2x2x1
jax: 0.10.0
libtpu: 0.0.40
codegen_flags: <defaults>
</compile_context>

<pallas_src>
import functools

import jax
import jax.numpy as jnp
from jax.experimental import pallas as pl
from jax.experimental.pallas import tpu as pltpu  # noqa: F401

N = 2
C_IN = 512
H = W = 7
HW = H * W              # 49
C_MID = 100
FLAT = C_MID * HW       # 4900
C_OUT = 49


def _full_spec(shape):
    # Whole-array block, gridless call (total working set ~1 MB, fits VMEM on every
    # TPU generation, so no grid / pipelining machinery is needed).
    return pl.BlockSpec(shape, lambda: tuple(0 for _ in shape))


def _msblock_kernel(x_ref, wc_ref, bc_ref, w3_ref, bl_ref, o_ref, *, batch):
    # x_ref : [HW*batch, C_IN] f32, rows ordered (hw, n)
    # wc_ref: [C_IN, C_MID]        bf16   (1x1 conv weight)
    # bc_ref: [1, C_MID]           f32
    # w3_ref: [HW, C_MID, C_OUT]   bf16   (w3[hw, c, j] = lin_w[j, c*HW + hw])
    # bl_ref: [1, C_OUT]           f32
    # o_ref : [batch, C_OUT]       f32

    # --- 1x1 conv as one MXU matmul over all N*H*W pixels, bf16 in / f32 acc ------
    x = x_ref[...].astype(jnp.bfloat16)
    conv = jnp.dot(x, wc_ref[...], preferred_element_type=jnp.float32)
    conv = jnp.maximum(conv + bc_ref[...], 0.0)          # [HW*batch, C_MID], f32

    # --- Linear layer: logits[n, j] = sum_{hw,c} conv[(hw,n), c] * w3[hw, c, j] ---
    # Rows for pixel hw are the contiguous block [hw*batch, (hw+1)*batch), so the
    # PyTorch flatten (c*49 + hw) contraction is done by accumulating one small
    # matmul per spatial position -- no in-kernel reshape needed.
    logits = jnp.zeros((batch, C_OUT), dtype=jnp.float32)
    for hw in range(HW):  # static unroll (49 iterations)
        a = conv[hw * batch:(hw + 1) * batch, :].astype(jnp.bfloat16)  # [batch, C_MID]
        logits = logits + jnp.dot(a, w3_ref[hw], preferred_element_type=jnp.float32)
    logits = logits + bl_ref[...]

    # --- numerically stable softmax (Dropout(0.5) is identity in eval mode) -------
    # TODO(synk): training-mode stochastic dropout not implemented.
    m = jnp.max(logits, axis=-1, keepdims=True)
    e = jnp.exp(logits - m)
    s = jnp.sum(e, axis=-1, keepdims=True)
    o_ref[...] = e * pl.reciprocal(s, approx=False)


def prepare_msblock_params(conv_w, conv_b, lin_w, lin_b):
    """One-time weight preparation (hoisted out of the per-forward path)."""
    # PyTorch conv weight [C_MID, C_IN, 1, 1] -> [C_IN, C_MID], bf16 for the MXU.
    wc = jnp.transpose(conv_w.reshape(C_MID, C_IN), (1, 0)).astype(jnp.bfloat16)
    bc = conv_b.reshape(1, C_MID).astype(jnp.float32)
    # PyTorch linear weight [C_OUT, FLAT] with column index k = c*HW + hw
    #   -> w3[hw, c, j] = lin_w[j, c*HW + hw]
    w3 = jnp.transpose(lin_w.reshape(C_OUT, C_MID, HW), (2, 1, 0)).astype(jnp.bfloat16)
    bl = lin_b.reshape(1, C_OUT).astype(jnp.float32)
    return wc, bc, w3, bl


@jax.jit
def msblock_forward(x_nchw, wc, bc, w3, bl):
    """x_nchw: [N, 512, 7, 7] f32.  Returns [N, 49] softmax probabilities (f32)."""
    n, c_in, h, w = x_nchw.shape
    assert (c_in, h, w) == (C_IN, H, W)

    # [N, C_IN, H, W] -> [HW, N, C_IN] -> [HW*N, C_IN]  (rows ordered (hw, n)).
    # This is the single remaining XLA op on the activation path.
    x_rows = jnp.transpose(x_nchw.reshape(n, C_IN, HW), (2, 0, 1)).reshape(HW * n, C_IN)

    kernel = functools.partial(_msblock_kernel, batch=n)
    return pl.pallas_call(
        kernel,
        out_shape=jax.ShapeDtypeStruct((n, C_OUT), jnp.float32),
        in_specs=[
            _full_spec((HW * n, C_IN)),
            _full_spec((C_IN, C_MID)),
            _full_spec((1, C_MID)),
            _full_spec((HW, C_MID, C_OUT)),
            _full_spec((1, C_OUT)),
        ],
        out_specs=_full_spec((n, C_OUT)),
    )(x_rows, wc, bc, w3, bl)


def msblock_reference(x_nchw, conv_w, conv_b, lin_w, lin_b):
    """Pure-jnp f32 reference mirroring the PyTorch forward (eval mode)."""
    n = x_nchw.shape[0]
    y = jnp.einsum("nchw,oc->nohw", x_nchw, conv_w.reshape(C_MID, C_IN)) + conv_b[
        None, :, None, None
    ]
    y = jnp.maximum(y, 0.0)
    flat = y.reshape(n, -1)                       # PyTorch flatten order (c*49 + hw)
    logits = flat @ lin_w.T + lin_b
    return jax.nn.softmax(logits, axis=1)


if __name__ == "__main__":
    key = jax.random.PRNGKey(0)
    k_x, k_cw, k_cb, k_lw, k_lb = jax.random.split(key, 5)

    x = jax.random.normal(k_x, (N, C_IN, H, W), dtype=jnp.float32)
    conv_w = jax.random.normal(k_cw, (C_MID, C_IN, 1, 1), dtype=jnp.float32) * 0.02
    conv_b = jax.random.normal(k_cb, (C_MID,), dtype=jnp.float32) * 0.02
    lin_w = jax.random.normal(k_lw, (C_OUT, FLAT), dtype=jnp.float32) * 0.02
    lin_b = jax.random.normal(k_lb, (C_OUT,), dtype=jnp.float32) * 0.02

    # Hoisted, one-time weight preparation (not part of the forward hot path).
    params = prepare_msblock_params(conv_w, conv_b, lin_w, lin_b)

    out = msblock_forward(x, *params)
    out = jax.block_until_ready(out)

    ref = msblock_reference(x, conv_w, conv_b, lin_w, lin_b)
    assert out.shape == (N, C_OUT)
    max_err = float(jnp.max(jnp.abs(out - ref)))
    # bf16 weights/activations on the MXU with f32 accumulation: relaxed tolerance.
    assert jnp.allclose(out, ref, atol=2e-3, rtol=2e-2), (
        f"mismatch vs reference: max abs err {max_err}"
    )
    assert jnp.allclose(jnp.sum(out, axis=1), 1.0, atol=1e-5), (
        "softmax rows must sum to 1"
    )

    print("KERNEL_OK")
</pallas_src>

<mosaic_0001>
module attributes {stable_mosaic.version = 11 : i64} {
  func.func @_msblock_kernel(%arg0: memref<98x512xf32, #tpu.memory_space<vmem>>, %arg1: memref<512x100xbf16, #tpu.memory_space<vmem>>, %arg2: memref<1x100xf32, #tpu.memory_space<vmem>>, %arg3: memref<49x100x49xbf16, #tpu.memory_space<vmem>>, %arg4: memref<1x49xf32, #tpu.memory_space<vmem>>, %arg5: memref<2x49xf32, #tpu.memory_space<vmem>>) attributes {dimension_semantics = [], scalar_prefetch = 0 : i64, scratch_operands = 0 : i64, tpu.core_type = #tpu.core_type<tc>} {
    %c0 = arith.constant 0 : index
    %c0_0 = arith.constant 0 : index
    %0 = vector.load %arg0[%c0, %c0_0] : memref<98x512xf32, #tpu.memory_space<vmem>>, vector<98x512xf32>
    %1 = arith.truncf %0 : vector<98x512xf32> to vector<98x512xbf16>
    %c0_1 = arith.constant 0 : index
    %c0_2 = arith.constant 0 : index
    %2 = vector.load %arg1[%c0_1, %c0_2] : memref<512x100xbf16, #tpu.memory_space<vmem>>, vector<512x100xbf16>
    %cst = arith.constant dense<0.000000e+00> : vector<98x100xf32>
    %3 = tpu.matmul %1, %2, %cst {dimension_numbers = #tpu.dot_dimension_numbers<[1], [0], [0], [1], [0, 0, 1, 1], [], []>} : vector<98x512xbf16>, vector<512x100xbf16>, vector<98x100xf32> -> vector<98x100xf32>
    %c0_3 = arith.constant 0 : index
    %c0_4 = arith.constant 0 : index
    %4 = vector.load %arg2[%c0_3, %c0_4] : memref<1x100xf32, #tpu.memory_space<vmem>>, vector<1x100xf32>
    %5 = vector.broadcast %4 : vector<1x100xf32> to vector<98x100xf32>
    %6 = arith.addf %3, %5 : vector<98x100xf32>
    %cst_5 = arith.constant 0.000000e+00 : f32
    %7 = vector.broadcast %cst_5 : f32 to vector<98x100xf32>
    %8 = arith.maximumf %6, %7 : vector<98x100xf32>
    %cst_6 = arith.constant 0.000000e+00 : f32
    %9 = vector.broadcast %cst_6 : f32 to vector<2x49xf32>
    %10 = vector.extract_strided_slice %8 {offsets = [0, 0], sizes = [2, 100], strides = [1, 1]} : vector<98x100xf32> to vector<2x100xf32>
    %11 = arith.truncf %10 : vector<2x100xf32> to vector<2x100xbf16>
    %c0_7 = arith.constant 0 : index
    %c0_8 = arith.constant 0 : index
    %c0_9 = arith.constant 0 : index
    %12 = vector.load %arg3[%c0_7, %c0_8, %c0_9] : memref<49x100x49xbf16, #tpu.memory_space<vmem>>, vector<1x100x49xbf16>
    %13 = vector.shape_cast %12 : vector<1x100x49xbf16> to vector<100x49xbf16>
    %cst_10 = arith.constant dense<0.000000e+00> : vector<2x49xf32>
    %14 = tpu.matmul %11, %13, %cst_10 {dimension_numbers = #tpu.dot_dimension_numbers<[1], [0], [0], [1], [0, 0, 1, 1], [], []>} : vector<2x100xbf16>, vector<100x49xbf16>, vector<2x49xf32> -> vector<2x49xf32>
    %15 = arith.addf %9, %14 : vector<2x49xf32>
    %16 = vector.extract_strided_slice %8 {offsets = [2, 0], sizes = [2, 100], strides = [1, 1]} : vector<98x100xf32> to vector<2x100xf32>
    %17 = arith.truncf %16 : vector<2x100xf32> to vector<2x100xbf16>
    %c1 = arith.constant 1 : index
    %c0_11 = arith.constant 0 : index
    %c0_12 = arith.constant 0 : index
    %18 = vector.load %arg3[%c1, %c0_11, %c0_12] : memref<49x100x49xbf16, #tpu.memory_space<vmem>>, vector<1x100x49xbf16>
    %19 = vector.shape_cast %18 : vector<1x100x49xbf16> to vector<100x49xbf16>
    %cst_13 = arith.constant dense<0.000000e+00> : vector<2x49xf32>
    %20 = tpu.matmul %17, %19, %cst_13 {dimension_numbers = #tpu.dot_dimension_numbers<[1], [0], [0], [1], [0, 0, 1, 1], [], []>} : vector<2x100xbf16>, vector<100x49xbf16>, vector<2x49xf32> -> vector<2x49xf32>
    %21 = arith.addf %15, %20 : vector<2x49xf32>
    %22 = vector.extract_strided_slice %8 {offsets = [4, 0], sizes = [2, 100], strides = [1, 1]} : vector<98x100xf32> to vector<2x100xf32>
    %23 = arith.truncf %22 : vector<2x100xf32> to vector<2x100xbf16>
    %c2 = arith.constant 2 : index
    %c0_14 = arith.constant 0 : index
    %c0_15 = arith.constant 0 : index
    %24 = vector.load %arg3[%c2, %c0_14, %c0_15] : memref<49x100x49xbf16, #tpu.memory_space<vmem>>, vector<1x100x49xbf16>
    %25 = vector.shape_cast %24 : vector<1x100x49xbf16> to vector<100x49xbf16>
    %cst_16 = arith.constant dense<0.000000e+00> : vector<2x49xf32>
    %26 = tpu.matmul %23, %25, %cst_16 {dimension_numbers = #tpu.dot_dimension_numbers<[1], [0], [0], [1], [0, 0, 1, 1], [], []>} : vector<2x100xbf16>, vector<100x49xbf16>, vector<2x49xf32> -> vector<2x49xf32>
    %27 = arith.addf %21, %26 : vector<2x49xf32>
    %28 = vector.extract_strided_slice %8 {offsets = [6, 0], sizes = [2, 100], strides = [1, 1]} : vector<98x100xf32> to vector<2x100xf32>
    %29 = arith.truncf %28 : vector<2x100xf32> to vector<2x100xbf16>
    %c3 = arith.constant 3 : index
    %c0_17 = arith.constant 0 : index
    %c0_18 = arith.constant 0 : index
    %30 = vector.load %arg3[%c3, %c0_17, %c0_18] : memref<49x100x49xbf16, #tpu.memory_space<vmem>>, vector<1x100x49xbf16>
    %31 = vector.shape_cast %30 : vector<1x100x49xbf16> to vector<100x49xbf16>
    %cst_19 = arith.constant dense<0.000000e+00> : vector<2x49xf32>
    %32 = tpu.matmul %29, %31, %cst_19 {dimension_numbers = #tpu.dot_dimension_numbers<[1], [0], [0], [1], [0, 0, 1, 1], [], []>} : vector<2x100xbf16>, vector<100x49xbf16>, vector<2x49xf32> -> vector<2x49xf32>
    %33 = arith.addf %27, %32 : vector<2x49xf32>
    %34 = vector.extract_strided_slice %8 {offsets = [8, 0], sizes = [2, 100], strides = [1, 1]} : vector<98x100xf32> to vector<2x100xf32>
    %35 = arith.truncf %34 : vector<2x100xf32> to vector<2x100xbf16>
    %c4 = arith.constant 4 : index
    %c0_20 = arith.constant 0 : index
    %c0_21 = arith.constant 0 : index
    %36 = vector.load %arg3[%c4, %c0_20, %c0_21] : memref<49x100x49xbf16, #tpu.memory_space<vmem>>, vector<1x100x49xbf16>
    %37 = vector.shape_cast %36 : vector<1x100x49xbf16> to vector<100x49xbf16>
    %cst_22 = arith.constant dense<0.000000e+00> : vector<2x49xf32>
    %38 = tpu.matmul %35, %37, %cst_22 {dimension_numbers = #tpu.dot_dimension_numbers<[1], [0], [0], [1], [0, 0, 1, 1], [], []>} : vector<2x100xbf16>, vector<100x49xbf16>, vector<2x49xf32> -> vector<2x49xf32>
    %39 = arith.addf %33, %38 : vector<2x49xf32>
    %40 = vector.extract_strided_slice %8 {offsets = [10, 0], sizes = [2, 100], strides = [1, 1]} : vector<98x100xf32> to vector<2x100xf32>
    %41 = arith.truncf %40 : vector<2x100xf32> to vector<2x100xbf16>
    %c5 = arith.constant 5 : index
    %c0_23 = arith.constant 0 : index
    %c0_24 = arith.constant 0 : index
    %42 = vector.load %arg3[%c5, %c0_23, %c0_24] : memref<49x100x49xbf16, #tpu.memory_space<vmem>>, vector<1x100x49xbf16>
    %43 = vector.shape_cast %42 : vector<1x100x49xbf16> to vector<100x49xbf16>
    %cst_25 = arith.constant dense<0.000000e+00> : vector<2x49xf32>
    %44 = tpu.matmul %41, %43, %cst_25 {dimension_numbers = #tpu.dot_dimension_numbers<[1], [0], [0], [1], [0, 0, 1, 1], [], []>} : vector<2x100xbf16>, vector<100x49xbf16>, vector<2x49xf32> -> vector<2x49xf32>
    %45 = arith.addf %39, %44 : vector<2x49xf32>
    %46 = vector.extract_strided_slice %8 {offsets = [12, 0], sizes = [2, 100], strides = [1, 1]} : vector<98x100xf32> to vector<2x100xf32>
    %47 = arith.truncf %46 : vector<2x100xf32> to vector<2x100xbf16>
    %c6 = arith.constant 6 : index
    %c0_26 = arith.constant 0 : index
    %c0_27 = arith.constant 0 : index
    %48 = vector.load %arg3[%c6, %c0_26, %c0_27] : memref<49x100x49xbf16, #tpu.memory_space<vmem>>, vector<1x100x49xbf16>
    %49 = vector.shape_cast %48 : vector<1x100x49xbf16> to vector<100x49xbf16>
    %cst_28 = arith.constant dense<0.000000e+00> : vector<2x49xf32>
    %50 = tpu.matmul %47, %49, %cst_28 {dimension_numbers = #tpu.dot_dimension_numbers<[1], [0], [0], [1], [0, 0, 1, 1], [], []>} : vector<2x100xbf16>, vector<100x49xbf16>, vector<2x49xf32> -> vector<2x49xf32>
    %51 = arith.addf %45, %50 : vector<2x49xf32>
    %52 = vector.extract_strided_slice %8 {offsets = [14, 0], sizes = [2, 100], strides = [1, 1]} : vector<98x100xf32> to vector<2x100xf32>
    %53 = arith.truncf %52 : vector<2x100xf32> to vector<2x100xbf16>
    %c7 = arith.constant 7 : index
    %c0_29 = arith.constant 0 : index
    %c0_30 = arith.constant 0 : index
    %54 = vector.load %arg3[%c7, %c0_29, %c0_30] : memref<49x100x49xbf16, #tpu.memory_space<vmem>>, vector<1x100x49xbf16>
    %55 = vector.shape_cast %54 : vector<1x100x49xbf16> to vector<100x49xbf16>
    %cst_31 = arith.constant dense<0.000000e+00> : vector<2x49xf32>
    %56 = tpu.matmul %53, %55, %cst_31 {dimension_numbers = #tpu.dot_dimension_numbers<[1], [0], [0], [1], [0, 0, 1, 1], [], []>} : vector<2x100xbf16>, vector<100x49xbf16>, vector<2x49xf32> -> vector<2x49xf32>
    %57 = arith.addf %51, %56 : vector<2x49xf32>
    %58 = vector.extract_strided_slice %8 {offsets = [16, 0], sizes = [2, 100], strides = [1, 1]} : vector<98x100xf32> to vector<2x100xf32>
    %59 = arith.truncf %58 : vector<2x100xf32> to vector<2x100xbf16>
    %c8 = arith.constant 8 : index
    %c0_32 = arith.constant 0 : index
    %c0_33 = arith.constant 0 : index
    %60 = vector.load %arg3[%c8, %c0_32, %c0_33] : memref<49x100x49xbf16, #tpu.memory_space<vmem>>, vector<1x100x49xbf16>
    %61 = vector.shape_cast %60 : vector<1x100x49xbf16> to vector<100x49xbf16>
    %cst_34 = arith.constant dense<0.000000e+00> : vector<2x49xf32>
    %62 = tpu.matmul %59, %61, %cst_34 {dimension_numbers = #tpu.dot_dimension_numbers<[1], [0], [0], [1], [0, 0, 1, 1], [], []>} : vector<2x100xbf16>, vector<100x49xbf16>, vector<2x49xf32> -> vector<2x49xf32>
    %63 = arith.addf %57, %62 : vector<2x49xf32>
    %64 = vector.extract_strided_slice %8 {offsets = [18, 0], sizes = [2, 100], strides = [1, 1]} : vector<98x100xf32> to vector<2x100xf32>
    %65 = arith.truncf %64 : vector<2x100xf32> to vector<2x100xbf16>
    %c9 = arith.constant 9 : index
    %c0_35 = arith.constant 0 : index
    %c0_36 = arith.constant 0 : index
    %66 = vector.load %arg3[%c9, %c0_35, %c0_36] : memref<49x100x49xbf16, #tpu.memory_space<vmem>>, vector<1x100x49xbf16>
    %67 = vector.shape_cast %66 : vector<1x100x49xbf16> to vector<100x49xbf16>
    %cst_37 = arith.constant dense<0.000000e+00> : vector<2x49xf32>
    %68 = tpu.matmul %65, %67, %cst_37 {dimension_numbers = #tpu.dot_dimension_numbers<[1], [0], [0], [1], [0, 0, 1, 1], [], []>} : vector<2x100xbf16>, vector<100x49xbf16>, vector<2x49xf32> -> vector<2x49xf32>
    %69 = arith.addf %63, %68 : vector<2x49xf32>
    %70 = vector.extract_strided_slice %8 {offsets = [20, 0], sizes = [2, 100], strides = [1, 1]} : vector<98x100xf32> to vector<2x100xf32>
    %71 = arith.truncf %70 : vector<2x100xf32> to vector<2x100xbf16>
    %c10 = arith.constant 10 : index
    %c0_38 = arith.constant 0 : index
    %c0_39 = arith.constant 0 : index
    %72 = vector.load %arg3[%c10, %c0_38, %c0_39] : memref<49x100x49xbf16, #tpu.memory_space<vmem>>, vector<1x100x49xbf16>
    %73 = vector.shape_cast %72 : vector<1x100x49xbf16> to vector<100x49xbf16>
    %cst_40 = arith.constant dense<0.000000e+00> : vector<2x49xf32>
    %74 = tpu.matmul %71, %73, %cst_40 {dimension_numbers = #tpu.dot_dimension_numbers<[1], [0], [0], [1], [0, 0, 1, 1], [], []>} : vector<2x100xbf16>, vector<100x49xbf16>, vector<2x49xf32> -> vector<2x49xf32>
    %75 = arith.addf %69, %74 : vector<2x49xf32>
    %76 = vector.extract_strided_slice %8 {offsets = [22, 0], sizes = [2, 100], strides = [1, 1]} : vector<98x100xf32> to vector<2x100xf32>
    %77 = arith.truncf %76 : vector<2x100xf32> to vector<2x100xbf16>
    %c11 = arith.constant 11 : index
    %c0_41 = arith.constant 0 : index
    %c0_42 = arith.constant 0 : index
    %78 = vector.load %arg3[%c11, %c0_41, %c0_42] : memref<49x100x49xbf16, #tpu.memory_space<vmem>>, vector<1x100x49xbf16>
    %79 = vector.shape_cast %78 : vector<1x100x49xbf16> to vector<100x49xbf16>
    %cst_43 = arith.constant dense<0.000000e+00> : vector<2x49xf32>
    %80 = tpu.matmul %77, %79, %cst_43 {dimension_numbers = #tpu.dot_dimension_numbers<[1], [0], [0], [1], [0, 0, 1, 1], [], []>} : vector<2x100xbf16>, vector<100x49xbf16>, vector<2x49xf32> -> vector<2x49xf32>
    %81 = arith.addf %75, %80 : vector<2x49xf32>
    %82 = vector.extract_strided_slice %8 {offsets = [24, 0], sizes = [2, 100], strides = [1, 1]} : vector<98x100xf32> to vector<2x100xf32>
    %83 = arith.truncf %82 : vector<2x100xf32> to vector<2x100xbf16>
    %c12 = arith.constant 12 : index
    %c0_44 = arith.constant 0 : index
    %c0_45 = arith.constant 0 : index
    %84 = vector.load %arg3[%c12, %c0_44, %c0_45] : memref<49x100x49xbf16, #tpu.memory_space<vmem>>, vector<1x100x49xbf16>
    %85 = vector.shape_cast %84 : vector<1x100x49xbf16> to vector<100x49xbf16>
    %cst_46 = arith.constant dense<0.000000e+00> : vector<2x49xf32>
    %86 = tpu.matmul %83, %85, %cst_46 {dimension_numbers = #tpu.dot_dimension_numbers<[1], [0], [0], [1], [0, 0, 1, 1], [], []>} : vector<2x100xbf16>, vector<100x49xbf16>, vector<2x49xf32> -> vector<2x49xf32>
    %87 = arith.addf %81, %86 : vector<2x49xf32>
    %88 = vector.extract_strided_slice %8 {offsets = [26, 0], sizes = [2, 100], strides = [1, 1]} : vector<98x100xf32> to vector<2x100xf32>
    %89 = arith.truncf %88 : vector<2x100xf32> to vector<2x100xbf16>
    %c13 = arith.constant 13 : index
    %c0_47 = arith.constant 0 : index
    %c0_48 = arith.constant 0 : index
    %90 = vector.load %arg3[%c13, %c0_47, %c0_48] : memref<49x100x49xbf16, #tpu.memory_space<vmem>>, vector<1x100x49xbf16>
    %91 = vector.shape_cast %90 : vector<1x100x49xbf16> to vector<100x49xbf16>
    %cst_49 = arith.constant dense<0.000000e+00> : vector<2x49xf32>
    %92 = tpu.matmul %89, %91, %cst_49 {dimension_numbers = #tpu.dot_dimension_numbers<[1], [0], [0], [1], [0, 0, 1, 1], [], []>} : vector<2x100xbf16>, vector<100x49xbf16>, vector<2x49xf32> -> vector<2x49xf32>
    %93 = arith.addf %87, %92 : vector<2x49xf32>
    %94 = vector.extract_strided_slice %8 {offsets = [28, 0], sizes = [2, 100], strides = [1, 1]} : vector<98x100xf32> to vector<2x100xf32>
    %95 = arith.truncf %94 : vector<2x100xf32> to vector<2x100xbf16>
    %c14 = arith.constant 14 : index
    %c0_50 = arith.constant 0 : index
    %c0_51 = arith.constant 0 : index
    %96 = vector.load %arg3[%c14, %c0_50, %c0_51] : memref<49x100x49xbf16, #tpu.memory_space<vmem>>, vector<1x100x49xbf16>
    %97 = vector.shape_cast %96 : vector<1x100x49xbf16> to vector<100x49xbf16>
    %cst_52 = arith.constant dense<0.000000e+00> : vector<2x49xf32>
    %98 = tpu.matmul %95, %97, %cst_52 {dimension_numbers = #tpu.dot_dimension_numbers<[1], [0], [0], [1], [0, 0, 1, 1], [], []>} : vector<2x100xbf16>, vector<100x49xbf16>, vector<2x49xf32> -> vector<2x49xf32>
    %99 = arith.addf %93, %98 : vector<2x49xf32>
    %100 = vector.extract_strided_slice %8 {offsets = [30, 0], sizes = [2, 100], strides = [1, 1]} : vector<98x100xf32> to vector<2x100xf32>
    %101 = arith.truncf %100 : vector<2x100xf32> to vector<2x100xbf16>
    %c15 = arith.constant 15 : index
    %c0_53 = arith.constant 0 : index
    %c0_54 = arith.constant 0 : index
    %102 = vector.load %arg3[%c15, %c0_53, %c0_54] : memref<49x100x49xbf16, #tpu.memory_space<vmem>>, vector<1x100x49xbf16>
    %103 = vector.shape_cast %102 : vector<1x100x49xbf16> to vector<100x49xbf16>
    %cst_55 = arith.constant dense<0.000000e+00> : vector<2x49xf32>
    %104 = tpu.matmul %101, %103, %cst_55 {dimension_numbers = #tpu.dot_dimension_numbers<[1], [0], [0], [1], [0, 0, 1, 1], [], []>} : vector<2x100xbf16>, vector<100x49xbf16>, vector<2x49xf32> -> vector<2x49xf32>
    %105 = arith.addf %99, %104 : vector<2x49xf32>
    %106 = vector.extract_strided_slice %8 {offsets = [32, 0], sizes = [2, 100], strides = [1, 1]} : vector<98x100xf32> to vector<2x100xf32>
    %107 = arith.truncf %106 : vector<2x100xf32> to vector<2x100xbf16>
    %c16 = arith.constant 16 : index
    %c0_56 = arith.constant 0 : index
    %c0_57 = arith.constant 0 : index
    %108 = vector.load %arg3[%c16, %c0_56, %c0_57] : memref<49x100x49xbf16, #tpu.memory_space<vmem>>, vector<1x100x49xbf16>
    %109 = vector.shape_cast %108 : vector<1x100x49xbf16> to vector<100x49xbf16>
    %cst_58 = arith.constant dense<0.000000e+00> : vector<2x49xf32>
    %110 = tpu.matmul %107, %109, %cst_58 {dimension_numbers = #tpu.dot_dimension_numbers<[1], [0], [0], [1], [0, 0, 1, 1], [], []>} : vector<2x100xbf16>, vector<100x49xbf16>, vector<2x49xf32> -> vector<2x49xf32>
    %111 = arith.addf %105, %110 : vector<2x49xf32>
    %112 = vector.extract_strided_slice %8 {offsets = [34, 0], sizes = [2, 100], strides = [1, 1]} : vector<98x100xf32> to vector<2x100xf32>
    %113 = arith.truncf %112 : vector<2x100xf32> to vector<2x100xbf16>
    %c17 = arith.constant 17 : index
    %c0_59 = arith.constant 0 : index
    %c0_60 = arith.constant 0 : index
    %114 = vector.load %arg3[%c17, %c0_59, %c0_60] : memref<49x100x49xbf16, #tpu.memory_space<vmem>>, vector<1x100x49xbf16>
    %115 = vector.shape_cast %114 : vector<1x100x49xbf16> to vector<100x49xbf16>
    %cst_61 = arith.constant dense<0.000000e+00> : vector<2x49xf32>
    %116 = tpu.matmul %113, %115, %cst_61 {dimension_numbers = #tpu.dot_dimension_numbers<[1], [0], [0], [1], [0, 0, 1, 1], [], []>} : vector<2x100xbf16>, vector<100x49xbf16>, vector<2x49xf32> -> vector<2x49xf32>
    %117 = arith.addf %111, %116 : vector<2x49xf32>
    %118 = vector.extract_strided_slice %8 {offsets = [36, 0], sizes = [2, 100], strides = [1, 1]} : vector<98x100xf32> to vector<2x100xf32>
    %119 = arith.truncf %118 : vector<2x100xf32> to vector<2x100xbf16>
    %c18 = arith.constant 18 : index
    %c0_62 = arith.constant 0 : index
    %c0_63 = arith.constant 0 : index
    %120 = vector.load %arg3[%c18, %c0_62, %c0_63] : memref<49x100x49xbf16, #tpu.memory_space<vmem>>, vector<1x100x49xbf16>
    %121 = vector.shape_cast %120 : vector<1x100x49xbf16> to vector<100x49xbf16>
    %cst_64 = arith.constant dense<0.000000e+00> : vector<2x49xf32>
    %122 = tpu.matmul %119, %121, %cst_64 {dimension_numbers = #tpu.dot_dimension_numbers<[1], [0], [0], [1], [0, 0, 1, 1], [], []>} : vector<2x100xbf16>, vector<100x49xbf16>, vector<2x49xf32> -> vector<2x49xf32>
    %123 = arith.addf %117, %122 : vector<2x49xf32>
    %124 = vector.extract_strided_slice %8 {offsets = [38, 0], sizes = [2, 100], strides = [1, 1]} : vector<98x100xf32> to vector<2x100xf32>
    %125 = arith.truncf %124 : vector<2x100xf32> to vector<2x100xbf16>
    %c19 = arith.constant 19 : index
    %c0_65 = arith.constant 0 : index
    %c0_66 = arith.constant 0 : index
    %126 = vector.load %arg3[%c19, %c0_65, %c0_66] : memref<49x100x49xbf16, #tpu.memory_space<vmem>>, vector<1x100x49xbf16>
    %127 = vector.shape_cast %126 : vector<1x100x49xbf16> to vector<100x49xbf16>
    %cst_67 = arith.constant dense<0.000000e+00> : vector<2x49xf32>
    %128 = tpu.matmul %125, %127, %cst_67 {dimension_numbers = #tpu.dot_dimension_numbers<[1], [0], [0], [1], [0, 0, 1, 1], [], []>} : vector<2x100xbf16>, vector<100x49xbf16>, vector<2x49xf32> -> vector<2x49xf32>
    %129 = arith.addf %123, %128 : vector<2x49xf32>
    %130 = vector.extract_strided_slice %8 {offsets = [40, 0], sizes = [2, 100], strides = [1, 1]} : vector<98x100xf32> to vector<2x100xf32>
    %131 = arith.truncf %130 : vector<2x100xf32> to vector<2x100xbf16>
    %c20 = arith.constant 20 : index
    %c0_68 = arith.constant 0 : index
    %c0_69 = arith.constant 0 : index
    %132 = vector.load %arg3[%c20, %c0_68, %c0_69] : memref<49x100x49xbf16, #tpu.memory_space<vmem>>, vector<1x100x49xbf16>
    %133 = vector.shape_cast %132 : vector<1x100x49xbf16> to vector<100x49xbf16>
    %cst_70 = arith.constant dense<0.000000e+00> : vector<2x49xf32>
    %134 = tpu.matmul %131, %133, %cst_70 {dimension_numbers = #tpu.dot_dimension_numbers<[1], [0], [0], [1], [0, 0, 1, 1], [], []>} : vector<2x100xbf16>, vector<100x49xbf16>, vector<2x49xf32> -> vector<2x49xf32>
    %135 = arith.addf %129, %134 : vector<2x49xf32>
    %136 = vector.extract_strided_slice %8 {offsets = [42, 0], sizes = [2, 100], strides = [1, 1]} : vector<98x100xf32> to vector<2x100xf32>
    %137 = arith.truncf %136 : vector<2x100xf32> to vector<2x100xbf16>
    %c21 = arith.constant 21 : index
    %c0_71 = arith.constant 0 : index
    %c0_72 = arith.constant 0 : index
    %138 = vector.load %arg3[%c21, %c0_71, %c0_72] : memref<49x100x49xbf16, #tpu.memory_space<vmem>>, vector<1x100x49xbf16>
    %139 = vector.shape_cast %138 : vector<1x100x49xbf16> to vector<100x49xbf16>
    %cst_73 = arith.constant dense<0.000000e+00> : vector<2x49xf32>
    %140 = tpu.matmul %137, %139, %cst_73 {dimension_numbers = #tpu.dot_dimension_numbers<[1], [0], [0], [1], [0, 0, 1, 1], [], []>} : vector<2x100xbf16>, vector<100x49xbf16>, vector<2x49xf32> -> vector<2x49xf32>
    %141 = arith.addf %135, %140 : vector<2x49xf32>
    %142 = vector.extract_strided_slice %8 {offsets = [44, 0], sizes = [2, 100], strides = [1, 1]} : vector<98x100xf32> to vector<2x100xf32>
    %143 = arith.truncf %142 : vector<2x100xf32> to vector<2x100xbf16>
    %c22 = arith.constant 22 : index
    %c0_74 = arith.constant 0 : index
    %c0_75 = arith.constant 0 : index
    %144 = vector.load %arg3[%c22, %c0_74, %c0_75] : memref<49x100x49xbf16, #tpu.memory_space<vmem>>, vector<1x100x49xbf16>
    %145 = vector.shape_cast %144 : vector<1x100x49xbf16> to vector<100x49xbf16>
    %cst_76 = arith.constant dense<0.000000e+00> : vector<2x49xf32>
    %146 = tpu.matmul %143, %145, %cst_76 {dimension_numbers = #tpu.dot_dimension_numbers<[1], [0], [0], [1], [0, 0, 1, 1], [], []>} : vector<2x100xbf16>, vector<100x49xbf16>, vector<2x49xf32> -> vector<2x49xf32>
    %147 = arith.addf %141, %146 : vector<2x49xf32>
    %148 = vector.extract_strided_slice %8 {offsets = [46, 0], sizes = [2, 100], strides = [1, 1]} : vector<98x100xf32> to vector<2x100xf32>
    %149 = arith.truncf %148 : vector<2x100xf32> to vector<2x100xbf16>
    %c23 = arith.constant 23 : index
    %c0_77 = arith.constant 0 : index
    %c0_78 = arith.constant 0 : index
    %150 = vector.load %arg3[%c23, %c0_77, %c0_78] : memref<49x100x49xbf16, #tpu.memory_space<vmem>>, vector<1x100x49xbf16>
    %151 = vector.shape_cast %150 : vector<1x100x49xbf16> to vector<100x49xbf16>
    %cst_79 = arith.constant dense<0.000000e+00> : vector<2x49xf32>
    %152 = tpu.matmul %149, %151, %cst_79 {dimension_numbers = #tpu.dot_dimension_numbers<[1], [0], [0], [1], [0, 0, 1, 1], [], []>} : vector<2x100xbf16>, vector<100x49xbf16>, vector<2x49xf32> -> vector<2x49xf32>
    %153 = arith.addf %147, %152 : vector<2x49xf32>
    %154 = vector.extract_strided_slice %8 {offsets = [48, 0], sizes = [2, 100], strides = [1, 1]} : vector<98x100xf32> to vector<2x100xf32>
    %155 = arith.truncf %154 : vector<2x100xf32> to vector<2x100xbf16>
    %c24 = arith.constant 24 : index
    %c0_80 = arith.constant 0 : index
    %c0_81 = arith.constant 0 : index
    %156 = vector.load %arg3[%c24, %c0_80, %c0_81] : memref<49x100x49xbf16, #tpu.memory_space<vmem>>, vector<1x100x49xbf16>
    %157 = vector.shape_cast %156 : vector<1x100x49xbf16> to vector<100x49xbf16>
    %cst_82 = arith.constant dense<0.000000e+00> : vector<2x49xf32>
    %158 = tpu.matmul %155, %157, %cst_82 {dimension_numbers = #tpu.dot_dimension_numbers<[1], [0], [0], [1], [0, 0, 1, 1], [], []>} : vector<2x100xbf16>, vector<100x49xbf16>, vector<2x49xf32> -> vector<2x49xf32>
    %159 = arith.addf %153, %158 : vector<2x49xf32>
    %160 = vector.extract_strided_slice %8 {offsets = [50, 0], sizes = [2, 100], strides = [1, 1]} : vector<98x100xf32> to vector<2x100xf32>
    %161 = arith.truncf %160 : vector<2x100xf32> to vector<2x100xbf16>
    %c25 = arith.constant 25 : index
    %c0_83 = arith.constant 0 : index
    %c0_84 = arith.constant 0 : index
    %162 = vector.load %arg3[%c25, %c0_83, %c0_84] : memref<49x100x49xbf16, #tpu.memory_space<vmem>>, vector<1x100x49xbf16>
    %163 = vector.shape_cast %162 : vector<1x100x49xbf16> to vector<100x49xbf16>
    %cst_85 = arith.constant dense<0.000000e+00> : vector<2x49xf32>
    %164 = tpu.matmul %161, %163, %cst_85 {dimension_numbers = #tpu.dot_dimension_numbers<[1], [0], [0], [1], [0, 0, 1, 1], [], []>} : vector<2x100xbf16>, vector<100x49xbf16>, vector<2x49xf32> -> vector<2x49xf32>
    %165 = arith.addf %159, %164 : vector<2x49xf32>
    %166 = vector.extract_strided_slice %8 {offsets = [52, 0], sizes = [2, 100], strides = [1, 1]} : vector<98x100xf32> to vector<2x100xf32>
    %167 = arith.truncf %166 : vector<2x100xf32> to vector<2x100xbf16>
    %c26 = arith.constant 26 : index
    %c0_86 = arith.constant 0 : index
    %c0_87 = arith.constant 0 : index
    %168 = vector.load %arg3[%c26, %c0_86, %c0_87] : memref<49x100x49xbf16, #tpu.memory_space<vmem>>, vector<1x100x49xbf16>
    %169 = vector.shape_cast %168 : vector<1x100x49xbf16> to vector<100x49xbf16>
    %cst_88 = arith.constant dense<0.000000e+00> : vector<2x49xf32>
    %170 = tpu.matmul %167, %169, %cst_88 {dimension_numbers = #tpu.dot_dimension_numbers<[1], [0], [0], [1], [0, 0, 1, 1], [], []>} : vector<2x100xbf16>, vector<100x49xbf16>, vector<2x49xf32> -> vector<2x49xf32>
    %171 = arith.addf %165, %170 : vector<2x49xf32>
    %172 = vector.extract_strided_slice %8 {offsets = [54, 0], sizes = [2, 100], strides = [1, 1]} : vector<98x100xf32> to vector<2x100xf32>
    %173 = arith.truncf %172 : vector<2x100xf32> to vector<2x100xbf16>
    %c27 = arith.constant 27 : index
    %c0_89 = arith.constant 0 : index
    %c0_90 = arith.constant 0 : index
    %174 = vector.load %arg3[%c27, %c0_89, %c0_90] : memref<49x100x49xbf16, #tpu.memory_space<vmem>>, vector<1x100x49xbf16>
    %175 = vector.shape_cast %174 : vector<1x100x49xbf16> to vector<100x49xbf16>
    %cst_91 = arith.constant dense<0.000000e+00> : vector<2x49xf32>
    %176 = tpu.matmul %173, %175, %cst_91 {dimension_numbers = #tpu.dot_dimension_numbers<[1], [0], [0], [1], [0, 0, 1, 1], [], []>} : vector<2x100xbf16>, vector<100x49xbf16>, vector<2x49xf32> -> vector<2x49xf32>
    %177 = arith.addf %171, %176 : vector<2x49xf32>
    %178 = vector.extract_strided_slice %8 {offsets = [56, 0], sizes = [2, 100], strides = [1, 1]} : vector<98x100xf32> to vector<2x100xf32>
    %179 = arith.truncf %178 : vector<2x100xf32> to vector<2x100xbf16>
    %c28 = arith.constant 28 : index
    %c0_92 = arith.constant 0 : index
    %c0_93 = arith.constant 0 : index
    %180 = vector.load %arg3[%c28, %c0_92, %c0_93] : memref<49x100x49xbf16, #tpu.memory_space<vmem>>, vector<1x100x49xbf16>
    %181 = vector.shape_cast %180 : vector<1x100x49xbf16> to vector<100x49xbf16>
    %cst_94 = arith.constant dense<0.000000e+00> : vector<2x49xf32>
    %182 = tpu.matmul %179, %181, %cst_94 {dimension_numbers = #tpu.dot_dimension_numbers<[1], [0], [0], [1], [0, 0, 1, 1], [], []>} : vector<2x100xbf16>, vector<100x49xbf16>, vector<2x49xf32> -> vector<2x49xf32>
    %183 = arith.addf %177, %182 : vector<2x49xf32>
    %184 = vector.extract_strided_slice %8 {offsets = [58, 0], sizes = [2, 100], strides = [1, 1]} : vector<98x100xf32> to vector<2x100xf32>
    %185 = arith.truncf %184 : vector<2x100xf32> to vector<2x100xbf16>
    %c29 = arith.constant 29 : index
    %c0_95 = arith.constant 0 : index
    %c0_96 = arith.constant 0 : index
    %186 = vector.load %arg3[%c29, %c0_95, %c0_96] : memref<49x100x49xbf16, #tpu.memory_space<vmem>>, vector<1x100x49xbf16>
    %187 = vector.shape_cast %186 : vector<1x100x49xbf16> to vector<100x49xbf16>
    %cst_97 = arith.constant dense<0.000000e+00> : vector<2x49xf32>
    %188 = tpu.matmul %185, %187, %cst_97 {dimension_numbers = #tpu.dot_dimension_numbers<[1], [0], [0], [1], [0, 0, 1, 1], [], []>} : vector<2x100xbf16>, vector<100x49xbf16>, vector<2x49xf32> -> vector<2x49xf32>
    %189 = arith.addf %183, %188 : vector<2x49xf32>
    %190 = vector.extract_strided_slice %8 {offsets = [60, 0], sizes = [2, 100], strides = [1, 1]} : vector<98x100xf32> to vector<2x100xf32>
    %191 = arith.truncf %190 : vector<2x100xf32> to vector<2x100xbf16>
    %c30 = arith.constant 30 : index
    %c0_98 = arith.constant 0 : index
    %c0_99 = arith.constant 0 : index
    %192 = vector.load %arg3[%c30, %c0_98, %c0_99] : memref<49x100x49xbf16, #tpu.memory_space<vmem>>, vector<1x100x49xbf16>
    %193 = vector.shape_cast %192 : vector<1x100x49xbf16> to vector<100x49xbf16>
    %cst_100 = arith.constant dense<0.000000e+00> : vector<2x49xf32>
    %194 = tpu.matmul %191, %193, %cst_100 {dimension_numbers = #tpu.dot_dimension_numbers<[1], [0], [0], [1], [0, 0, 1, 1], [], []>} : vector<2x100xbf16>, vector<100x49xbf16>, vector<2x49xf32> -> vector<2x49xf32>
    %195 = arith.addf %189, %194 : vector<2x49xf32>
    %196 = vector.extract_strided_slice %8 {offsets = [62, 0], sizes = [2, 100], strides = [1, 1]} : vector<98x100xf32> to vector<2x100xf32>
    %197 = arith.truncf %196 : vector<2x100xf32> to vector<2x100xbf16>
    %c31 = arith.constant 31 : index
    %c0_101 = arith.constant 0 : index
    %c0_102 = arith.constant 0 : index
    %198 = vector.load %arg3[%c31, %c0_101, %c0_102] : memref<49x100x49xbf16, #tpu.memory_space<vmem>>, vector<1x100x49xbf16>
    %199 = vector.shape_cast %198 : vector<1x100x49xbf16> to vector<100x49xbf16>
    %cst_103 = arith.constant dense<0.000000e+00> : vector<2x49xf32>
    %200 = tpu.matmul %197, %199, %cst_103 {dimension_numbers = #tpu.dot_dimension_numbers<[1], [0], [0], [1], [0, 0, 1, 1], [], []>} : vector<2x100xbf16>, vector<100x49xbf16>, vector<2x49xf32> -> vector<2x49xf32>
    %201 = arith.addf %195, %200 : vector<2x49xf32>
    %202 = vector.extract_strided_slice %8 {offsets = [64, 0], sizes = [2, 100], strides = [1, 1]} : vector<98x100xf32> to vector<2x100xf32>
    %203 = arith.truncf %202 : vector<2x100xf32> to vector<2x100xbf16>
    %c32 = arith.constant 32 : index
    %c0_104 = arith.constant 0 : index
    %c0_105 = arith.constant 0 : index
    %204 = vector.load %arg3[%c32, %c0_104, %c0_105] : memref<49x100x49xbf16, #tpu.memory_space<vmem>>, vector<1x100x49xbf16>
    %205 = vector.shape_cast %204 : vector<1x100x49xbf16> to vector<100x49xbf16>
    %cst_106 = arith.constant dense<0.000000e+00> : vector<2x49xf32>
    %206 = tpu.matmul %203, %205, %cst_106 {dimension_numbers = #tpu.dot_dimension_numbers<[1], [0], [0], [1], [0, 0, 1, 1], [], []>} : vector<2x100xbf16>, vector<100x49xbf16>, vector<2x49xf32> -> vector<2x49xf32>
    %207 = arith.addf %201, %206 : vector<2x49xf32>
    %208 = vector.extract_strided_slice %8 {offsets = [66, 0], sizes = [2, 100], strides = [1, 1]} : vector<98x100xf32> to vector<2x100xf32>
    %209 = arith.truncf %208 : vector<2x100xf32> to vector<2x100xbf16>
    %c33 = arith.constant 33 : index
    %c0_107 = arith.constant 0 : index
    %c0_108 = arith.constant 0 : index
    %210 = vector.load %arg3[%c33, %c0_107, %c0_108] : memref<49x100x49xbf16, #tpu.memory_space<vmem>>, vector<1x100x49xbf16>
    %211 = vector.shape_cast %210 : vector<1x100x49xbf16> to vector<100x49xbf16>
    %cst_109 = arith.constant dense<0.000000e+00> : vector<2x49xf32>
    %212 = tpu.matmul %209, %211, %cst_109 {dimension_numbers = #tpu.dot_dimension_numbers<[1], [0], [0], [1], [0, 0, 1, 1], [], []>} : vector<2x100xbf16>, vector<100x49xbf16>, vector<2x49xf32> -> vector<2x49xf32>
    %213 = arith.addf %207, %212 : vector<2x49xf32>
    %214 = vector.extract_strided_slice %8 {offsets = [68, 0], sizes = [2, 100], strides = [1, 1]} : vector<98x100xf32> to vector<2x100xf32>
    %215 = arith.truncf %214 : vector<2x100xf32> to vector<2x100xbf16>
    %c34 = arith.constant 34 : index
    %c0_110 = arith.constant 0 : index
    %c0_111 = arith.constant 0 : index
    %216 = vector.load %arg3[%c34, %c0_110, %c0_111] : memref<49x100x49xbf16, #tpu.memory_space<vmem>>, vector<1x100x49xbf16>
    %217 = vector.shape_cast %216 : vector<1x100x49xbf16> to vector<100x49xbf16>
    %cst_112 = arith.constant dense<0.000000e+00> : vector<2x49xf32>
    %218 = tpu.matmul %215, %217, %cst_112 {dimension_numbers = #tpu.dot_dimension_numbers<[1], [0], [0], [1], [0, 0, 1, 1], [], []>} : vector<2x100xbf16>, vector<100x49xbf16>, vector<2x49xf32> -> vector<2x49xf32>
    %219 = arith.addf %213, %218 : vector<2x49xf32>
    %220 = vector.extract_strided_slice %8 {offsets = [70, 0], sizes = [2, 100], strides = [1, 1]} : vector<98x100xf32> to vector<2x100xf32>
    %221 = arith.truncf %220 : vector<2x100xf32> to vector<2x100xbf16>
    %c35 = arith.constant 35 : index
    %c0_113 = arith.constant 0 : index
    %c0_114 = arith.constant 0 : index
    %222 = vector.load %arg3[%c35, %c0_113, %c0_114] : memref<49x100x49xbf16, #tpu.memory_space<vmem>>, vector<1x100x49xbf16>
    %223 = vector.shape_cast %222 : vector<1x100x49xbf16> to vector<100x49xbf16>
    %cst_115 = arith.constant dense<0.000000e+00> : vector<2x49xf32>
    %224 = tpu.matmul %221, %223, %cst_115 {dimension_numbers = #tpu.dot_dimension_numbers<[1], [0], [0], [1], [0, 0, 1, 1], [], []>} : vector<2x100xbf16>, vector<100x49xbf16>, vector<2x49xf32> -> vector<2x49xf32>
    %225 = arith.addf %219, %224 : vector<2x49xf32>
    %226 = vector.extract_strided_slice %8 {offsets = [72, 0], sizes = [2, 100], strides = [1, 1]} : vector<98x100xf32> to vector<2x100xf32>
    %227 = arith.truncf %226 : vector<2x100xf32> to vector<2x100xbf16>
    %c36 = arith.constant 36 : index
    %c0_116 = arith.constant 0 : index
    %c0_117 = arith.constant 0 : index
    %228 = vector.load %arg3[%c36, %c0_116, %c0_117] : memref<49x100x49xbf16, #tpu.memory_space<vmem>>, vector<1x100x49xbf16>
    %229 = vector.shape_cast %228 : vector<1x100x49xbf16> to vector<100x49xbf16>
    %cst_118 = arith.constant dense<0.000000e+00> : vector<2x49xf32>
    %230 = tpu.matmul %227, %229, %cst_118 {dimension_numbers = #tpu.dot_dimension_numbers<[1], [0], [0], [1], [0, 0, 1, 1], [], []>} : vector<2x100xbf16>, vector<100x49xbf16>, vector<2x49xf32> -> vector<2x49xf32>
    %231 = arith.addf %225, %230 : vector<2x49xf32>
    %232 = vector.extract_strided_slice %8 {offsets = [74, 0], sizes = [2, 100], strides = [1, 1]} : vector<98x100xf32> to vector<2x100xf32>
    %233 = arith.truncf %232 : vector<2x100xf32> to vector<2x100xbf16>
    %c37 = arith.constant 37 : index
    %c0_119 = arith.constant 0 : index
    %c0_120 = arith.constant 0 : index
    %234 = vector.load %arg3[%c37, %c0_119, %c0_120] : memref<49x100x49xbf16, #tpu.memory_space<vmem>>, vector<1x100x49xbf16>
    %235 = vector.shape_cast %234 : vector<1x100x49xbf16> to vector<100x49xbf16>
    %cst_121 = arith.constant dense<0.000000e+00> : vector<2x49xf32>
    %236 = tpu.matmul %233, %235, %cst_121 {dimension_numbers = #tpu.dot_dimension_numbers<[1], [0], [0], [1], [0, 0, 1, 1], [], []>} : vector<2x100xbf16>, vector<100x49xbf16>, vector<2x49xf32> -> vector<2x49xf32>
    %237 = arith.addf %231, %236 : vector<2x49xf32>
    %238 = vector.extract_strided_slice %8 {offsets = [76, 0], sizes = [2, 100], strides = [1, 1]} : vector<98x100xf32> to vector<2x100xf32>
    %239 = arith.truncf %238 : vector<2x100xf32> to vector<2x100xbf16>
    %c38 = arith.constant 38 : index
    %c0_122 = arith.constant 0 : index
    %c0_123 = arith.constant 0 : index
    %240 = vector.load %arg3[%c38, %c0_122, %c0_123] : memref<49x100x49xbf16, #tpu.memory_space<vmem>>, vector<1x100x49xbf16>
    %241 = vector.shape_cast %240 : vector<1x100x49xbf16> to vector<100x49xbf16>
    %cst_124 = arith.constant dense<0.000000e+00> : vector<2x49xf32>
    %242 = tpu.matmul %239, %241, %cst_124 {dimension_numbers = #tpu.dot_dimension_numbers<[1], [0], [0], [1], [0, 0, 1, 1], [], []>} : vector<2x100xbf16>, vector<100x49xbf16>, vector<2x49xf32> -> vector<2x49xf32>
    %243 = arith.addf %237, %242 : vector<2x49xf32>
    %244 = vector.extract_strided_slice %8 {offsets = [78, 0], sizes = [2, 100], strides = [1, 1]} : vector<98x100xf32> to vector<2x100xf32>
    %245 = arith.truncf %244 : vector<2x100xf32> to vector<2x100xbf16>
    %c39 = arith.constant 39 : index
    %c0_125 = arith.constant 0 : index
    %c0_126 = arith.constant 0 : index
    %246 = vector.load %arg3[%c39, %c0_125, %c0_126] : memref<49x100x49xbf16, #tpu.memory_space<vmem>>, vector<1x100x49xbf16>
    %247 = vector.shape_cast %246 : vector<1x100x49xbf16> to vector<100x49xbf16>
    %cst_127 = arith.constant dense<0.000000e+00> : vector<2x49xf32>
    %248 = tpu.matmul %245, %247, %cst_127 {dimension_numbers = #tpu.dot_dimension_numbers<[1], [0], [0], [1], [0, 0, 1, 1], [], []>} : vector<2x100xbf16>, vector<100x49xbf16>, vector<2x49xf32> -> vector<2x49xf32>
    %249 = arith.addf %243, %248 : vector<2x49xf32>
    %250 = vector.extract_strided_slice %8 {offsets = [80, 0], sizes = [2, 100], strides = [1, 1]} : vector<98x100xf32> to vector<2x100xf32>
    %251 = arith.truncf %250 : vector<2x100xf32> to vector<2x100xbf16>
    %c40 = arith.constant 40 : index
    %c0_128 = arith.constant 0 : index
    %c0_129 = arith.constant 0 : index
    %252 = vector.load %arg3[%c40, %c0_128, %c0_129] : memref<49x100x49xbf16, #tpu.memory_space<vmem>>, vector<1x100x49xbf16>
    %253 = vector.shape_cast %252 : vector<1x100x49xbf16> to vector<100x49xbf16>
    %cst_130 = arith.constant dense<0.000000e+00> : vector<2x49xf32>
    %254 = tpu.matmul %251, %253, %cst_130 {dimension_numbers = #tpu.dot_dimension_numbers<[1], [0], [0], [1], [0, 0, 1, 1], [], []>} : vector<2x100xbf16>, vector<100x49xbf16>, vector<2x49xf32> -> vector<2x49xf32>
    %255 = arith.addf %249, %254 : vector<2x49xf32>
    %256 = vector.extract_strided_slice %8 {offsets = [82, 0], sizes = [2, 100], strides = [1, 1]} : vector<98x100xf32> to vector<2x100xf32>
    %257 = arith.truncf %256 : vector<2x100xf32> to vector<2x100xbf16>
    %c41 = arith.constant 41 : index
    %c0_131 = arith.constant 0 : index
    %c0_132 = arith.constant 0 : index
    %258 = vector.load %arg3[%c41, %c0_131, %c0_132] : memref<49x100x49xbf16, #tpu.memory_space<vmem>>, vector<1x100x49xbf16>
    %259 = vector.shape_cast %258 : vector<1x100x49xbf16> to vector<100x49xbf16>
    %cst_133 = arith.constant dense<0.000000e+00> : vector<2x49xf32>
    %260 = tpu.matmul %257, %259, %cst_133 {dimension_numbers = #tpu.dot_dimension_numbers<[1], [0], [0], [1], [0, 0, 1, 1], [], []>} : vector<2x100xbf16>, vector<100x49xbf16>, vector<2x49xf32> -> vector<2x49xf32>
    %261 = arith.addf %255, %260 : vector<2x49xf32>
    %262 = vector.extract_strided_slice %8 {offsets = [84, 0], sizes = [2, 100], strides = [1, 1]} : vector<98x100xf32> to vector<2x100xf32>
    %263 = arith.truncf %262 : vector<2x100xf32> to vector<2x100xbf16>
    %c42 = arith.constant 42 : index
    %c0_134 = arith.constant 0 : index
    %c0_135 = arith.constant 0 : index
    %264 = vector.load %arg3[%c42, %c0_134, %c0_135] : memref<49x100x49xbf16, #tpu.memory_space<vmem>>, vector<1x100x49xbf16>
    %265 = vector.shape_cast %264 : vector<1x100x49xbf16> to vector<100x49xbf16>
    %cst_136 = arith.constant dense<0.000000e+00> : vector<2x49xf32>
    %266 = tpu.matmul %263, %265, %cst_136 {dimension_numbers = #tpu.dot_dimension_numbers<[1], [0], [0], [1], [0, 0, 1, 1], [], []>} : vector<2x100xbf16>, vector<100x49xbf16>, vector<2x49xf32> -> vector<2x49xf32>
    %267 = arith.addf %261, %266 : vector<2x49xf32>
    %268 = vector.extract_strided_slice %8 {offsets = [86, 0], sizes = [2, 100], strides = [1, 1]} : vector<98x100xf32> to vector<2x100xf32>
    %269 = arith.truncf %268 : vector<2x100xf32> to vector<2x100xbf16>
    %c43 = arith.constant 43 : index
    %c0_137 = arith.constant 0 : index
    %c0_138 = arith.constant 0 : index
    %270 = vector.load %arg3[%c43, %c0_137, %c0_138] : memref<49x100x49xbf16, #tpu.memory_space<vmem>>, vector<1x100x49xbf16>
    %271 = vector.shape_cast %270 : vector<1x100x49xbf16> to vector<100x49xbf16>
    %cst_139 = arith.constant dense<0.000000e+00> : vector<2x49xf32>
    %272 = tpu.matmul %269, %271, %cst_139 {dimension_numbers = #tpu.dot_dimension_numbers<[1], [0], [0], [1], [0, 0, 1, 1], [], []>} : vector<2x100xbf16>, vector<100x49xbf16>, vector<2x49xf32> -> vector<2x49xf32>
    %273 = arith.addf %267, %272 : vector<2x49xf32>
    %274 = vector.extract_strided_slice %8 {offsets = [88, 0], sizes = [2, 100], strides = [1, 1]} : vector<98x100xf32> to vector<2x100xf32>
    %275 = arith.truncf %274 : vector<2x100xf32> to vector<2x100xbf16>
    %c44 = arith.constant 44 : index
    %c0_140 = arith.constant 0 : index
    %c0_141 = arith.constant 0 : index
    %276 = vector.load %arg3[%c44, %c0_140, %c0_141] : memref<49x100x49xbf16, #tpu.memory_space<vmem>>, vector<1x100x49xbf16>
    %277 = vector.shape_cast %276 : vector<1x100x49xbf16> to vector<100x49xbf16>
    %cst_142 = arith.constant dense<0.000000e+00> : vector<2x49xf32>
    %278 = tpu.matmul %275, %277, %cst_142 {dimension_numbers = #tpu.dot_dimension_numbers<[1], [0], [0], [1], [0, 0, 1, 1], [], []>} : vector<2x100xbf16>, vector<100x49xbf16>, vector<2x49xf32> -> vector<2x49xf32>
    %279 = arith.addf %273, %278 : vector<2x49xf32>
    %280 = vector.extract_strided_slice %8 {offsets = [90, 0], sizes = [2, 100], strides = [1, 1]} : vector<98x100xf32> to vector<2x100xf32>
    %281 = arith.truncf %280 : vector<2x100xf32> to vector<2x100xbf16>
    %c45 = arith.constant 45 : index
    %c0_143 = arith.constant 0 : index
    %c0_144 = arith.constant 0 : index
    %282 = vector.load %arg3[%c45, %c0_143, %c0_144] : memref<49x100x49xbf16, #tpu.memory_space<vmem>>, vector<1x100x49xbf16>
    %283 = vector.shape_cast %282 : vector<1x100x49xbf16> to vector<100x49xbf16>
    %cst_145 = arith.constant dense<0.000000e+00> : vector<2x49xf32>
    %284 = tpu.matmul %281, %283, %cst_145 {dimension_numbers = #tpu.dot_dimension_numbers<[1], [0], [0], [1], [0, 0, 1, 1], [], []>} : vector<2x100xbf16>, vector<100x49xbf16>, vector<2x49xf32> -> vector<2x49xf32>
    %285 = arith.addf %279, %284 : vector<2x49xf32>
    %286 = vector.extract_strided_slice %8 {offsets = [92, 0], sizes = [2, 100], strides = [1, 1]} : vector<98x100xf32> to vector<2x100xf32>
    %287 = arith.truncf %286 : vector<2x100xf32> to vector<2x100xbf16>
    %c46 = arith.constant 46 : index
    %c0_146 = arith.constant 0 : index
    %c0_147 = arith.constant 0 : index
    %288 = vector.load %arg3[%c46, %c0_146, %c0_147] : memref<49x100x49xbf16, #tpu.memory_space<vmem>>, vector<1x100x49xbf16>
    %289 = vector.shape_cast %288 : vector<1x100x49xbf16> to vector<100x49xbf16>
    %cst_148 = arith.constant dense<0.000000e+00> : vector<2x49xf32>
    %290 = tpu.matmul %287, %289, %cst_148 {dimension_numbers = #tpu.dot_dimension_numbers<[1], [0], [0], [1], [0, 0, 1, 1], [], []>} : vector<2x100xbf16>, vector<100x49xbf16>, vector<2x49xf32> -> vector<2x49xf32>
    %291 = arith.addf %285, %290 : vector<2x49xf32>
    %292 = vector.extract_strided_slice %8 {offsets = [94, 0], sizes = [2, 100], strides = [1, 1]} : vector<98x100xf32> to vector<2x100xf32>
    %293 = arith.truncf %292 : vector<2x100xf32> to vector<2x100xbf16>
    %c47 = arith.constant 47 : index
    %c0_149 = arith.constant 0 : index
    %c0_150 = arith.constant 0 : index
    %294 = vector.load %arg3[%c47, %c0_149, %c0_150] : memref<49x100x49xbf16, #tpu.memory_space<vmem>>, vector<1x100x49xbf16>
    %295 = vector.shape_cast %294 : vector<1x100x49xbf16> to vector<100x49xbf16>
    %cst_151 = arith.constant dense<0.000000e+00> : vector<2x49xf32>
    %296 = tpu.matmul %293, %295, %cst_151 {dimension_numbers = #tpu.dot_dimension_numbers<[1], [0], [0], [1], [0, 0, 1, 1], [], []>} : vector<2x100xbf16>, vector<100x49xbf16>, vector<2x49xf32> -> vector<2x49xf32>
    %297 = arith.addf %291, %296 : vector<2x49xf32>
    %298 = vector.extract_strided_slice %8 {offsets = [96, 0], sizes = [2, 100], strides = [1, 1]} : vector<98x100xf32> to vector<2x100xf32>
    %299 = arith.truncf %298 : vector<2x100xf32> to vector<2x100xbf16>
    %c48 = arith.constant 48 : index
    %c0_152 = arith.constant 0 : index
    %c0_153 = arith.constant 0 : index
    %300 = vector.load %arg3[%c48, %c0_152, %c0_153] : memref<49x100x49xbf16, #tpu.memory_space<vmem>>, vector<1x100x49xbf16>
    %301 = vector.shape_cast %300 : vector<1x100x49xbf16> to vector<100x49xbf16>
    %cst_154 = arith.constant dense<0.000000e+00> : vector<2x49xf32>
    %302 = tpu.matmul %299, %301, %cst_154 {dimension_numbers = #tpu.dot_dimension_numbers<[1], [0], [0], [1], [0, 0, 1, 1], [], []>} : vector<2x100xbf16>, vector<100x49xbf16>, vector<2x49xf32> -> vector<2x49xf32>
    %303 = arith.addf %297, %302 : vector<2x49xf32>
    %c0_155 = arith.constant 0 : index
    %c0_156 = arith.constant 0 : index
    %304 = vector.load %arg4[%c0_155, %c0_156] : memref<1x49xf32, #tpu.memory_space<vmem>>, vector<1x49xf32>
    %305 = vector.broadcast %304 : vector<1x49xf32> to vector<2x49xf32>
    %306 = arith.addf %303, %305 : vector<2x49xf32>
    %cst_157 = arith.constant dense<0xFF800000> : vector<2xf32>
    %307 = vector.multi_reduction <maximumf>, %306, %cst_157 [1] : vector<2x49xf32> to vector<2xf32>
    %308 = vector.shape_cast %307 : vector<2xf32> to vector<2x1xf32>
    %309 = vector.broadcast %308 : vector<2x1xf32> to vector<2x49xf32>
    %310 = arith.subf %306, %309 : vector<2x49xf32>
    %311 = math.exp %310 : vector<2x49xf32>
    %cst_158 = arith.constant dense<0.000000e+00> : vector<2xf32>
    %312 = vector.multi_reduction <add>, %311, %cst_158 [1] : vector<2x49xf32> to vector<2xf32>
    %313 = vector.shape_cast %312 : vector<2xf32> to vector<2x1xf32>
    %314 = tpu.reciprocal %313 : vector<2x1xf32> -> vector<2x1xf32>
    %315 = vector.broadcast %314 : vector<2x1xf32> to vector<2x49xf32>
    %316 = arith.mulf %311, %315 : vector<2x49xf32>
    %c0_159 = arith.constant 0 : index
    %c0_160 = arith.constant 0 : index
    %317 = vector.load %arg5[%c0_159, %c0_160] : memref<2x49xf32, #tpu.memory_space<vmem>>, vector<2x49xf32>
    tpu.vector_store %arg5[%c0_159, %c0_160], %316 {strides = array<i32>} : memref<2x49xf32, #tpu.memory_space<vmem>>, vector<2x49xf32>,
    return
  }
}

</mosaic_0001>

<bundles_post_ra>
// kernel: msblock_forward.1
= control target key start
LH: loop header
LB: loop body
LE: loop exit
PB: predicated region body
PF: predicated region fallthrough
CT: control target
= control target key end

     0   :  { %v8395_v39 = vmov 0.0   ;;  %vm627_vm0 = vcmask 1041408   ;;  %vm8396_vm1 = vmmov 0   ;;  %vm623_vm2 = vcmask 818176   ;;  %s10392_s0 = inlined_call_operand.vmem [shape: f32[98,512], index: 0, kind: input, shape index: {}]   ;;  %s10393_s1 = inlined_call_operand.vmem [shape: bf16[512,100], index: 1, kind: input, shape index: {}]   ;;  %s10394_s2 = inlined_call_operand.vmem [shape: f32[1,100], index: 2, kind: input, shape index: {}]   ;;  %s10395_s3 = inlined_call_operand.vmem [shape: bf16[49,100,49], index: 3, kind: input, shape index: {}]   ;;  %s10396_s4 = inlined_call_operand.vmem [shape: f32[1,49], index: 4, kind: input, shape index: {}]   ;;  %s10397_s5 = inlined_call_operand.hbm [shape: f32[2,49], index: 5, kind: output, shape index: {}]  }
   0x1   :  { %v7992_v0 = vld [vmem:[%s10393_s1 + $0x40] sm:$0xff]   ;;  %v7996_v4 = vld [vmem:[%s10393_s1 + $0x48] sm:$0xff]   ;;  %v8000_v8 = vld [vmem:[%s10393_s1 + $0x50] sm:$0xff]  }
   0x2   :  { %v7993_v1 = vld [vmem:[%s10393_s1 + $0xc0] sm:$0xff]   ;;  %6599 = vmatprep.subr.bf16.mxu0 %v7992_v0  ;;  %v7997_v5 = vld [vmem:[%s10393_s1 + $0xc8] sm:$0xff]   ;;  %v8001_v9 = vld [vmem:[%s10393_s1 + $0xd0] sm:$0xff]  }
   0x3   :  { %v7994_v2 = vld [vmem:[%s10393_s1] sm:$0xff]   ;;  %6657 = vmatprep.subr.bf16.mxu1 %v7993_v1  ;;  %v7998_v6 = vld [vmem:[%s10393_s1 + $0x8] sm:$0xff]   ;;  %v8002_v10 = vld [vmem:[%s10393_s1 + $0x10] sm:$0xff]  }
   0x4   :  { %v7995_v3 = vld [vmem:[%s10393_s1 + $0x80] sm:$0xff]   ;;  %6600 = vmatpush3.bf16.msra.mxu0 %v7994_v2  ;;  %v7999_v7 = vld [vmem:[%s10393_s1 + $0x88] sm:$0xff]   ;;  %v8003_v11 = vld [vmem:[%s10393_s1 + $0x90] sm:$0xff]  }
   0x5   :  { %6658 = vmatpush3.bf16.msra.mxu1 %v7995_v3  ;;  %6601 = vmatprep.subr.bf16.mxu0 %v7996_v4  ;;  %v8004_v12 = vld [vmem:[%s10393_s1 + $0x58] sm:$0xff]   ;;  %v8008_v16 = vld [vmem:[%s10393_s1 + $0x60] sm:$0xff]   ;;  %v8012_v20 = vld [vmem:[%s10393_s1 + $0x68] sm:$0xff]  }
   0x6   :  { %6659 = vmatprep.subr.bf16.mxu1 %v7997_v5  ;;  %v8005_v13 = vld [vmem:[%s10393_s1 + $0xd8] sm:$0xff]   ;;  %v8009_v17 = vld [vmem:[%s10393_s1 + $0xe0] sm:$0xff]   ;;  %v8013_v21 = vld [vmem:[%s10393_s1 + $0xe8] sm:$0xff]  }
   0x7   :  { %v8006_v14 = vld [vmem:[%s10393_s1 + $0x18] sm:$0xff]   ;;  %v8010_v18 = vld [vmem:[%s10393_s1 + $0x20] sm:$0xff]   ;;  %v8014_v22 = vld [vmem:[%s10393_s1 + $0x28] sm:$0xff]  }
   0x8   :  { %6602 = vmatpush3.bf16.msra.mxu0 %v7998_v6  ;;  %v8007_v15 = vld [vmem:[%s10393_s1 + $0x98] sm:$0xff]   ;;  %v8011_v19 = vld [vmem:[%s10393_s1 + $0xa0] sm:$0xff]   ;;  %v8015_v23 = vld [vmem:[%s10393_s1 + $0xa8] sm:$0xff]  }
   0x9   :  { %6660 = vmatpush3.bf16.msra.mxu1 %v7999_v7  ;;  %6603 = vmatprep.subr.bf16.mxu0 %v8000_v8  ;;  %v8016_v24 = vld [vmem:[%s10393_s1 + $0x70] sm:$0xff]   ;;  %v8020_v28 = vld [vmem:[%s10393_s1 + $0x78] sm:$0xff]   ;;  %v23_v32 = vld [vmem:[%s10392_s0 + $0x8] sm:$0xff] }
   0xa   :  { %6661 = vmatprep.subr.bf16.mxu1 %v8001_v9  ;;  %v8017_v25 = vld [vmem:[%s10393_s1 + $0xf0] sm:$0xff]   ;;  %v8021_v29 = vld [vmem:[%s10393_s1 + $0xf8] sm:$0xff]   ;;  %v27_v33 = vld [vmem:[%s10392_s0 + $0x28] sm:$0xff] }
   0xb   :  { %v8018_v26 = vld [vmem:[%s10393_s1 + $0x30] sm:$0xff]   ;;  %v8022_v30 = vld [vmem:[%s10393_s1 + $0x38] sm:$0xff]   ;;  %v75_v35 = vpack.c.bf16 %v27_v33, %v23_v32  ;;  %v22_v37 = vld [vmem:[%s10392_s0] sm:$0xff] }
   0xc   :  { %6604 = vmatpush3.bf16.msra.mxu0 %v8002_v10  ;;  %v8019_v27 = vld [vmem:[%s10393_s1 + $0xb0] sm:$0xff]   ;;  %v8023_v31 = vld [vmem:[%s10393_s1 + $0xb8] sm:$0xff]   ;;  %v26_v38 = vld [vmem:[%s10392_s0 + $0x20] sm:$0xff] }
   0xd   :  { %6662 = vmatpush3.bf16.msra.mxu1 %v8003_v11  ;;  %6605 = vmatprep.subr.bf16.mxu0 %v8004_v12  ;;  %v25_v34 = vld [vmem:[%s10392_s0 + $0x18] sm:$0xff]  ;;  %v74_v41 = vpack.c.bf16 %v26_v38, %v22_v37  ;;  %v24_v42 = vld [vmem:[%s10392_s0 + $0x10] sm:$0xff]  ;;  %v31_v44 = vld [vmem:[%s10392_s0 + $0x48] sm:$0xff] }
   0xe   :  { %6663 = vmatprep.subr.bf16.mxu1 %v8005_v13  ;;  %v29_v36 = vld [vmem:[%s10392_s0 + $0x38] sm:$0xff]  ;;  %v28_v43 = vld [vmem:[%s10392_s0 + $0x30] sm:$0xff]  ;;  %397 = vmatprep.mubr.bf16.mxu0 %v75_v35  ;;  %v35_v46 = vld [vmem:[%s10392_s0 + $0x68] sm:$0xff] }
   0xf   :  { %v77_v40 = vpack.c.bf16 %v29_v36, %v25_v34  ;;  %v76_v45 = vpack.c.bf16 %v28_v43, %v24_v42  ;;  %v30_v47 = vld [vmem:[%s10392_s0 + $0x40] sm:$0xff]  ;;  %v79_v49 = vpack.c.bf16 %v35_v46, %v31_v44  ;;  %v33_v50 = vld [vmem:[%s10392_s0 + $0x58] sm:$0xff]  ;;  %v32_v52 = vld [vmem:[%s10392_s0 + $0x50] sm:$0xff] }
  0x10   :  { %6606 = vmatpush3.bf16.msra.mxu0 %v8006_v14  ;;  %v34_v48 = vld [vmem:[%s10392_s0 + $0x60] sm:$0xff]  ;;  %v37_v51 = vld [vmem:[%s10392_s0 + $0x78] sm:$0xff]  ;;  %v36_v54 = vld [vmem:[%s10392_s0 + $0x70] sm:$0xff] }
  0x11   :  { %6664 = vmatpush3.bf16.msra.mxu1 %v8007_v15  ;;  %6607 = vmatprep.subr.bf16.mxu0 %v8008_v16  ;;  %v81_v53 = vpack.c.bf16 %v37_v51, %v33_v50  ;;  %v8024_v55 = vld [vmem:[%s10395_s3 + $0x34] sm:$0xff]   ;;  %v39_v56 = vld [vmem:[%s10392_s0 + $0x88] sm:$0xff]  ;;  %v78_v58 = vpack.c.bf16 %v34_v48, %v30_v47  ;;  %v80_v60 = vpack.c.bf16 %v36_v54, %v32_v52  ;;  %v8025_v61 = vld [vmem:[%s10395_s3 + $0x3c] sm:$0xff]  }
  0x12   :  { %6665 = vmatprep.subr.bf16.mxu1 %v8009_v17  ;;  %485 = vmatprep.mubr.bf16.mxu1 %v77_v40  ;;  %v43_v57 = vld [vmem:[%s10392_s0 + $0xa8] sm:$0xff]  ;;  %v41_v59 = vld [vmem:[%s10392_s0 + $0x98] sm:$0xff]  ;;  %v38_v1 = vld [vmem:[%s10392_s0 + $0x80] sm:$0xff] }
  0x13   :  { %v45_v62 = vld [vmem:[%s10392_s0 + $0xb8] sm:$0xff]  ;;  %v83_v63 = vpack.c.bf16 %v43_v57, %v39_v56  ;;  %v42_v2 = vld [vmem:[%s10392_s0 + $0xa0] sm:$0xff]  ;;  %v40_v3 = vld [vmem:[%s10392_s0 + $0x90] sm:$0xff] }
  0x14   :  { %6608 = vmatpush3.bf16.msra.mxu0 %v8010_v18  ;;  %v85_v0 = vpack.c.bf16 %v45_v62, %v41_v59  ;;  %v44_v4 = vld [vmem:[%s10392_s0 + $0xb0] sm:$0xff]  ;;  %v8026_v5 = vld [vmem:[%s10395_s3 + $0x44] sm:$0xff]   ;;  %v49_v8 = vld [vmem:[%s10392_s0 + $0xd8] sm:$0xff]  ;;  %v82_v11 = vpack.c.bf16 %v42_v2, %v38_v1 }
  0x15   :  { %6666 = vmatpush3.bf16.msra.mxu1 %v8011_v19  ;;  %6609 = vmatprep.subr.bf16.mxu0 %v8012_v20  ;;  %v47_v6 = vld [vmem:[%s10392_s0 + $0xc8] sm:$0xff]  ;;  %v53_v9 = vld [vmem:[%s10392_s0 + $0xf8] sm:$0xff]  ;;  %v8028_v10 = vld [vmem:[%s10395_s3] sm:$0xff]   ;;  %v84_v12 = vpack.c.bf16 %v44_v4, %v40_v3 }
  0x16   :  { %6667 = vmatprep.subr.bf16.mxu1 %v8013_v21  ;;  %v51_v7 = vld [vmem:[%s10392_s0 + $0xe8] sm:$0xff]  ;;  %v89_v14 = vpack.c.bf16 %v53_v9, %v49_v8  ;;  %v46_v17 = vld [vmem:[%s10392_s0 + $0xc0] sm:$0xff]  ;;  %v48_v19 = vld [vmem:[%s10392_s0 + $0xd0] sm:$0xff] }
  0x17   :  { %v87_v13 = vpack.c.bf16 %v51_v7, %v47_v6  ;;  %v8027_v15 = vld [vmem:[%s10395_s3 + $0x4c] sm:$0xff]   ;;  %v50_v18 = vld [vmem:[%s10392_s0 + $0xe0] sm:$0xff]  ;;  %v65_v40 = vld [vmem:[%s10392_s0 + $0x158] sm:$0xff] }
  0x18   :  { %6610 = vmatpush3.bf16.msra.mxu0 %v8014_v22  ;;  %v8029_v16 = vld [vmem:[%s10395_s3 + $0x8] sm:$0xff]   ;;  %v52_v20 = vld [vmem:[%s10392_s0 + $0xf0] sm:$0xff]  ;;  %v54_v33 = vld [vmem:[%s10392_s0 + $0x100] sm:$0xff] }
  0x19   :  { %6668 = vmatpush3.bf16.msra.mxu1 %v8015_v23  ;;  %6611 = vmatprep.subr.bf16.mxu0 %v8016_v24  ;;  %v55_v21 = vld [vmem:[%s10392_s0 + $0x108] sm:$0xff]  ;;  %v8030_v23 = vld [vmem:[%s10395_s3 + $0x54] sm:$0xff]   ;;  %v58_v34 = vld [vmem:[%s10392_s0 + $0x120] sm:$0xff] }
  0x1a   :  { %6669 = vmatprep.subr.bf16.mxu1 %v8017_v25  ;;  %v59_v22 = vld [vmem:[%s10392_s0 + $0x128] sm:$0xff]  ;;  %v57_v24 = vld [vmem:[%s10392_s0 + $0x118] sm:$0xff]  ;;  %v56_v35 = vld [vmem:[%s10392_s0 + $0x110] sm:$0xff]  ;;  %v90_v42 = vpack.c.bf16 %v58_v34, %v54_v33 }
  0x1b   :  { %v61_v25 = vld [vmem:[%s10392_s0 + $0x138] sm:$0xff]  ;;  %v60_v36 = vld [vmem:[%s10392_s0 + $0x130] sm:$0xff]  ;;  %v63_v37 = vld [vmem:[%s10392_s0 + $0x148] sm:$0xff] }
  0x1c   :  { %6612 = vmatpush3.bf16.msra.mxu0 %v8018_v26  ;;  %v8031_v26 = vld [vmem:[%s10395_s3 + $0x10] sm:$0xff]   ;;  %v93_v32 = vpack.c.bf16 %v61_v25, %v57_v24  ;;  %v67_v38 = vld [vmem:[%s10392_s0 + $0x168] sm:$0xff]  ;;  %v92_v43 = vpack.c.bf16 %v60_v36, %v56_v35  ;;  %v62_v46 = vld [vmem:[%s10392_s0 + $0x140] sm:$0xff] }
  0x1d   :  { %6670 = vmatpush3.bf16.msra.mxu1 %v8019_v27  ;;  %6613 = vmatprep.subr.bf16.mxu0 %v8020_v28  ;;  %v86_v27 = vpack.c.bf16 %v50_v18, %v46_v17  ;;  %v88_v28 = vpack.c.bf16 %v52_v20, %v48_v19  ;;  %v95_v44 = vpack.c.bf16 %v67_v38, %v63_v37  ;;  %v66_v47 = vld [vmem:[%s10392_s0 + $0x160] sm:$0xff]  ;;  %v64_v48 = vld [vmem:[%s10392_s0 + $0x150] sm:$0xff]  ;;  %v73_v56 = vld [vmem:[%s10392_s0 + $0x198] sm:$0x3] }
  0x1e   :  { %6671 = vmatprep.subr.bf16.mxu1 %v8021_v29  ;;  %v91_v29 = vpack.c.bf16 %v59_v22, %v55_v21  ;;  %v94_v50 = vpack.c.bf16 %v66_v47, %v62_v46  ;;  %v8034_v52 = vld [vmem:[%s10395_s3 + $0x20] sm:$0xff]   ;;  %v72_v59 = vld [vmem:[%s10392_s0 + $0x190] sm:$0x3] }
  0x1f   :  { %v8037_v62 = vld [vmem:[%s10395_s3 + $0x30] ss:$0 sps:$4 sm:$0x33]   ;;  %v8747_v4 = vld [vmem:[%s10394_s2] ss:$0 sm:$0xff]  ;;  %v8040_v34 = vld [vmem:[%s10395_s3 + $0xa4] sm:$0xff]  }
  0x20   :  { %6614 = vmatpush3.bf16.msra.mxu0 %v8022_v30  ;;  %v8032_v30 = vld [vmem:[%s10395_s3 + $0x18] sm:$0xff]   ;;  %v8041_v38 = vld [vmem:[%s10395_s3 + $0x70] sm:$0xff]   ;;  %v8045_v46 = vld [vmem:[%s10395_s3 + $0x80] sm:$0xff]  }
  0x21   :  { %6672 = vmatpush3.bf16.msra.mxu1 %v8023_v31  ;;  %7107 = vmatprep.subr.bf16.mxu0 %v8395_v39  ;;  %v8033_v31 = vld [vmem:[%s10395_s3 + $0x5c] sm:$0xff]  }
  0x22   :  { %7125 = vmatprep.subr.bf16.mxu1 %v8395_v39  ;;  %v8038_v21 = vld [vmem:[%s10395_s3 + $0x9c] sm:$0xff]  }
  0x23   :  { %398 = vmatmul.mubr.bf16.vlgmr.msra.gmra.mrb[0].mxu0 %v74_v41  ;;  %v69_v41 = vld [vmem:[%s10392_s0 + $0x178] sm:$0xff] }
  0x24   :  { %486 = vmatmul.mubr.bf16.vlgmr.msra.gmra.mrb[0].mxu1 %v76_v45  ;;  %405 = vmatprep.mubr.bf16.mxu0 %v79_v49  ;;  %v97_v45 = vpack.c.bf16 %v69_v41, %v65_v40  ;;  %v68_v49 = vld [vmem:[%s10392_s0 + $0x170] sm:$0xff]  ;;  %v8046_v47 = vld [vmem:[%s10395_s3 + $0xbc] sm:$0xff]  }
  0x25   :  { %493 = vmatprep.mubr.bf16.mxu1 %v81_v53  ;;  %7108 = vmatpush3.bf16.msra.mxu0 %v8024_v55  ;;  %v96_v51 = vpack.c.bf16 %v68_v49, %v64_v48  ;;  %v71_v53 = vld [vmem:[%s10392_s0 + $0x188] sm:$0x3]  ;;  %v70_v55 = vld [vmem:[%s10392_s0 + $0x180] sm:$0x3] }
  0x26   :  { %7109 = vmatprep.subr.bf16.mxu0 %v8395_v39  ;;  %7126 = vmatpush3.bf16.msra.mxu1 %v8028_v10  ;;  %v99_v54 = vpack.c.bf16 %v71_v53, %v71_v53  ;;  %v98_v57 = vpack.c.bf16 %v70_v55, %v70_v55  ;;  %v8047_v48 = vld [vmem:[%s10395_s3 + $0x88] sm:$0xff]  }
  0x27   :  { %7127 = vmatprep.subr.bf16.mxu1 %v8395_v39  ;;  %v8050_v49 = vld [vmem:[%s10395_s3 + $0xcc] ss:$0 sps:$4 sm:$0x33]  }
  0x28   :  { %v915_v53 = vsel %vm627_vm0, %v8050_v49, 0 }
  0x29   :  { %7110 = vmatpush3.bf16.msra.mxu0 %v8025_v61  ;;  %v8035_v61 = vld [vmem:[%s10395_s3 + $0x28] sm:$0xff]  }
  0x2a   :  { %7111 = vmatprep.subr.bf16.mxu0 %v8395_v39  ;;  %7128 = vmatpush3.bf16.msra.mxu1 %v8029_v16 }
  0x2b   :  { %406 = vmatmul.mubr.bf16.gmra.mrb[4].mxu0 %v78_v58  ;;  %7129 = vmatprep.subr.bf16.mxu1 %v8395_v39  ;;  %v101_v58 = vpack.c.bf16 %v73_v56, %v73_v56  ;;  %v8052_v56 = vld [vmem:[%s10395_s3 + $0x104] sm:$0xff]  }
  0x2c   :  { %494 = vmatmul.mubr.bf16.gmra.mrb[4].mxu1 %v80_v60  ;;  %413 = vmatprep.mubr.bf16.mxu0 %v83_v63  ;;  %v100_v60 = vpack.c.bf16 %v72_v59, %v72_v59  ;;  %v8036_v63 = vld [vmem:[%s10395_s3 + $0x64] ss:$0 sps:$4 sm:$0x33]   ;;  %v8054_v59 = vld [vmem:[%s10395_s3 + $0x10c] sm:$0xff]  }
  0x2d   :  { %501 = vmatprep.mubr.bf16.mxu1 %v85_v0  ;;  %7112 = vmatpush3.bf16.msra.mxu0 %v8026_v5  ;;  %v714_v0 = vsel %vm627_vm0, %v8037_v62, 0  ;;  %v629_v1 = vsel %vm627_vm0, %v8036_v63, 0  ;;  %v8057_v62 = vld [vmem:[%s10395_s3 + $0xe0] sm:$0xff]  }
  0x2e   :  { %7113 = vmatprep.subr.bf16.mxu0 %v8395_v39  ;;  %7130 = vmatpush3.bf16.msra.mxu1 %v8031_v26  ;;  %v8058_v63 = vld [vmem:[%s10395_s3 + $0x11c] sm:$0xff]  }
  0x2f   :  { %7131 = vmatprep.subr.bf16.mxu1 %v8395_v39 }
  0x31   :  { %7114 = vmatpush3.bf16.msra.mxu0 %v8027_v15 }
  0x32   :  { %7115 = vmatprep.subr.bf16.mxu0 %v8395_v39  ;;  %7132 = vmatpush3.bf16.msra.mxu1 %v8032_v30 }
  0x33   :  { %414 = vmatmul.mubr.bf16.gmra.mrb[8].mxu0 %v82_v11  ;;  %7133 = vmatprep.subr.bf16.mxu1 %v8395_v39 }
  0x34   :  { %502 = vmatmul.mubr.bf16.gmra.mrb[8].mxu1 %v84_v12  ;;  %421 = vmatprep.mubr.bf16.mxu0 %v87_v13 }
  0x35   :  { %509 = vmatprep.mubr.bf16.mxu1 %v89_v14  ;;  %7116 = vmatpush3.bf16.msra.mxu0 %v8030_v23 }
  0x36   :  { %7117 = vmatprep.subr.bf16.mxu0 %v8395_v39  ;;  %7134 = vmatpush3.bf16.msra.mxu1 %v8034_v52  ;;  %v8049_v52 = vld [vmem:[%s10395_s3 + $0x90] sm:$0xff]  }
  0x37   :  { %7135 = vmatprep.subr.bf16.mxu1 %v8395_v39 }
  0x39   :  { %7118 = vmatpush3.bf16.msra.mxu0 %v8033_v31 }
  0x3a   :  { %7119 = vmatprep.subr.bf16.mxu0 %v8395_v39  ;;  %7136 = vmatpush3.bf16.msra.mxu1 %v8035_v61  ;;  %v8056_v61 = vld [vmem:[%s10395_s3 + $0x114] sm:$0xff]  }
  0x3b   :  { %422 = vmatmul.mubr.bf16.gmra.mrb[12].mxu0 %v86_v27  ;;  %7137 = vmatprep.subr.bf16.mxu1 %v8395_v39 }
  0x3c   :  { %510 = vmatmul.mubr.bf16.gmra.mrb[12].mxu1 %v88_v28  ;;  %429 = vmatprep.mubr.bf16.mxu0 %v91_v29  ;;  %v8039_v28 = vld [vmem:[%s10395_s3 + $0x68] sm:$0xff]  }
  0x3d   :  { %517 = vmatprep.mubr.bf16.mxu1 %v93_v32  ;;  %7120 = vmatpush3.bf16.msra.mxu0 %v629_v1  ;;  %v8060_v1 = vld [vmem:[%s10395_s3 + $0x124] sm:$0xff]  }
  0x3e   :  { %7138 = vmatpush3.bf16.msra.mxu1 %v714_v0  ;;  %7143 = vmatprep.subr.bf16.mxu0 %v8395_v39  ;;  %v8059_v0 = vld [vmem:[%s10395_s3 + $0xe8] sm:$0xff]  }
  0x3f   :  { %7161 = vmatprep.subr.bf16.mxu1 %v8395_v39 }
  0x43   :  { %430 = vmatmul.mubr.bf16.gmra.mrb[16].mxu0 %v90_v42  ;;  %v8042_v42 = vld [vmem:[%s10395_s3 + $0xac] sm:$0xff]  }
  0x44   :  { %518 = vmatmul.mubr.bf16.gmra.mrb[16].mxu1 %v92_v43  ;;  %437 = vmatprep.mubr.bf16.mxu0 %v95_v44  ;;  %v8043_v44 = vld [vmem:[%s10395_s3 + $0x78] sm:$0xff]  }
  0x45   :  { %525 = vmatprep.mubr.bf16.mxu1 %v97_v45  ;;  %v8044_v45 = vld [vmem:[%s10395_s3 + $0xb4] sm:$0xff]  }
  0x4b   :  { %438 = vmatmul.mubr.bf16.gmra.mrb[20].mxu0 %v94_v50  ;;  %v8048_v50 = vld [vmem:[%s10395_s3 + $0xc4] sm:$0xff]  }
  0x4c   :  { %526 = vmatmul.mubr.bf16.gmra.mrb[20].mxu1 %v96_v51  ;;  %445 = vmatprep.mubr.bf16.mxu0 %v99_v54  ;;  %v8051_v51 = vld [vmem:[%s10395_s3 + $0x98] ss:$0 sps:$4 sm:$0x33]  }
  0x4d   :  { %533 = vmatprep.mubr.bf16.mxu1 %v101_v58  ;;  %v814_v54 = vsel %vm627_vm0, %v8051_v51, 0  ;;  %v8053_v58 = vld [vmem:[%s10395_s3 + $0xd0] sm:$0xff]  }
  0x53   :  { %446 = vmatmul.mubr.bf16.gmra.mrb[24].mxu0 %v98_v57 }
  0x54   :  { %534 = vmatmul.mubr.bf16.gmra.mrb[24].mxu1 %v100_v60  ;;  %7121 = vmatprep.mubr.msk.bf16.mxu0 %vm8396_vm1, %v8395_v39  ;;  %v8055_v60 = vld [vmem:[%s10395_s3 + $0xd8] sm:$0xff]  }
  0x55   :  { %7139 = vmatprep.mubr.msk.bf16.mxu1 %vm8396_vm1, %v8395_v39 }
  0xf6   :  { %v6615_v2 = vpop.f32.mrb[0].mxu0 }
  0xf7   :  { %v6673_v3 = vpop.f32.mrb[0].mxu1  ;;  %v6616_v5 = vpop.f32.mrb[1].mxu0 }
  0xf8   :  { %v6617_v6 = vadd.f32 %v6616_v5, %v6615_v2  ;;  %v6674_v7 = vpop.f32.mrb[1].mxu1  ;;  %v6618_v8 = vpop.f32.mrb[2].mxu0 }
  0xf9   :  { %v6675_v9 = vadd.f32 %v6674_v7, %v6673_v3  ;;  %v6676_v10 = vpop.f32.mrb[2].mxu1  ;;  %v6619_v11 = vpop.f32.mrb[3].mxu0  ;;  %v8061_v3 = vld [vmem:[%s10395_s3 + $0xf0] sm:$0xff]  }
  0xfa   :  { %v400_v12 = vadd.f32 %v6617_v6, %v8747_v4  ;;  %v6620_v13 = vadd.f32 %v6619_v11, %v6618_v8  ;;  %v6677_v14 = vpop.f32.mrb[3].mxu1  ;;  %v8064_v7 = vld [vmem:[%s10395_s3 + $0x134] ss:$0 sps:$4 sm:$0x33]  }
  0xfb   :  { %v6678_v15 = vadd.f32 %v6677_v14, %v6676_v10  ;;  %v8062_v10 = vld [vmem:[%s10395_s3 + $0x12c] sm:$0xff]   ;;  %v8065_v14 = vld [vmem:[%s10395_s3 + $0x100] ss:$0 sps:$4 sm:$0x33]  }
  0xfc   :  { %v488_v16 = vadd.f32 %v6675_v9, %v400_v12  ;;  %v403_v17 = vadd.f32 %v6620_v13, %v8747_v4 }
  0xfe   :  { %v541_v18 = vmax.f32 %v488_v16, 0.0  ;;  %v8751_v19 = vadd.f32 %v6678_v15, %v403_v17  ;;  %v6621_v20 = vpop.f32.mrb[4].mxu0 }
  0xff   :  { %v6622_v22 = vpop.f32.mrb[5].mxu0  ;;  %v6679_v23 = vpop.f32.mrb[4].mxu1 }
 0x100   :  { %v8756_v24 = vpack.c.bf16 %v541_v18, %v541_v18  ;;  %v6623_v25 = vadd.f32 %v6622_v22, %v6621_v20  ;;  %v6624_v26 = vpop.f32.mrb[6].mxu0  ;;  %v6680_v27 = vpop.f32.mrb[5].mxu1  ;;  %v542_v13 = vmax.f32 %v8751_v19, 0.0  ;;  %v8063_v20 = vld [vmem:[%s10395_s3 + $0xf8] sm:$0xff]  }
 0x101   :  { %v6681_v29 = vadd.f32 %v6680_v27, %v6679_v23  ;;  %v6625_v30 = vpop.f32.mrb[7].mxu0  ;;  %v6682_v31 = vpop.f32.mrb[6].mxu1 }
 0x102   :  { %v583_v32 = vrot.slane %v8756_v24, 1  ;;  %7140 = vmatmul.mubr.msk.bf16.vlgmr.msra.gmra.mrb[28].mxu1 %vm623_vm2, %v8756_v24  ;;  %v6683_v33 = vpop.f32.mrb[7].mxu1  ;;  %v408_v35 = vadd.f32 %v6623_v25, %v8747_v4  ;;  %v6626_v36 = vadd.f32 %v6625_v30, %v6624_v26  ;;  %v871_v55 = vrot.slane %v8756_v24, 3 }
 0x103   :  { %7162 = vmatpush3.bf16.msra.mxu1 %v8038_v21  ;;  %7175 = vmatprep.mubr.msk.bf16.mxu1 %vm8396_vm1, %v8395_v39  ;;  %v6684_v37 = vadd.f32 %v6683_v33, %v6682_v31  ;;  %v770_v57 = vrot.slane %v8756_v24, 2  ;;  %v8892_v25 = vpack.c.bf16 %v542_v13, %v542_v13  ;;  %v1118_v26 = vsel %vm627_vm0, %v8064_v7, 0  ;;  %v8066_v33 = vld [vmem:[%s10395_s3 + $0x16c] sm:$0xff]  }
 0x104   :  { %7122 = vmatmul.mubr.msk.bf16.vlgmr.msra.gmra.mrb[28].mxu0 %vm623_vm2, %v583_v32  ;;  %7163 = vmatprep.subr.bf16.mxu1 %v8395_v39  ;;  %v8777_v40 = vadd.f32 %v6681_v29, %v408_v35  ;;  %v411_v41 = vadd.f32 %v6626_v36, %v8747_v4  ;;  %v1016_v30 = vsel %vm627_vm0, %v8065_v14, 0 }
 0x105   :  { %7144 = vmatpush3.bf16.msra.mxu0 %v8039_v28  ;;  %7157 = vmatprep.mubr.msk.bf16.mxu0 %vm8396_vm1, %v8395_v39  ;;  %v1074_v36 = vrot.slane %v8892_v25, 1 }
 0x106   :  { %7145 = vmatprep.subr.bf16.mxu0 %v8395_v39  ;;  %v8784_v43 = vadd.f32 %v6684_v37, %v411_v41  ;;  %v6627_v2 = vpop.f32.mrb[8].mxu0 }
 0x107   :  { %7164 = vmatpush3.bf16.msra.mxu1 %v8040_v34  ;;  %v6628_v5 = vpop.f32.mrb[9].mxu0  ;;  %v6685_v6 = vpop.f32.mrb[8].mxu1 }
 0x108   :  { %7165 = vmatprep.subr.bf16.mxu1 %v8395_v39  ;;  %v6629_v8 = vadd.f32 %v6628_v5, %v6627_v2  ;;  %v6630_v9 = vpop.f32.mrb[10].mxu0  ;;  %v6686_v12 = vpop.f32.mrb[9].mxu1 }
 0x109   :  { %7146 = vmatpush3.bf16.msra.mxu0 %v8041_v38  ;;  %v6631_v11 = vpop.f32.mrb[11].mxu0  ;;  %v6687_v17 = vadd.f32 %v6686_v12, %v6685_v6  ;;  %v6688_v18 = vpop.f32.mrb[10].mxu1  ;;  %v8067_v38 = vld [vmem:[%s10395_s3 + $0x138] sm:$0xff]  }
 0x10a   :  { %7147 = vmatprep.subr.bf16.mxu0 %v8395_v39  ;;  %v416_v15 = vadd.f32 %v6629_v8, %v8747_v4  ;;  %v6632_v16 = vadd.f32 %v6631_v11, %v6630_v9  ;;  %v6689_v21 = vpop.f32.mrb[11].mxu1 }
 0x10b   :  { %7166 = vmatpush3.bf16.msra.mxu1 %v8042_v42  ;;  %v6690_v23 = vadd.f32 %v6689_v21, %v6688_v18 }
 0x10c   :  { %7167 = vmatprep.subr.bf16.mxu1 %v8395_v39  ;;  %v419_v19 = vadd.f32 %v6632_v16, %v8747_v4  ;;  %v8890_v22 = vadd.f32 %v6687_v17, %v416_v15 }
 0x10d   :  { %7148 = vmatpush3.bf16.msra.mxu0 %v8043_v44 }
 0x10e   :  { %7149 = vmatprep.subr.bf16.mxu0 %v8395_v39  ;;  %v6633_v24 = vpop.f32.mrb[12].mxu0  ;;  %v8896_v27 = vadd.f32 %v6690_v23, %v419_v19 }
 0x10f   :  { %7168 = vmatpush3.bf16.msra.mxu1 %v8044_v45  ;;  %v6634_v28 = vpop.f32.mrb[13].mxu0  ;;  %v6691_v29 = vpop.f32.mrb[12].mxu1 }
 0x110   :  { %7169 = vmatprep.subr.bf16.mxu1 %v8395_v39  ;;  %v6635_v31 = vadd.f32 %v6634_v28, %v6633_v24  ;;  %v6636_v32 = vpop.f32.mrb[14].mxu0  ;;  %v6692_v35 = vpop.f32.mrb[13].mxu1 }
 0x111   :  { %7150 = vmatpush3.bf16.msra.mxu0 %v8045_v46  ;;  %v6637_v34 = vpop.f32.mrb[15].mxu0  ;;  %v6694_v37 = vpop.f32.mrb[14].mxu1  ;;  %v6693_v44 = vadd.f32 %v6692_v35, %v6691_v29 }
 0x112   :  { %7151 = vmatprep.subr.bf16.mxu0 %v8395_v39  ;;  %v424_v41 = vadd.f32 %v6635_v31, %v8747_v4  ;;  %v6638_v42 = vadd.f32 %v6637_v34, %v6636_v32  ;;  %v6695_v45 = vpop.f32.mrb[15].mxu1 }
 0x113   :  { %7170 = vmatpush3.bf16.msra.mxu1 %v8046_v47  ;;  %v6696_v46 = vadd.f32 %v6695_v45, %v6694_v37 }
 0x114   :  { %7171 = vmatprep.subr.bf16.mxu1 %v8395_v39 }
 0x115   :  { %7152 = vmatpush3.bf16.msra.mxu0 %v8047_v48 }
 0x116   :  { %7153 = vmatprep.subr.bf16.mxu0 %v8395_v39 }
 0x117   :  { %7172 = vmatpush3.bf16.msra.mxu1 %v8048_v50 }
 0x118   :  { %7173 = vmatprep.subr.bf16.mxu1 %v8395_v39 }
 0x119   :  { %7154 = vmatpush3.bf16.msra.mxu0 %v8049_v52 }
 0x11a   :  { %7155 = vmatprep.subr.bf16.mxu0 %v8395_v39 }
 0x11b   :  { %7174 = vmatpush3.bf16.msra.mxu1 %v915_v53 }
 0x11c   :  { %7197 = vmatprep.subr.bf16.mxu1 %v8395_v39 }
 0x11d   :  { %7156 = vmatpush3.bf16.msra.mxu0 %v814_v54 }
 0x11e   :  { %7176 = vmatmul.mubr.msk.bf16.vlgmr.msra.gmra.mrb[32].mxu1 %vm623_vm2, %v871_v55  ;;  %7179 = vmatprep.subr.bf16.mxu0 %v8395_v39 }
 0x11f   :  { %7198 = vmatpush3.bf16.msra.mxu1 %v8052_v56  ;;  %7211 = vmatprep.mubr.msk.bf16.mxu1 %vm8396_vm1, %v8395_v39 }
 0x120   :  { %7158 = vmatmul.mubr.msk.bf16.vlgmr.msra.gmra.mrb[32].mxu0 %vm623_vm2, %v770_v57  ;;  %7199 = vmatprep.subr.bf16.mxu1 %v8395_v39 }
 0x121   :  { %7180 = vmatpush3.bf16.msra.mxu0 %v8053_v58  ;;  %7193 = vmatprep.mubr.msk.bf16.mxu0 %vm8396_vm1, %v8395_v39 }
 0x122   :  { %7181 = vmatprep.subr.bf16.mxu0 %v8395_v39 }
 0x123   :  { %7200 = vmatpush3.bf16.msra.mxu1 %v8054_v59 }
 0x124   :  { %7201 = vmatprep.subr.bf16.mxu1 %v8395_v39 }
 0x125   :  { %7182 = vmatpush3.bf16.msra.mxu0 %v8055_v60 }
 0x126   :  { %7183 = vmatprep.subr.bf16.mxu0 %v8395_v39 }
 0x127   :  { %7202 = vmatpush3.bf16.msra.mxu1 %v8056_v61 }
 0x128   :  { %7203 = vmatprep.subr.bf16.mxu1 %v8395_v39 }
 0x129   :  { %7184 = vmatpush3.bf16.msra.mxu0 %v8057_v62 }
 0x12a   :  { %7185 = vmatprep.subr.bf16.mxu0 %v8395_v39 }
 0x12b   :  { %7204 = vmatpush3.bf16.msra.mxu1 %v8058_v63 }
 0x12c   :  { %7205 = vmatprep.subr.bf16.mxu1 %v8395_v39 }
 0x12d   :  { %7186 = vmatpush3.bf16.msra.mxu0 %v8059_v0 }
 0x12e   :  { %7187 = vmatprep.subr.bf16.mxu0 %v8395_v39 }
 0x12f   :  { %7206 = vmatpush3.bf16.msra.mxu1 %v8060_v1 }
 0x130   :  { %7207 = vmatprep.subr.bf16.mxu1 %v8395_v39 }
 0x131   :  { %7188 = vmatpush3.bf16.msra.mxu0 %v8061_v3 }
 0x132   :  { %7189 = vmatprep.subr.bf16.mxu0 %v8395_v39 }
 0x133   :  { %7208 = vmatpush3.bf16.msra.mxu1 %v8062_v10 }
 0x134   :  { %7209 = vmatprep.subr.bf16.mxu1 %v8395_v39 }
 0x135   :  { %7190 = vmatpush3.bf16.msra.mxu0 %v8063_v20 }
 0x136   :  { %7191 = vmatprep.subr.bf16.mxu0 %v8395_v39 }
 0x137   :  { %7210 = vmatpush3.bf16.msra.mxu1 %v1118_v26 }
 0x138   :  { %7233 = vmatprep.subr.bf16.mxu1 %v8395_v39 }
 0x139   :  { %7192 = vmatpush3.bf16.msra.mxu0 %v1016_v30 }
 0x13a   :  { %7212 = vmatmul.mubr.msk.bf16.vlgmr.msra.gmra.mrb[36].mxu1 %vm623_vm2, %v1074_v36  ;;  %7215 = vmatprep.subr.bf16.mxu0 %v8395_v39 }
 0x13b   :  { %10 = vsyncpa [#allocation3], 0  ;;  %7234 = vmatpush3.bf16.msra.mxu1 %v8066_v33  ;;  %v8068_v47 = vld [vmem:[%s10395_s3 + $0x174] sm:$0xff]   ;;  %7247 = vmatprep.mubr.msk.bf16.mxu1 %vm8396_vm1, %v8395_v39  ;;  %v427_v48 = vadd.f32 %v6638_v42, %v8747_v4  ;;  %v8917_v49 = vadd.f32 %v6693_v44, %v424_v41  ;;  %v6639_v50 = vpop.f32.mrb[16].mxu0  ;;  %v8069_v51 = vld [vmem:[%s10395_s3 + $0x140] sm:$0xff]   ;;  %v6697_v54 = vpop.f32.mrb[16].mxu1 }
 0x13c   :  { %7194 = vmatmul.mubr.msk.bf16.vlgmr.msra.gmra.mrb[36].mxu0 %vm623_vm2, %v8892_v25  ;;  %7235 = vmatprep.subr.bf16.mxu1 %v8395_v39  ;;  %v6640_v53 = vpop.f32.mrb[17].mxu0  ;;  %v8070_v57 = vld [vmem:[%s10395_s3 + $0x17c] sm:$0xff]   ;;  %v6698_v59 = vpop.f32.mrb[17].mxu1  ;;  %v8071_v0 = vld [vmem:[%s10395_s3 + $0x148] sm:$0xff]   ;;  %v8073_v9 = vld [vmem:[%s10395_s3 + $0x150] sm:$0xff]   ;;  %vm5522_vm3 = vcmask 394240  }
 0x13d   :  { %7216 = vmatpush3.bf16.msra.mxu0 %v8067_v38  ;;  %7229 = vmatprep.mubr.msk.bf16.mxu0 %vm8396_vm1, %v8395_v39  ;;  %v8927_v52 = vadd.f32 %v6696_v46, %v427_v48  ;;  %v6641_v55 = vadd.f32 %v6640_v53, %v6639_v50  ;;  %v6642_v56 = vpop.f32.mrb[18].mxu0  ;;  %v6699_v62 = vadd.f32 %v6698_v59, %v6697_v54  ;;  %v6700_v63 = vpop.f32.mrb[18].mxu1  ;;  %v8072_v6 = vld [vmem:[%s10395_s3 + $0x184] sm:$0xff]   ;;  %v8074_v14 = vld [vmem:[%s10395_s3 + $0x18c] sm:$0xff]   ;;  %v8075_v18 = vld [vmem:[%s10395_s3 + $0x158] sm:$0xff]   ;;  %v1276_v53 = vrot.slane %v8892_v25, 3 }
 0x13e   :  { %7217 = vmatprep.subr.bf16.mxu0 %v8395_v39  ;;  %v6643_v58 = vpop.f32.mrb[19].mxu0  ;;  %v6701_v1 = vpop.f32.mrb[19].mxu1  ;;  %v8076_v26 = vld [vmem:[%s10395_s3 + $0x194] sm:$0xff]   ;;  %v8078_v30 = vld [vmem:[%s10395_s3 + $0x19c] ss:$0 sps:$4 sm:$0x33]  }
 0x13f   :  { %7236 = vmatpush3.bf16.msra.mxu1 %v8068_v47  ;;  %v432_v60 = vadd.f32 %v6641_v55, %v8747_v4  ;;  %v6644_v61 = vadd.f32 %v6643_v58, %v6642_v56  ;;  %v6702_v5 = vadd.f32 %v6701_v1, %v6700_v63  ;;  %v6645_v7 = vpop.f32.mrb[20].mxu0  ;;  %v6703_v13 = vpop.f32.mrb[20].mxu1  ;;  %v8077_v31 = vld [vmem:[%s10395_s3 + $0x160] sm:$0xff]   ;;  %v8079_v34 = vld [vmem:[%s10395_s3 + $0x168] ss:$0 sps:$4 sm:$0x33]  }
 0x140   :  { %7237 = vmatprep.subr.bf16.mxu1 %v8395_v39  ;;  %v6646_v10 = vpop.f32.mrb[21].mxu0  ;;  %v6704_v16 = vpop.f32.mrb[21].mxu1  ;;  %v1320_v41 = vsel %vm627_vm0, %v8078_v30, 0  ;;  %v1219_v45 = vsel %vm627_vm0, %v8079_v34, 0  ;;  %v8080_v50 = vld [vmem:[%s10395_s3 + $0x1d4] sm:$0xff]   ;;  %v8081_v55 = vld [vmem:[%s10395_s3 + $0x1a0] sm:$0xff]  }
 0x141   :  { %7218 = vmatpush3.bf16.msra.mxu0 %v8069_v51  ;;  %v435_v2 = vadd.f32 %v6644_v61, %v8747_v4  ;;  %v8940_v3 = vadd.f32 %v6699_v62, %v432_v60  ;;  %v6647_v11 = vadd.f32 %v6646_v10, %v6645_v7  ;;  %v6648_v12 = vpop.f32.mrb[22].mxu0  ;;  %v6706_v17 = vpop.f32.mrb[22].mxu1  ;;  %v6705_v19 = vadd.f32 %v6704_v16, %v6703_v13  ;;  %v8082_v56 = vld [vmem:[%s10395_s3 + $0x1dc] sm:$0xff]   ;;  %v8085_v58 = vld [vmem:[%s10395_s3 + $0x1b0] sm:$0xff]   ;;  %v8108_v30 = vld [vmem:[%s10395_s3 + $0x2a4] sm:$0xff]  }
 0x142   :  { %7219 = vmatprep.subr.bf16.mxu0 %v8395_v39  ;;  %v6649_v15 = vpop.f32.mrb[23].mxu0  ;;  %v6707_v23 = vpop.f32.mrb[23].mxu1  ;;  %v8086_v59 = vld [vmem:[%s10395_s3 + $0x1ec] sm:$0xff]   ;;  %v8087_v60 = vld [vmem:[%s10395_s3 + $0x1b8] sm:$0xff]   ;;  %v8089_v62 = vld [vmem:[%s10395_s3 + $0x1c0] sm:$0xff]   ;;  %v543_v63 = vmax.f32 %v8777_v40, 0.0 }
 0x143   :  { %7238 = vmatpush3.bf16.msra.mxu1 %v8070_v57  ;;  %v8946_v8 = vadd.f32 %v6702_v5, %v435_v2  ;;  %v440_v20 = vadd.f32 %v6647_v11, %v8747_v4  ;;  %v6650_v21 = vadd.f32 %v6649_v15, %v6648_v12  ;;  %v6708_v24 = vadd.f32 %v6707_v23, %v6706_v17  ;;  %v6651_v33 = vpop.f32.mrb[24].mxu0  ;;  %v6709_v38 = vpop.f32.mrb[24].mxu1  ;;  %v8084_v57 = vld [vmem:[%s10395_s3 + $0x1e4] sm:$0xff]   ;;  %v8088_v61 = vld [vmem:[%s10395_s3 + $0x1f4] sm:$0xff]   ;;  %v8094_v10 = vld [vmem:[%s10395_s3 + $0x23c] sm:$0xff]  }
 0x144   :  { %7239 = vmatprep.subr.bf16.mxu1 %v8395_v39  ;;  %v6652_v35 = vpop.f32.mrb[25].mxu0  ;;  %v6710_v44 = vpop.f32.mrb[25].mxu1  ;;  %v8092_v1 = vld [vmem:[%s10395_s3 + $0x204] ss:$0 sps:$4 sm:$0x33]   ;;  %v8091_v2 = vld [vmem:[%s10395_s3 + $0x1c8] sm:$0xff]   ;;  %v9046_v5 = vpack.c.bf16 %v543_v63, %v543_v63 }
 0x145   :  { %7220 = vmatpush3.bf16.msra.mxu0 %v8071_v0  ;;  %v443_v28 = vadd.f32 %v6650_v21, %v8747_v4  ;;  %v8965_v29 = vadd.f32 %v6705_v19, %v440_v20  ;;  %v6653_v36 = vadd.f32 %v6652_v35, %v6651_v33  ;;  %v6654_v37 = vpop.f32.mrb[26].mxu0  ;;  %v6711_v47 = vadd.f32 %v6710_v44, %v6709_v38  ;;  %v6712_v48 = vpop.f32.mrb[26].mxu1  ;;  %v8090_v0 = vld [vmem:[%s10395_s3 + $0x1fc] sm:$0xff]   ;;  %v8093_v40 = vld [vmem:[%s10395_s3 + $0x1d0] ss:$0 sps:$4 sm:$0x33]  }
 0x146   :  { %7221 = vmatprep.subr.bf16.mxu0 %v8395_v39  ;;  %v6655_v42 = vpop.f32.mrb[27].mxu0  ;;  %v6713_v51 = vpop.f32.mrb[27].mxu1  ;;  %v1479_v7 = vrot.slane %v9046_v5, 1  ;;  %v8095_v11 = vld [vmem:[%s10395_s3 + $0x208] sm:$0xff]   ;;  %v8097_v13 = vld [vmem:[%s10395_s3 + $0x210] sm:$0xff]   ;;  %v8099_v15 = vld [vmem:[%s10395_s3 + $0x218] sm:$0xff]  }
 0x147   :  { %7240 = vmatpush3.bf16.msra.mxu1 %v8072_v6  ;;  %v8974_v32 = vadd.f32 %v6708_v24, %v443_v28  ;;  %v448_v46 = vadd.f32 %v6653_v36, %v8747_v4  ;;  %v1175_v4 = vrot.slane %v8892_v25, 2  ;;  %v8083_v25 = vld [vmem:[%s10395_s3 + $0x1a8] sm:$0xff]   ;;  %v1523_v6 = vsel %vm627_vm0, %v8092_v1, 0  ;;  %v8100_v16 = vld [vmem:[%s10395_s3 + $0x254] sm:$0xff]   ;;  %v8101_v17 = vld [vmem:[%s10395_s3 + $0x220] sm:$0xff]  }
 0x148   :  { %7241 = vmatprep.subr.bf16.mxu1 %v8395_v39  ;;  %v8096_v12 = vld [vmem:[%s10395_s3 + $0x244] sm:$0xff]   ;;  %v8106_v19 = vld [vmem:[%s10395_s3 + $0x26c] ss:$0 sps:$4 sm:$0x33]   ;;  %v8105_v23 = vld [vmem:[%s10395_s3 + $0x230] sm:$0xff]   ;;  %v1580_v34 = vrot.slane %v9046_v5, 2 }
 0x149   :  { %7222 = vmatpush3.bf16.msra.mxu0 %v8073_v9  ;;  %v8990_v54 = vadd.f32 %v6711_v47, %v448_v46  ;;  %v1421_v9 = vsel %vm627_vm0, %v8093_v40, 0  ;;  %v8103_v20 = vld [vmem:[%s10395_s3 + $0x228] sm:$0xff]   ;;  %v8107_v24 = vld [vmem:[%s10395_s3 + $0x238] ss:$0 sps:$4 sm:$0x33]   ;;  %v8109_v33 = vld [vmem:[%s10395_s3 + $0x270] sm:$0xff]  }
 0x14a   :  { %7223 = vmatprep.subr.bf16.mxu0 %v8395_v39  ;;  %v8104_v21 = vld [vmem:[%s10395_s3 + $0x264] sm:$0xff]   ;;  %v1624_v28 = vsel %vm627_vm0, %v8107_v24, 0  ;;  %v8110_v35 = vld [vmem:[%s10395_s3 + $0x2ac] sm:$0xff]   ;;  %v8111_v36 = vld [vmem:[%s10395_s3 + $0x278] sm:$0xff]   ;;  %v544_v47 = vmax.f32 %v8784_v43, 0.0 }
 0x14b   :  { %7242 = vmatpush3.bf16.msra.mxu1 %v8074_v14  ;;  %v8098_v14 = vld [vmem:[%s10395_s3 + $0x24c] sm:$0xff]   ;;  %v8112_v37 = vld [vmem:[%s10395_s3 + $0x2b4] sm:$0xff]   ;;  %v8113_v38 = vld [vmem:[%s10395_s3 + $0x280] sm:$0xff]  }
 0x14c   :  { %7243 = vmatprep.subr.bf16.mxu1 %v8395_v39  ;;  %v8115_v42 = vld [vmem:[%s10395_s3 + $0x288] sm:$0xff]   ;;  %v8120_v48 = vld [vmem:[%s10395_s3 + $0x2d4] ss:$0 sps:$4 sm:$0x33]  }
 0x14d   :  { %7224 = vmatpush3.bf16.msra.mxu0 %v8075_v18  ;;  %v8102_v18 = vld [vmem:[%s10395_s3 + $0x25c] sm:$0xff]   ;;  %v8116_v44 = vld [vmem:[%s10395_s3 + $0x2c4] sm:$0xff]   ;;  %v8118_v46 = vld [vmem:[%s10395_s3 + $0x2cc] sm:$0xff]   ;;  %v1928_v43 = vsel %vm627_vm0, %v8120_v48, 0 }
 0x14e   :  { %7225 = vmatprep.subr.bf16.mxu0 %v8395_v39  ;;  %v8121_v51 = vld [vmem:[%s10395_s3 + $0x2a0] ss:$0 sps:$4 sm:$0x33]   ;;  %v8130_v63 = vld [vmem:[%s10395_s3 + $0x32c] sm:$0xff]   ;;  %v8132_v1 = vld [vmem:[%s10395_s3 + $0x334] sm:$0xff]  }
 0x14f   :  { %7244 = vmatpush3.bf16.msra.mxu1 %v8076_v26  ;;  %v1725_v26 = vsel %vm627_vm0, %v8106_v19, 0  ;;  %v8135_v40 = vld [vmem:[%s10395_s3 + $0x308] ss:$0 sps:$4 sm:$0x33]   ;;  %v8145_v19 = vld [vmem:[%s10395_s3 + $0x360] sm:$0xff]  }
 0x150   :  { %7245 = vmatprep.subr.bf16.mxu1 %v8395_v39  ;;  %v8152_v48 = vld [vmem:[%s10395_s3 + $0x3e4] sm:$0xff]  }
 0x151   :  { %7226 = vmatpush3.bf16.msra.mxu0 %v8077_v31  ;;  %v1681_v31 = vrot.slane %v9046_v5, 3 }
 0x152   :  { %7227 = vmatprep.subr.bf16.mxu0 %v8395_v39 }
 0x153   :  { %7246 = vmatpush3.bf16.msra.mxu1 %v1320_v41  ;;  %v8114_v41 = vld [vmem:[%s10395_s3 + $0x2bc] sm:$0xff]  }
 0x154   :  { %7269 = vmatprep.subr.bf16.mxu1 %v8395_v39 }
 0x155   :  { %7228 = vmatpush3.bf16.msra.mxu0 %v1219_v45  ;;  %v8117_v45 = vld [vmem:[%s10395_s3 + $0x290] sm:$0xff]  }
 0x156   :  { %7248 = vmatmul.mubr.msk.bf16.vlgmr.msra.gmra.mrb[40].mxu1 %vm623_vm2, %v1276_v53  ;;  %7251 = vmatprep.subr.bf16.mxu0 %v8395_v39  ;;  %v9185_v53 = vpack.c.bf16 %v544_v47, %v544_v47  ;;  %v8151_v47 = vld [vmem:[%s10395_s3 + $0x3a8] sm:$0xff]  }
 0x157   :  { %7270 = vmatpush3.bf16.msra.mxu1 %v8080_v50  ;;  %7283 = vmatprep.mubr.msk.bf16.mxu1 %vm8396_vm1, %v8395_v39  ;;  %v8119_v50 = vld [vmem:[%s10395_s3 + $0x298] sm:$0xff]  }
 0x158   :  { %7230 = vmatmul.mubr.msk.bf16.vlgmr.msra.gmra.mrb[40].mxu0 %vm623_vm2, %v1175_v4  ;;  %7271 = vmatprep.subr.bf16.mxu1 %v8395_v39  ;;  %v8122_v4 = vld [vmem:[%s10395_s3 + $0x30c] sm:$0xff]  }
 0x159   :  { %7252 = vmatpush3.bf16.msra.mxu0 %v8081_v55  ;;  %7265 = vmatprep.mubr.msk.bf16.mxu0 %vm8396_vm1, %v8395_v39  ;;  %v1826_v55 = vsel %vm627_vm0, %v8121_v51, 0  ;;  %v8154_v51 = vld [vmem:[%s10395_s3 + $0x3ec] sm:$0xff]  }
 0x15a   :  { %7253 = vmatprep.subr.bf16.mxu0 %v8395_v39 }
 0x15b   :  { %7272 = vmatpush3.bf16.msra.mxu1 %v8082_v56  ;;  %v1884_v56 = vrot.slane %v9185_v53, 1 }
 0x15c   :  { %7273 = vmatprep.subr.bf16.mxu1 %v8395_v39 }
 0x15d   :  { %7254 = vmatpush3.bf16.msra.mxu0 %v8083_v25  ;;  %v8123_v25 = vld [vmem:[%s10395_s3 + $0x2d8] sm:$0xff]  }
 0x15e   :  { %7255 = vmatprep.subr.bf16.mxu0 %v8395_v39 }
 0x15f   :  { %7274 = vmatpush3.bf16.msra.mxu1 %v8084_v57  ;;  %v8124_v57 = vld [vmem:[%s10395_s3 + $0x314] sm:$0xff]  }
 0x160   :  { %7275 = vmatprep.subr.bf16.mxu1 %v8395_v39 }
 0x161   :  { %7256 = vmatpush3.bf16.msra.mxu0 %v8085_v58  ;;  %v8125_v58 = vld [vmem:[%s10395_s3 + $0x2e0] sm:$0xff]  }
 0x162   :  { %7257 = vmatprep.subr.bf16.mxu0 %v8395_v39 }
 0x163   :  { %7276 = vmatpush3.bf16.msra.mxu1 %v8086_v59  ;;  %v8126_v59 = vld [vmem:[%s10395_s3 + $0x31c] sm:$0xff]  }
 0x164   :  { %7277 = vmatprep.subr.bf16.mxu1 %v8395_v39 }
 0x165   :  { %7258 = vmatpush3.bf16.msra.mxu0 %v8087_v60  ;;  %v8127_v60 = vld [vmem:[%s10395_s3 + $0x2e8] sm:$0xff]  }
 0x166   :  { %7259 = vmatprep.subr.bf16.mxu0 %v8395_v39 }
 0x167   :  { %7278 = vmatpush3.bf16.msra.mxu1 %v8088_v61  ;;  %v8128_v61 = vld [vmem:[%s10395_s3 + $0x324] sm:$0xff]  }
 0x168   :  { %7279 = vmatprep.subr.bf16.mxu1 %v8395_v39 }
 0x169   :  { %7260 = vmatpush3.bf16.msra.mxu0 %v8089_v62  ;;  %v8129_v62 = vld [vmem:[%s10395_s3 + $0x2f0] sm:$0xff]  }
 0x16a   :  { %7261 = vmatprep.subr.bf16.mxu0 %v8395_v39 }
 0x16b   :  { %7280 = vmatpush3.bf16.msra.mxu1 %v8090_v0  ;;  %v8131_v0 = vld [vmem:[%s10395_s3 + $0x2f8] sm:$0xff]  }
 0x16c   :  { %7281 = vmatprep.subr.bf16.mxu1 %v8395_v39 }
 0x16d   :  { %7262 = vmatpush3.bf16.msra.mxu0 %v8091_v2  ;;  %v8134_v2 = vld [vmem:[%s10395_s3 + $0x33c] ss:$0 sps:$4 sm:$0x33]  }
 0x16e   :  { %7263 = vmatprep.subr.bf16.mxu0 %v8395_v39 }
 0x16f   :  { %7282 = vmatpush3.bf16.msra.mxu1 %v1523_v6  ;;  %v2130_v6 = vsel %vm627_vm0, %v8134_v2, 0  ;;  %v8161_v2 = vld [vmem:[%s10395_s3 + $0x3d0] sm:$0xff]  }
 0x170   :  { %7305 = vmatprep.subr.bf16.mxu1 %v8395_v39 }
 0x171   :  { %7264 = vmatpush3.bf16.msra.mxu0 %v1421_v9  ;;  %v8136_v9 = vld [vmem:[%s10395_s3 + $0x374] sm:$0xff]  }
 0x172   :  { %7284 = vmatmul.mubr.msk.bf16.vlgmr.msra.gmra.mrb[44].mxu1 %vm623_vm2, %v1479_v7  ;;  %7287 = vmatprep.subr.bf16.mxu0 %v8395_v39  ;;  %v2029_v7 = vsel %vm627_vm0, %v8135_v40, 0  ;;  %v8163_v40 = vld [vmem:[%s10395_s3 + $0x3d8] ss:$0 sps:$4 sm:$0x33]  }
 0x173   :  { %7306 = vmatpush3.bf16.msra.mxu1 %v8094_v10  ;;  %7319 = vmatprep.mubr.msk.bf16.mxu1 %vm8396_vm1, %v8395_v39  ;;  %v2086_v10 = vrot.slane %v9185_v53, 3 }
 0x174   :  { %7266 = vmatmul.mubr.msk.bf16.vlgmr.msra.gmra.mrb[44].mxu0 %vm623_vm2, %v9046_v5  ;;  %7307 = vmatprep.subr.bf16.mxu1 %v8395_v39  ;;  %v8133_v5 = vld [vmem:[%s10395_s3 + $0x300] sm:$0xff]  }
 0x175   :  { %7288 = vmatpush3.bf16.msra.mxu0 %v8095_v11  ;;  %7301 = vmatprep.mubr.msk.bf16.mxu0 %vm8396_vm1, %v8395_v39  ;;  %v8137_v11 = vld [vmem:[%s10395_s3 + $0x340] sm:$0xff]  }
 0x176   :  { %7289 = vmatprep.subr.bf16.mxu0 %v8395_v39 }
 0x177   :  { %7308 = vmatpush3.bf16.msra.mxu1 %v8096_v12  ;;  %v1985_v12 = vrot.slane %v9185_v53, 2 }
 0x178   :  { %7309 = vmatprep.subr.bf16.mxu1 %v8395_v39 }
 0x179   :  { %7290 = vmatpush3.bf16.msra.mxu0 %v8097_v13  ;;  %v8138_v13 = vld [vmem:[%s10395_s3 + $0x37c] sm:$0xff]  }
 0x17a   :  { %7291 = vmatprep.subr.bf16.mxu0 %v8395_v39 }
 0x17b   :  { %7310 = vmatpush3.bf16.msra.mxu1 %v8098_v14  ;;  %v8139_v14 = vld [vmem:[%s10395_s3 + $0x348] sm:$0xff]  }
 0x17c   :  { %7311 = vmatprep.subr.bf16.mxu1 %v8395_v39 }
 0x17d   :  { %7292 = vmatpush3.bf16.msra.mxu0 %v8099_v15  ;;  %v8140_v15 = vld [vmem:[%s10395_s3 + $0x384] sm:$0xff]  }
 0x17e   :  { %7293 = vmatprep.subr.bf16.mxu0 %v8395_v39 }
 0x17f   :  { %7312 = vmatpush3.bf16.msra.mxu1 %v8100_v16  ;;  %v8141_v16 = vld [vmem:[%s10395_s3 + $0x350] sm:$0xff]  }
 0x180   :  { %7313 = vmatprep.subr.bf16.mxu1 %v8395_v39 }
 0x181   :  { %7294 = vmatpush3.bf16.msra.mxu0 %v8101_v17  ;;  %v8142_v17 = vld [vmem:[%s10395_s3 + $0x38c] sm:$0xff]  }
 0x182   :  { %7295 = vmatprep.subr.bf16.mxu0 %v8395_v39 }
 0x183   :  { %7314 = vmatpush3.bf16.msra.mxu1 %v8102_v18  ;;  %v8143_v18 = vld [vmem:[%s10395_s3 + $0x358] sm:$0xff]  }
 0x184   :  { %7315 = vmatprep.subr.bf16.mxu1 %v8395_v39 }
 0x185   :  { %7296 = vmatpush3.bf16.msra.mxu0 %v8103_v20  ;;  %v8144_v20 = vld [vmem:[%s10395_s3 + $0x394] sm:$0xff]  }
 0x186   :  { %7297 = vmatprep.subr.bf16.mxu0 %v8395_v39 }
 0x187   :  { %7316 = vmatpush3.bf16.msra.mxu1 %v8104_v21 }
 0x188   :  { %7317 = vmatprep.subr.bf16.mxu1 %v8395_v39 }
 0x189   :  { %7298 = vmatpush3.bf16.msra.mxu0 %v8105_v23 }
 0x18a   :  { %7299 = vmatprep.subr.bf16.mxu0 %v8395_v39 }
 0x18b   :  { %7318 = vmatpush3.bf16.msra.mxu1 %v1725_v26 }
 0x18c   :  { %7341 = vmatprep.subr.bf16.mxu1 %v8395_v39 }
 0x18d   :  { %7300 = vmatpush3.bf16.msra.mxu0 %v1624_v28  ;;  %v8146_v28 = vld [vmem:[%s10395_s3 + $0x39c] sm:$0xff]  }
 0x18e   :  { %7320 = vmatmul.mubr.msk.bf16.vlgmr.msra.gmra.mrb[48].mxu1 %vm623_vm2, %v1681_v31  ;;  %7323 = vmatprep.subr.bf16.mxu0 %v8395_v39 }
 0x18f   :  { %7342 = vmatpush3.bf16.msra.mxu1 %v8108_v30  ;;  %7355 = vmatprep.mubr.msk.bf16.mxu1 %vm8396_vm1, %v8395_v39  ;;  %v545_v30 = vmax.f32 %v8890_v22, 0.0  ;;  %v8149_v22 = vld [vmem:[%s10395_s3 + $0x370] ss:$0 sps:$4 sm:$0x33]  }
 0x190   :  { %7302 = vmatmul.mubr.msk.bf16.vlgmr.msra.gmra.mrb[48].mxu0 %vm623_vm2, %v1580_v34  ;;  %7343 = vmatprep.subr.bf16.mxu1 %v8395_v39 }
 0x191   :  { %7324 = vmatpush3.bf16.msra.mxu0 %v8109_v33  ;;  %7337 = vmatprep.mubr.msk.bf16.mxu0 %vm8396_vm1, %v8395_v39 }
 0x192   :  { %7325 = vmatprep.subr.bf16.mxu0 %v8395_v39 }
 0x193   :  { %7344 = vmatpush3.bf16.msra.mxu1 %v8110_v35  ;;  %v8148_v35 = vld [vmem:[%s10395_s3 + $0x3a4] ss:$0 sps:$4 sm:$0x33]  }
 0x194   :  { %7345 = vmatprep.subr.bf16.mxu1 %v8395_v39 }
 0x195   :  { %7326 = vmatpush3.bf16.msra.mxu0 %v8111_v36 }
 0x196   :  { %7327 = vmatprep.subr.bf16.mxu0 %v8395_v39 }
 0x197   :  { %7346 = vmatpush3.bf16.msra.mxu1 %v8112_v37  ;;  %v8147_v37 = vld [vmem:[%s10395_s3 + $0x368] sm:$0xff]  }
 0x198   :  { %7347 = vmatprep.subr.bf16.mxu1 %v8395_v39 }
 0x199   :  { %7328 = vmatpush3.bf16.msra.mxu0 %v8113_v38 }
 0x19a   :  { %7329 = vmatprep.subr.bf16.mxu0 %v8395_v39 }
 0x19b   :  { %7348 = vmatpush3.bf16.msra.mxu1 %v8114_v41  ;;  %v9320_v41 = vpack.c.bf16 %v545_v30, %v545_v30  ;;  %v8174_v30 = vld [vmem:[%s10395_s3 + $0x46c] sm:$0xff]  }
 0x19c   :  { %7349 = vmatprep.subr.bf16.mxu1 %v8395_v39 }
 0x19d   :  { %7330 = vmatpush3.bf16.msra.mxu0 %v8115_v42  ;;  %v2333_v42 = vsel %vm627_vm0, %v8148_v35, 0 }
 0x19e   :  { %7331 = vmatprep.subr.bf16.mxu0 %v8395_v39 }
 0x19f   :  { %7350 = vmatpush3.bf16.msra.mxu1 %v8116_v44  ;;  %v2231_v44 = vsel %vm627_vm0, %v8149_v22, 0 }
 0x1a0   :  { %7351 = vmatprep.subr.bf16.mxu1 %v8395_v39 }
 0x1a1   :  { %7332 = vmatpush3.bf16.msra.mxu0 %v8117_v45  ;;  %v8150_v45 = vld [vmem:[%s10395_s3 + $0x3dc] sm:$0xff]  }
 0x1a2   :  { %7333 = vmatprep.subr.bf16.mxu0 %v8395_v39 }
 0x1a3   :  { %7352 = vmatpush3.bf16.msra.mxu1 %v8118_v46  ;;  %v2289_v46 = vrot.slane %v9320_v41, 1 }
 0x1a4   :  { %7353 = vmatprep.subr.bf16.mxu1 %v8395_v39 }
 0x1a5   :  { %7334 = vmatpush3.bf16.msra.mxu0 %v8119_v50  ;;  %v8153_v50 = vld [vmem:[%s10395_s3 + $0x3b0] sm:$0xff]  }
 0x1a6   :  { %7335 = vmatprep.subr.bf16.mxu0 %v8395_v39 }
 0x1a7   :  { %7354 = vmatpush3.bf16.msra.mxu1 %v1928_v43  ;;  %v8156_v43 = vld [vmem:[%s10395_s3 + $0x3f4] sm:$0xff]  }
 0x1a8   :  { %7377 = vmatprep.subr.bf16.mxu1 %v8395_v39 }
 0x1a9   :  { %7336 = vmatpush3.bf16.msra.mxu0 %v1826_v55  ;;  %v8157_v55 = vld [vmem:[%s10395_s3 + $0x3c0] sm:$0xff]  }
 0x1aa   :  { %7356 = vmatmul.mubr.msk.bf16.vlgmr.msra.gmra.mrb[52].mxu1 %vm623_vm2, %v1884_v56  ;;  %7359 = vmatprep.subr.bf16.mxu0 %v8395_v39 }
 0x1ab   :  { %7378 = vmatpush3.bf16.msra.mxu1 %v8122_v4  ;;  %7391 = vmatprep.mubr.msk.bf16.mxu1 %vm8396_vm1, %v8395_v39  ;;  %v8158_v4 = vld [vmem:[%s10395_s3 + $0x3fc] sm:$0xff]  }
 0x1ac   :  { %7338 = vmatmul.mubr.msk.bf16.vlgmr.msra.gmra.mrb[52].mxu0 %vm623_vm2, %v9185_v53  ;;  %7379 = vmatprep.subr.bf16.mxu1 %v8395_v39  ;;  %v8155_v53 = vld [vmem:[%s10395_s3 + $0x3b8] sm:$0xff]  }
 0x1ad   :  { %7360 = vmatpush3.bf16.msra.mxu0 %v8123_v25  ;;  %7373 = vmatprep.mubr.msk.bf16.mxu0 %vm8396_vm1, %v8395_v39  ;;  %v8159_v25 = vld [vmem:[%s10395_s3 + $0x3c8] sm:$0xff]  }
 0x1ae   :  { %7361 = vmatprep.subr.bf16.mxu0 %v8395_v39 }
 0x1af   :  { %7380 = vmatpush3.bf16.msra.mxu1 %v8124_v57 }
 0x1b0   :  { %7381 = vmatprep.subr.bf16.mxu1 %v8395_v39 }
 0x1b1   :  { %7362 = vmatpush3.bf16.msra.mxu0 %v8125_v58 }
 0x1b2   :  { %7363 = vmatprep.subr.bf16.mxu0 %v8395_v39 }
 0x1b3   :  { %7382 = vmatpush3.bf16.msra.mxu1 %v8126_v59 }
 0x1b4   :  { %7383 = vmatprep.subr.bf16.mxu1 %v8395_v39 }
 0x1b5   :  { %7364 = vmatpush3.bf16.msra.mxu0 %v8127_v60  ;;  %v8160_v60 = vld [vmem:[%s10395_s3 + $0x404] sm:$0xff]  }
 0x1b6   :  { %7365 = vmatprep.subr.bf16.mxu0 %v8395_v39 }
 0x1b7   :  { %7384 = vmatpush3.bf16.msra.mxu1 %v8128_v61 }
 0x1b8   :  { %7385 = vmatprep.subr.bf16.mxu1 %v8395_v39 }
 0x1b9   :  { %7366 = vmatpush3.bf16.msra.mxu0 %v8129_v62 }
 0x1ba   :  { %7367 = vmatprep.subr.bf16.mxu0 %v8395_v39 }
 0x1bb   :  { %7386 = vmatpush3.bf16.msra.mxu1 %v8130_v63 }
 0x1bc   :  { %7387 = vmatprep.subr.bf16.mxu1 %v8395_v39 }
 0x1bd   :  { %7368 = vmatpush3.bf16.msra.mxu0 %v8131_v0  ;;  %v8162_v0 = vld [vmem:[%s10395_s3 + $0x40c] ss:$0 sps:$4 sm:$0x33]  }
 0x1be   :  { %7369 = vmatprep.subr.bf16.mxu0 %v8395_v39 }
 0x1bf   :  { %7388 = vmatpush3.bf16.msra.mxu1 %v8132_v1 }
 0x1c0   :  { %7389 = vmatprep.subr.bf16.mxu1 %v8395_v39 }
 0x1c1   :  { %7370 = vmatpush3.bf16.msra.mxu0 %v8133_v5 }
 0x1c2   :  { %7371 = vmatprep.subr.bf16.mxu0 %v8395_v39 }
 0x1c3   :  { %7390 = vmatpush3.bf16.msra.mxu1 %v2130_v6 }
 0x1c4   :  { %7413 = vmatprep.subr.bf16.mxu1 %v8395_v39 }
 0x1c5   :  { %7372 = vmatpush3.bf16.msra.mxu0 %v2029_v7  ;;  %v2535_v7 = vsel %vm627_vm0, %v8162_v0, 0 }
 0x1c6   :  { %7392 = vmatmul.mubr.msk.bf16.vlgmr.msra.gmra.mrb[56].mxu1 %vm623_vm2, %v2086_v10  ;;  %7395 = vmatprep.subr.bf16.mxu0 %v8395_v39  ;;  %v8164_v10 = vld [vmem:[%s10395_s3 + $0x444] sm:$0xff]  }
 0x1c7   :  { %7414 = vmatpush3.bf16.msra.mxu1 %v8136_v9  ;;  %7427 = vmatprep.mubr.msk.bf16.mxu1 %vm8396_vm1, %v8395_v39  ;;  %v2434_v9 = vsel %vm627_vm0, %v8163_v40, 0 }
 0x1c8   :  { %7374 = vmatmul.mubr.msk.bf16.vlgmr.msra.gmra.mrb[56].mxu0 %vm623_vm2, %v1985_v12  ;;  %7415 = vmatprep.subr.bf16.mxu1 %v8395_v39  ;;  %v8165_v12 = vld [vmem:[%s10395_s3 + $0x410] sm:$0xff]  }
 0x1c9   :  { %7396 = vmatpush3.bf16.msra.mxu0 %v8137_v11  ;;  %7409 = vmatprep.mubr.msk.bf16.mxu0 %vm8396_vm1, %v8395_v39  ;;  %v2491_v11 = vrot.slane %v9320_v41, 3 }
 0x1ca   :  { %7397 = vmatprep.subr.bf16.mxu0 %v8395_v39 }
 0x1cb   :  { %7416 = vmatpush3.bf16.msra.mxu1 %v8138_v13  ;;  %v2390_v13 = vrot.slane %v9320_v41, 2 }
 0x1cc   :  { %7417 = vmatprep.subr.bf16.mxu1 %v8395_v39 }
 0x1cd   :  { %7398 = vmatpush3.bf16.msra.mxu0 %v8139_v14  ;;  %v8166_v14 = vld [vmem:[%s10395_s3 + $0x44c] sm:$0xff]  }
 0x1ce   :  { %7399 = vmatprep.subr.bf16.mxu0 %v8395_v39 }
 0x1cf   :  { %7418 = vmatpush3.bf16.msra.mxu1 %v8140_v15  ;;  %v8167_v15 = vld [vmem:[%s10395_s3 + $0x418] sm:$0xff]  }
 0x1d0   :  { %7419 = vmatprep.subr.bf16.mxu1 %v8395_v39 }
 0x1d1   :  { %7400 = vmatpush3.bf16.msra.mxu0 %v8141_v16  ;;  %v8168_v16 = vld [vmem:[%s10395_s3 + $0x454] sm:$0xff]  }
 0x1d2   :  { %7401 = vmatprep.subr.bf16.mxu0 %v8395_v39 }
 0x1d3   :  { %7420 = vmatpush3.bf16.msra.mxu1 %v8142_v17  ;;  %v8169_v17 = vld [vmem:[%s10395_s3 + $0x420] sm:$0xff]  }
 0x1d4   :  { %7421 = vmatprep.subr.bf16.mxu1 %v8395_v39 }
 0x1d5   :  { %7402 = vmatpush3.bf16.msra.mxu0 %v8143_v18  ;;  %v750_v21 = vpop.f32.mrb[28].mxu1  ;;  %v8170_v18 = vld [vmem:[%s10395_s3 + $0x45c] sm:$0xff]  }
 0x1d6   :  { %v7141_v23 = vpop.f32.mrb[29].mxu1  ;;  %7403 = vmatprep.subr.bf16.mxu0 %v8395_v39 }
 0x1d7   :  { %7422 = vmatpush3.bf16.msra.mxu1 %v8144_v20  ;;  %v665_v24 = vpop.f32.mrb[28].mxu0  ;;  %v753_v26 = vpop.f32.mrb[30].mxu1  ;;  %v8171_v20 = vld [vmem:[%s10395_s3 + $0x428] sm:$0xff]   ;;  %v8173_v23 = vld [vmem:[%s10395_s3 + $0x430] sm:$0xff]  }
 0x1d8   :  { %v751_v31 = vadd.f32 %v750_v21, %v665_v24  ;;  %v7123_v33 = vpop.f32.mrb[29].mxu0  ;;  %v7142_v34 = vpop.f32.mrb[31].mxu1  ;;  %7423 = vmatprep.subr.bf16.mxu1 %v8395_v39  ;;  %v8172_v21 = vld [vmem:[%s10395_s3 + $0x464] sm:$0xff]  }
 0x1d9   :  { %7404 = vmatpush3.bf16.msra.mxu0 %v8145_v19  ;;  %v668_v36 = vpop.f32.mrb[30].mxu0 }
 0x1da   :  { %v7124_v38 = vpop.f32.mrb[31].mxu0  ;;  %7405 = vmatprep.subr.bf16.mxu0 %v8395_v39  ;;  %v8176_v36 = vld [vmem:[%s10395_s3 + $0x474] ss:$0 sps:$4 sm:$0x33]  }
 0x1db   :  { %7424 = vmatpush3.bf16.msra.mxu1 %v8146_v28  ;;  %v8175_v38 = vld [vmem:[%s10395_s3 + $0x438] sm:$0xff]  }
 0x1dc   :  { %7425 = vmatprep.subr.bf16.mxu1 %v8395_v39 }
 0x1dd   :  { %7406 = vmatpush3.bf16.msra.mxu0 %v8147_v37 }
 0x1de   :  { %7407 = vmatprep.subr.bf16.mxu0 %v8395_v39 }
 0x1df   :  { %7426 = vmatpush3.bf16.msra.mxu1 %v2333_v42 }
 0x1e0   :  { %7449 = vmatprep.subr.bf16.mxu1 %v8395_v39 }
 0x1e1   :  { %7408 = vmatpush3.bf16.msra.mxu0 %v2231_v44  ;;  %v2738_v44 = vsel %vm627_vm0, %v8176_v36, 0 }
 0x1e2   :  { %7428 = vmatmul.mubr.msk.bf16.vlgmr.msra.gmra.mrb[60].mxu1 %vm623_vm2, %v2289_v46  ;;  %7431 = vmatprep.subr.bf16.mxu0 %v8395_v39  ;;  %v8178_v46 = vld [vmem:[%s10395_s3 + $0x4ac] sm:$0xff]  }
 0x1e3   :  { %7450 = vmatpush3.bf16.msra.mxu1 %v8150_v45  ;;  %7463 = vmatprep.mubr.msk.bf16.mxu1 %vm8396_vm1, %v8395_v39 }
 0x1e4   :  { %7410 = vmatmul.mubr.msk.bf16.vlgmr.msra.gmra.mrb[60].mxu0 %vm623_vm2, %v9320_v41  ;;  %7451 = vmatprep.subr.bf16.mxu1 %v8395_v39 }
 0x1e5   :  { %7432 = vmatpush3.bf16.msra.mxu0 %v8151_v47  ;;  %7445 = vmatprep.mubr.msk.bf16.mxu0 %vm8396_vm1, %v8395_v39 }
 0x1e6   :  { %7433 = vmatprep.subr.bf16.mxu0 %v8395_v39 }
 0x1e7   :  { %7452 = vmatpush3.bf16.msra.mxu1 %v8152_v48  ;;  %v8179_v48 = vld [vmem:[%s10395_s3 + $0x478] sm:$0xff]  }
 0x1e8   :  { %7453 = vmatprep.subr.bf16.mxu1 %v8395_v39 }
 0x1e9   :  { %7434 = vmatpush3.bf16.msra.mxu0 %v8153_v50  ;;  %v8180_v50 = vld [vmem:[%s10395_s3 + $0x4b4] sm:$0xff]  }
 0x1ea   :  { %7435 = vmatprep.subr.bf16.mxu0 %v8395_v39 }
 0x1eb   :  { %7454 = vmatpush3.bf16.msra.mxu1 %v8154_v51  ;;  %v8181_v51 = vld [vmem:[%s10395_s3 + $0x480] sm:$0xff]  }
 0x1ec   :  { %7455 = vmatprep.subr.bf16.mxu1 %v8395_v39 }
 0x1ed   :  { %7436 = vmatpush3.bf16.msra.mxu0 %v8155_v53  ;;  %v8182_v53 = vld [vmem:[%s10395_s3 + $0x4bc] sm:$0xff]  }
 0x1ee   :  { %7437 = vmatprep.subr.bf16.mxu0 %v8395_v39 }
 0x1ef   :  { %7456 = vmatpush3.bf16.msra.mxu1 %v8156_v43  ;;  %v8183_v43 = vld [vmem:[%s10395_s3 + $0x488] sm:$0xff]  }
 0x1f0   :  { %7457 = vmatprep.subr.bf16.mxu1 %v8395_v39 }
 0x1f1   :  { %v951_v56 = vpop.f32.mrb[32].mxu1  ;;  %7438 = vmatpush3.bf16.msra.mxu0 %v8157_v55  ;;  %v8184_v55 = vld [vmem:[%s10395_s3 + $0x4c4] sm:$0xff]  }
 0x1f2   :  { %v7177_v57 = vpop.f32.mrb[33].mxu1  ;;  %7439 = vmatprep.subr.bf16.mxu0 %v8395_v39 }
 0x1f3   :  { %v850_v58 = vpop.f32.mrb[32].mxu0  ;;  %v954_v59 = vpop.f32.mrb[34].mxu1  ;;  %7458 = vmatpush3.bf16.msra.mxu1 %v8158_v4  ;;  %v8185_v4 = vld [vmem:[%s10395_s3 + $0x490] sm:$0xff]   ;;  %v8187_v57 = vld [vmem:[%s10395_s3 + $0x498] sm:$0xff]  }
 0x1f4   :  { %v856_v61 = vadd.f32 %v850_v58, %v751_v31  ;;  %v7159_v62 = vpop.f32.mrb[33].mxu0  ;;  %v7178_v63 = vpop.f32.mrb[35].mxu1  ;;  %7459 = vmatprep.subr.bf16.mxu1 %v8395_v39  ;;  %v546_v31 = vmax.f32 %v8896_v27, 0.0  ;;  %v8177_v27 = vld [vmem:[%s10395_s3 + $0x440] ss:$0 sps:$4 sm:$0x33]  }
 0x1f5   :  { %v853_v1 = vpop.f32.mrb[34].mxu0  ;;  %7440 = vmatpush3.bf16.msra.mxu0 %v8159_v25  ;;  %v2636_v45 = vsel %vm627_vm0, %v8177_v27, 0 }
 0x1f6   :  { %v7160_v5 = vpop.f32.mrb[35].mxu0  ;;  %7441 = vmatprep.subr.bf16.mxu0 %v8395_v39  ;;  %v957_v6 = vadd.f32 %v951_v56, %v856_v61  ;;  %v9455_v42 = vpack.c.bf16 %v546_v31, %v546_v31  ;;  %v8186_v56 = vld [vmem:[%s10395_s3 + $0x4cc] sm:$0xff]   ;;  %v8188_v61 = vld [vmem:[%s10395_s3 + $0x4d4] sm:$0xff]   ;;  %v8190_v1 = vld [vmem:[%s10395_s3 + $0x4dc] ss:$0 sps:$4 sm:$0x33]  }
 0x1f7   :  { %7460 = vmatpush3.bf16.msra.mxu1 %v8160_v60  ;;  %v8189_v5 = vld [vmem:[%s10395_s3 + $0x4a0] sm:$0xff]  }
 0x1f8   :  { %7461 = vmatprep.subr.bf16.mxu1 %v8395_v39  ;;  %v2694_v47 = vrot.slane %v9455_v42, 1  ;;  %v8202_v31 = vld [vmem:[%s10395_s3 + $0x53c] sm:$0xff]  }
 0x1f9   :  { %7442 = vmatpush3.bf16.msra.mxu0 %v8161_v2 }
 0x1fa   :  { %7443 = vmatprep.subr.bf16.mxu0 %v8395_v39 }
 0x1fb   :  { %7462 = vmatpush3.bf16.msra.mxu1 %v2535_v7 }
 0x1fc   :  { %7485 = vmatprep.subr.bf16.mxu1 %v8395_v39 }
 0x1fd   :  { %7444 = vmatpush3.bf16.msra.mxu0 %v2434_v9  ;;  %v2940_v9 = vsel %vm627_vm0, %v8190_v1, 0  ;;  %v8218_v1 = vld [vmem:[%s10395_s3 + $0x5ac] ss:$0 sps:$4 sm:$0x33]  }
 0x1fe   :  { %7464 = vmatmul.mubr.msk.bf16.vlgmr.msra.gmra.mrb[64].mxu1 %vm623_vm2, %v2491_v11  ;;  %7467 = vmatprep.subr.bf16.mxu0 %v8395_v39  ;;  %v8192_v11 = vld [vmem:[%s10395_s3 + $0x514] sm:$0xff]  }
 0x1ff   :  { %7486 = vmatpush3.bf16.msra.mxu1 %v8164_v10  ;;  %7499 = vmatprep.mubr.msk.bf16.mxu1 %vm8396_vm1, %v8395_v39 }
 0x200   :  { %7446 = vmatmul.mubr.msk.bf16.vlgmr.msra.gmra.mrb[64].mxu0 %vm623_vm2, %v2390_v13  ;;  %7487 = vmatprep.subr.bf16.mxu1 %v8395_v39  ;;  %v8193_v13 = vld [vmem:[%s10395_s3 + $0x4e0] sm:$0xff]  }
 0x201   :  { %7468 = vmatpush3.bf16.msra.mxu0 %v8165_v12  ;;  %7481 = vmatprep.mubr.msk.bf16.mxu0 %vm8396_vm1, %v8395_v39  ;;  %v2896_v12 = vrot.slane %v9455_v42, 3 }
 0x202   :  { %7469 = vmatprep.subr.bf16.mxu0 %v8395_v39 }
 0x203   :  { %7488 = vmatpush3.bf16.msra.mxu1 %v8166_v14  ;;  %v2795_v14 = vrot.slane %v9455_v42, 2 }
 0x204   :  { %7489 = vmatprep.subr.bf16.mxu1 %v8395_v39 }
 0x205   :  { %7470 = vmatpush3.bf16.msra.mxu0 %v8167_v15  ;;  %v8194_v15 = vld [vmem:[%s10395_s3 + $0x51c] sm:$0xff]  }
 0x206   :  { %7471 = vmatprep.subr.bf16.mxu0 %v8395_v39 }
 0x207   :  { %7490 = vmatpush3.bf16.msra.mxu1 %v8168_v16  ;;  %v8195_v16 = vld [vmem:[%s10395_s3 + $0x4e8] sm:$0xff]  }
 0x208   :  { %7491 = vmatprep.subr.bf16.mxu1 %v8395_v39 }
 0x209   :  { %7472 = vmatpush3.bf16.msra.mxu0 %v8169_v17  ;;  %v8196_v17 = vld [vmem:[%s10395_s3 + $0x524] sm:$0xff]  }
 0x20a   :  { %7473 = vmatprep.subr.bf16.mxu0 %v8395_v39 }
 0x20b   :  { %7492 = vmatpush3.bf16.msra.mxu1 %v8170_v18  ;;  %v8197_v18 = vld [vmem:[%s10395_s3 + $0x4f0] sm:$0xff]  }
 0x20c   :  { %7493 = vmatprep.subr.bf16.mxu1 %v8395_v39 }
 0x20d   :  { %v1154_v19 = vpop.f32.mrb[36].mxu1  ;;  %7474 = vmatpush3.bf16.msra.mxu0 %v8171_v20  ;;  %v8198_v20 = vld [vmem:[%s10395_s3 + $0x52c] sm:$0xff]  }
 0x20e   :  { %v7213_v24 = vpop.f32.mrb[37].mxu1  ;;  %7475 = vmatprep.subr.bf16.mxu0 %v8395_v39 }
 0x20f   :  { %v1052_v26 = vpop.f32.mrb[36].mxu0  ;;  %v1157_v28 = vpop.f32.mrb[38].mxu1  ;;  %7494 = vmatpush3.bf16.msra.mxu1 %v8172_v21  ;;  %v8199_v21 = vld [vmem:[%s10395_s3 + $0x4f8] sm:$0xff]   ;;  %v8201_v24 = vld [vmem:[%s10395_s3 + $0x500] sm:$0xff]  }
 0x210   :  { %v1058_v33 = vadd.f32 %v1052_v26, %v957_v6  ;;  %v7195_v34 = vpop.f32.mrb[37].mxu0  ;;  %v7214_v35 = vpop.f32.mrb[39].mxu1  ;;  %7495 = vmatprep.subr.bf16.mxu1 %v8395_v39  ;;  %v8191_v6 = vld [vmem:[%s10395_s3 + $0x4a8] ss:$0 sps:$4 sm:$0x33]  }
 0x211   :  { %v1055_v37 = vpop.f32.mrb[38].mxu0  ;;  %7476 = vmatpush3.bf16.msra.mxu0 %v8173_v23  ;;  %v2839_v10 = vsel %vm627_vm0, %v8191_v6, 0  ;;  %v8219_v6 = vld [vmem:[%s10395_s3 + $0x578] ss:$0 sps:$4 sm:$0x33]  }
 0x212   :  { %v7196_v22 = vpop.f32.mrb[39].mxu0  ;;  %7477 = vmatprep.subr.bf16.mxu0 %v8395_v39  ;;  %v1160_v41 = vadd.f32 %v1154_v19, %v1058_v33  ;;  %v8200_v19 = vld [vmem:[%s10395_s3 + $0x534] sm:$0xff]   ;;  %v547_v33 = vmax.f32 %v8917_v49, 0.0  ;;  %v8204_v37 = vld [vmem:[%s10395_s3 + $0x544] ss:$0 sps:$4 sm:$0x33]  }
 0x213   :  { %7496 = vmatpush3.bf16.msra.mxu1 %v8174_v30  ;;  %v8203_v22 = vld [vmem:[%s10395_s3 + $0x508] sm:$0xff]   ;;  %v8205_v49 = vld [vmem:[%s10395_s3 + $0x510] ss:$0 sps:$4 sm:$0x33]  }
 0x214   :  { %7497 = vmatprep.subr.bf16.mxu1 %v8395_v39 }
 0x215   :  { %7478 = vmatpush3.bf16.msra.mxu0 %v8175_v38 }
 0x216   :  { %7479 = vmatprep.subr.bf16.mxu0 %v8395_v39 }
 0x217   :  { %7498 = vmatpush3.bf16.msra.mxu1 %v2738_v44  ;;  %v3143_v44 = vsel %vm627_vm0, %v8204_v37, 0  ;;  %v8232_v37 = vld [vmem:[%s10395_s3 + $0x614] ss:$0 sps:$4 sm:$0x33]  }
 0x218   :  { %7521 = vmatprep.subr.bf16.mxu1 %v8395_v39 }
 0x219   :  { %7480 = vmatpush3.bf16.msra.mxu0 %v2636_v45  ;;  %v3041_v45 = vsel %vm627_vm0, %v8205_v49, 0 }
 0x21a   :  { %7500 = vmatmul.mubr.msk.bf16.vlgmr.msra.gmra.mrb[68].mxu1 %vm623_vm2, %v2694_v47  ;;  %7503 = vmatprep.subr.bf16.mxu0 %v8395_v39 }
 0x21b   :  { %7522 = vmatpush3.bf16.msra.mxu1 %v8178_v46  ;;  %7535 = vmatprep.mubr.msk.bf16.mxu1 %vm8396_vm1, %v8395_v39  ;;  %v8206_v46 = vld [vmem:[%s10395_s3 + $0x57c] sm:$0xff]  }
 0x21c   :  { %7482 = vmatmul.mubr.msk.bf16.vlgmr.msra.gmra.mrb[68].mxu0 %vm623_vm2, %v9455_v42  ;;  %7523 = vmatprep.subr.bf16.mxu1 %v8395_v39  ;;  %v9590_v42 = vpack.c.bf16 %v547_v33, %v547_v33  ;;  %v548_v33 = vmax.f32 %v8927_v52, 0.0  ;;  %v8233_v52 = vld [vmem:[%s10395_s3 + $0x5e0] ss:$0 sps:$4 sm:$0x33]  }
 0x21d   :  { %7504 = vmatpush3.bf16.msra.mxu0 %v8179_v48  ;;  %7517 = vmatprep.mubr.msk.bf16.mxu0 %vm8396_vm1, %v8395_v39  ;;  %v8207_v48 = vld [vmem:[%s10395_s3 + $0x548] sm:$0xff]  }
 0x21e   :  { %7505 = vmatprep.subr.bf16.mxu0 %v8395_v39  ;;  %v3099_v47 = vrot.slane %v9590_v42, 1 }
 0x21f   :  { %7524 = vmatpush3.bf16.msra.mxu1 %v8180_v50  ;;  %v8208_v50 = vld [vmem:[%s10395_s3 + $0x584] sm:$0xff]  }
 0x220   :  { %7525 = vmatprep.subr.bf16.mxu1 %v8395_v39 }
 0x221   :  { %7506 = vmatpush3.bf16.msra.mxu0 %v8181_v51  ;;  %v8209_v51 = vld [vmem:[%s10395_s3 + $0x550] sm:$0xff]  }
 0x222   :  { %7507 = vmatprep.subr.bf16.mxu0 %v8395_v39 }
 0x223   :  { %7526 = vmatpush3.bf16.msra.mxu1 %v8182_v53  ;;  %v8210_v53 = vld [vmem:[%s10395_s3 + $0x58c] sm:$0xff]  }
 0x224   :  { %7527 = vmatprep.subr.bf16.mxu1 %v8395_v39 }
 0x225   :  { %7508 = vmatpush3.bf16.msra.mxu0 %v8183_v43  ;;  %v8211_v43 = vld [vmem:[%s10395_s3 + $0x558] sm:$0xff]  }
 0x226   :  { %7509 = vmatprep.subr.bf16.mxu0 %v8395_v39 }
 0x227   :  { %7528 = vmatpush3.bf16.msra.mxu1 %v8184_v55  ;;  %v8212_v55 = vld [vmem:[%s10395_s3 + $0x594] sm:$0xff]  }
 0x228   :  { %7529 = vmatprep.subr.bf16.mxu1 %v8395_v39 }
 0x229   :  { %v1356_v25 = vpop.f32.mrb[40].mxu1  ;;  %7510 = vmatpush3.bf16.msra.mxu0 %v8185_v4  ;;  %v8213_v4 = vld [vmem:[%s10395_s3 + $0x560] sm:$0xff]  }
 0x22a   :  { %v7249_v58 = vpop.f32.mrb[41].mxu1  ;;  %7511 = vmatprep.subr.bf16.mxu0 %v8395_v39 }
 0x22b   :  { %v1255_v59 = vpop.f32.mrb[40].mxu0  ;;  %v1359_v60 = vpop.f32.mrb[42].mxu1  ;;  %7530 = vmatpush3.bf16.msra.mxu1 %v8186_v56  ;;  %v8214_v56 = vld [vmem:[%s10395_s3 + $0x59c] sm:$0xff]  }
 0x22c   :  { %v1261_v62 = vadd.f32 %v1255_v59, %v1160_v41  ;;  %v7231_v63 = vpop.f32.mrb[41].mxu0  ;;  %v7250_v0 = vpop.f32.mrb[43].mxu1  ;;  %7531 = vmatprep.subr.bf16.mxu1 %v8395_v39 }
 0x22d   :  { %v1258_v2 = vpop.f32.mrb[42].mxu0  ;;  %7512 = vmatpush3.bf16.msra.mxu0 %v8187_v57  ;;  %v8215_v57 = vld [vmem:[%s10395_s3 + $0x568] sm:$0xff]  }
 0x22e   :  { %v7232_v40 = vpop.f32.mrb[43].mxu0  ;;  %7513 = vmatprep.subr.bf16.mxu0 %v8395_v39  ;;  %v1362_v7 = vadd.f32 %v1356_v25, %v1261_v62 }
 0x22f   :  { %7532 = vmatpush3.bf16.msra.mxu1 %v8188_v61  ;;  %v8216_v61 = vld [vmem:[%s10395_s3 + $0x5a4] sm:$0xff]  }
 0x230   :  { %7533 = vmatprep.subr.bf16.mxu1 %v8395_v39 }
 0x231   :  { %7514 = vmatpush3.bf16.msra.mxu0 %v8189_v5  ;;  %v8217_v5 = vld [vmem:[%s10395_s3 + $0x570] sm:$0xff]  }
 0x232   :  { %7515 = vmatprep.subr.bf16.mxu0 %v8395_v39 }
 0x233   :  { %7534 = vmatpush3.bf16.msra.mxu1 %v2940_v9  ;;  %v3345_v9 = vsel %vm627_vm0, %v8218_v1, 0 }
 0x234   :  { %7557 = vmatprep.subr.bf16.mxu1 %v8395_v39 }
 0x235   :  { %7516 = vmatpush3.bf16.msra.mxu0 %v2839_v10  ;;  %v3244_v10 = vsel %vm627_vm0, %v8219_v6, 0 }
 0x236   :  { %7536 = vmatmul.mubr.msk.bf16.vlgmr.msra.gmra.mrb[72].mxu1 %vm623_vm2, %v2896_v12  ;;  %7539 = vmatprep.subr.bf16.mxu0 %v8395_v39  ;;  %v3301_v12 = vrot.slane %v9590_v42, 3 }
 0x237   :  { %7558 = vmatpush3.bf16.msra.mxu1 %v8192_v11  ;;  %7571 = vmatprep.mubr.msk.bf16.mxu1 %vm8396_vm1, %v8395_v39  ;;  %v8220_v11 = vld [vmem:[%s10395_s3 + $0x5e4] sm:$0xff]  }
 0x238   :  { %7518 = vmatmul.mubr.msk.bf16.vlgmr.msra.gmra.mrb[72].mxu0 %vm623_vm2, %v2795_v14  ;;  %7559 = vmatprep.subr.bf16.mxu1 %v8395_v39  ;;  %v3200_v14 = vrot.slane %v9590_v42, 2 }
 0x239   :  { %7540 = vmatpush3.bf16.msra.mxu0 %v8193_v13  ;;  %7553 = vmatprep.mubr.msk.bf16.mxu0 %vm8396_vm1, %v8395_v39  ;;  %v8221_v13 = vld [vmem:[%s10395_s3 + $0x5b0] sm:$0xff]  }
 0x23a   :  { %7541 = vmatprep.subr.bf16.mxu0 %v8395_v39 }
 0x23b   :  { %7560 = vmatpush3.bf16.msra.mxu1 %v8194_v15  ;;  %v8222_v15 = vld [vmem:[%s10395_s3 + $0x5ec] sm:$0xff]  }
 0x23c   :  { %7561 = vmatprep.subr.bf16.mxu1 %v8395_v39 }
 0x23d   :  { %7542 = vmatpush3.bf16.msra.mxu0 %v8195_v16  ;;  %v8223_v16 = vld [vmem:[%s10395_s3 + $0x5b8] sm:$0xff]  }
 0x23e   :  { %7543 = vmatprep.subr.bf16.mxu0 %v8395_v39 }
 0x23f   :  { %7562 = vmatpush3.bf16.msra.mxu1 %v8196_v17  ;;  %v8224_v17 = vld [vmem:[%s10395_s3 + $0x5f4] sm:$0xff]  }
 0x240   :  { %7563 = vmatprep.subr.bf16.mxu1 %v8395_v39 }
 0x241   :  { %7544 = vmatpush3.bf16.msra.mxu0 %v8197_v18  ;;  %v8225_v18 = vld [vmem:[%s10395_s3 + $0x5c0] sm:$0xff]  }
 0x242   :  { %7545 = vmatprep.subr.bf16.mxu0 %v8395_v39 }
 0x243   :  { %7564 = vmatpush3.bf16.msra.mxu1 %v8198_v20  ;;  %v8226_v20 = vld [vmem:[%s10395_s3 + $0x5fc] sm:$0xff]  }
 0x244   :  { %7565 = vmatprep.subr.bf16.mxu1 %v8395_v39 }
 0x245   :  { %7546 = vmatpush3.bf16.msra.mxu0 %v8199_v21  ;;  %v1559_v23 = vpop.f32.mrb[44].mxu1  ;;  %v8227_v21 = vld [vmem:[%s10395_s3 + $0x5c8] sm:$0xff]  }
 0x246   :  { %v7285_v26 = vpop.f32.mrb[45].mxu1  ;;  %7547 = vmatprep.subr.bf16.mxu0 %v8395_v39 }
 0x247   :  { %v1457_v28 = vpop.f32.mrb[44].mxu0  ;;  %7566 = vmatpush3.bf16.msra.mxu1 %v8200_v19  ;;  %v1562_v30 = vpop.f32.mrb[46].mxu1  ;;  %v8228_v19 = vld [vmem:[%s10395_s3 + $0x604] sm:$0xff]  }
 0x248   :  { %v1463_v34 = vadd.f32 %v1457_v28, %v1362_v7  ;;  %v7267_v35 = vpop.f32.mrb[45].mxu0  ;;  %v7286_v36 = vpop.f32.mrb[47].mxu1  ;;  %7567 = vmatprep.subr.bf16.mxu1 %v8395_v39 }
 0x249   :  { %v1460_v38 = vpop.f32.mrb[46].mxu0  ;;  %7548 = vmatpush3.bf16.msra.mxu0 %v8201_v24  ;;  %v8229_v24 = vld [vmem:[%s10395_s3 + $0x5d0] sm:$0xff]  }
 0x24a   :  { %v7268_v27 = vpop.f32.mrb[47].mxu0  ;;  %7549 = vmatprep.subr.bf16.mxu0 %v8395_v39  ;;  %v1565_v41 = vadd.f32 %v1559_v23, %v1463_v34 }
 0x24b   :  { %7568 = vmatpush3.bf16.msra.mxu1 %v8202_v31  ;;  %v8230_v31 = vld [vmem:[%s10395_s3 + $0x60c] sm:$0xff]  }
 0x24c   :  { %7569 = vmatprep.subr.bf16.mxu1 %v8395_v39 }
 0x24d   :  { %7550 = vmatpush3.bf16.msra.mxu0 %v8203_v22  ;;  %v8231_v22 = vld [vmem:[%s10395_s3 + $0x5d8] sm:$0xff]  }
 0x24e   :  { %7551 = vmatprep.subr.bf16.mxu0 %v8395_v39 }
 0x24f   :  { %7570 = vmatpush3.bf16.msra.mxu1 %v3143_v44  ;;  %v3446_v44 = vsel %vm627_vm0, %v8233_v52, 0 }
 0x250   :  { %7593 = vmatprep.subr.bf16.mxu1 %v8395_v39 }
 0x251   :  { %7552 = vmatpush3.bf16.msra.mxu0 %v3041_v45  ;;  %v8234_v45 = vld [vmem:[%s10395_s3 + $0x64c] sm:$0xff]  }
 0x252   :  { %7572 = vmatmul.mubr.msk.bf16.vlgmr.msra.gmra.mrb[76].mxu1 %vm623_vm2, %v3099_v47  ;;  %7575 = vmatprep.subr.bf16.mxu0 %v8395_v39  ;;  %v8235_v47 = vld [vmem:[%s10395_s3 + $0x618] sm:$0xff]  }
 0x253   :  { %7594 = vmatpush3.bf16.msra.mxu1 %v8206_v46  ;;  %7607 = vmatprep.mubr.msk.bf16.mxu1 %vm8396_vm1, %v8395_v39 }
 0x254   :  { %7554 = vmatmul.mubr.msk.bf16.vlgmr.msra.gmra.mrb[76].mxu0 %vm623_vm2, %v9590_v42  ;;  %7595 = vmatprep.subr.bf16.mxu1 %v8395_v39  ;;  %v3548_v42 = vsel %vm627_vm0, %v8232_v37, 0 }
 0x255   :  { %7576 = vmatpush3.bf16.msra.mxu0 %v8207_v48  ;;  %7589 = vmatprep.mubr.msk.bf16.mxu0 %vm8396_vm1, %v8395_v39  ;;  %v8236_v48 = vld [vmem:[%s10395_s3 + $0x654] sm:$0xff]  }
 0x256   :  { %7577 = vmatprep.subr.bf16.mxu0 %v8395_v39 }
 0x257   :  { %7596 = vmatpush3.bf16.msra.mxu1 %v8208_v50  ;;  %v8237_v50 = vld [vmem:[%s10395_s3 + $0x620] sm:$0xff]  }
 0x258   :  { %7597 = vmatprep.subr.bf16.mxu1 %v8395_v39 }
 0x259   :  { %7578 = vmatpush3.bf16.msra.mxu0 %v8209_v51  ;;  %v8238_v51 = vld [vmem:[%s10395_s3 + $0x65c] sm:$0xff]  }
 0x25a   :  { %7579 = vmatprep.subr.bf16.mxu0 %v8395_v39 }
 0x25b   :  { %7598 = vmatpush3.bf16.msra.mxu1 %v8210_v53  ;;  %v8239_v53 = vld [vmem:[%s10395_s3 + $0x628] sm:$0xff]  }
 0x25c   :  { %7599 = vmatprep.subr.bf16.mxu1 %v8395_v39 }
 0x25d   :  { %7580 = vmatpush3.bf16.msra.mxu0 %v8211_v43  ;;  %v8240_v43 = vld [vmem:[%s10395_s3 + $0x664] sm:$0xff]  }
 0x25e   :  { %7581 = vmatprep.subr.bf16.mxu0 %v8395_v39 }
 0x25f   :  { %7600 = vmatpush3.bf16.msra.mxu1 %v8212_v55  ;;  %v8241_v55 = vld [vmem:[%s10395_s3 + $0x630] sm:$0xff]  }
 0x260   :  { %7601 = vmatprep.subr.bf16.mxu1 %v8395_v39 }
 0x261   :  { %v1761_v25 = vpop.f32.mrb[48].mxu1  ;;  %7582 = vmatpush3.bf16.msra.mxu0 %v8213_v4  ;;  %v8242_v4 = vld [vmem:[%s10395_s3 + $0x66c] sm:$0xff]  }
 0x262   :  { %v7321_v58 = vpop.f32.mrb[49].mxu1  ;;  %7583 = vmatprep.subr.bf16.mxu0 %v8395_v39 }
 0x263   :  { %v1660_v59 = vpop.f32.mrb[48].mxu0  ;;  %v1764_v60 = vpop.f32.mrb[50].mxu1  ;;  %7602 = vmatpush3.bf16.msra.mxu1 %v8214_v56 }
 0x264   :  { %v1666_v62 = vadd.f32 %v1660_v59, %v1565_v41  ;;  %v7303_v63 = vpop.f32.mrb[49].mxu0  ;;  %v7322_v0 = vpop.f32.mrb[51].mxu1  ;;  %7603 = vmatprep.subr.bf16.mxu1 %v8395_v39  ;;  %v9725_v41 = vpack.c.bf16 %v548_v33, %v548_v33  ;;  %v8244_v60 = vld [vmem:[%s10395_s3 + $0x674] sm:$0xff]  }
 0x265   :  { %v1663_v2 = vpop.f32.mrb[50].mxu0  ;;  %7584 = vmatpush3.bf16.msra.mxu0 %v8215_v57  ;;  %v8246_v0 = vld [vmem:[%s10395_s3 + $0x67c] ss:$0 sps:$4 sm:$0x33]  }
 0x266   :  { %v7304_v40 = vpop.f32.mrb[51].mxu0  ;;  %7585 = vmatprep.subr.bf16.mxu0 %v8395_v39  ;;  %v1767_v7 = vadd.f32 %v1761_v25, %v1666_v62  ;;  %v3504_v46 = vrot.slane %v9725_v41, 1  ;;  %v8243_v25 = vld [vmem:[%s10395_s3 + $0x638] sm:$0xff]   ;;  %v8245_v2 = vld [vmem:[%s10395_s3 + $0x640] sm:$0xff]  }
 0x267   :  { %7604 = vmatpush3.bf16.msra.mxu1 %v8216_v61  ;;  %v8247_v40 = vld [vmem:[%s10395_s3 + $0x648] ss:$0 sps:$4 sm:$0x33]  }
 0x268   :  { %7605 = vmatprep.subr.bf16.mxu1 %v8395_v39 }
 0x269   :  { %7586 = vmatpush3.bf16.msra.mxu0 %v8217_v5 }
 0x26a   :  { %7587 = vmatprep.subr.bf16.mxu0 %v8395_v39 }
 0x26b   :  { %7606 = vmatpush3.bf16.msra.mxu1 %v3345_v9  ;;  %v3649_v9 = vsel %vm627_vm0, %v8247_v40, 0 }
 0x26c   :  { %7629 = vmatprep.subr.bf16.mxu1 %v8395_v39 }
 0x26d   :  { %7588 = vmatpush3.bf16.msra.mxu0 %v3244_v10  ;;  %v8248_v10 = vld [vmem:[%s10395_s3 + $0x6b4] sm:$0xff]  }
 0x26e   :  { %7608 = vmatmul.mubr.msk.bf16.vlgmr.msra.gmra.mrb[80].mxu1 %vm623_vm2, %v3301_v12  ;;  %7611 = vmatprep.subr.bf16.mxu0 %v8395_v39  ;;  %v8249_v12 = vld [vmem:[%s10395_s3 + $0x680] sm:$0xff]  }
 0x26f   :  { %7630 = vmatpush3.bf16.msra.mxu1 %v8220_v11  ;;  %7643 = vmatprep.mubr.msk.bf16.mxu1 %vm8396_vm1, %v8395_v39  ;;  %v3706_v11 = vrot.slane %v9725_v41, 3 }
 0x270   :  { %7590 = vmatmul.mubr.msk.bf16.vlgmr.msra.gmra.mrb[80].mxu0 %vm623_vm2, %v3200_v14  ;;  %7631 = vmatprep.subr.bf16.mxu1 %v8395_v39  ;;  %v8250_v14 = vld [vmem:[%s10395_s3 + $0x6bc] sm:$0xff]  }
 0x271   :  { %7612 = vmatpush3.bf16.msra.mxu0 %v8221_v13  ;;  %7625 = vmatprep.mubr.msk.bf16.mxu0 %vm8396_vm1, %v8395_v39  ;;  %v3605_v13 = vrot.slane %v9725_v41, 2 }
 0x272   :  { %7613 = vmatprep.subr.bf16.mxu0 %v8395_v39 }
 0x273   :  { %7632 = vmatpush3.bf16.msra.mxu1 %v8222_v15  ;;  %v8251_v15 = vld [vmem:[%s10395_s3 + $0x688] sm:$0xff]  }
 0x274   :  { %7633 = vmatprep.subr.bf16.mxu1 %v8395_v39 }
 0x275   :  { %7614 = vmatpush3.bf16.msra.mxu0 %v8223_v16  ;;  %v8252_v16 = vld [vmem:[%s10395_s3 + $0x6c4] sm:$0xff]  }
 0x276   :  { %7615 = vmatprep.subr.bf16.mxu0 %v8395_v39 }
 0x277   :  { %7634 = vmatpush3.bf16.msra.mxu1 %v8224_v17  ;;  %v8253_v17 = vld [vmem:[%s10395_s3 + $0x690] sm:$0xff]  }
 0x278   :  { %7635 = vmatprep.subr.bf16.mxu1 %v8395_v39 }
 0x279   :  { %7616 = vmatpush3.bf16.msra.mxu0 %v8225_v18  ;;  %v8254_v18 = vld [vmem:[%s10395_s3 + $0x6cc] sm:$0xff]  }
 0x27a   :  { %7617 = vmatprep.subr.bf16.mxu0 %v8395_v39 }
 0x27b   :  { %7636 = vmatpush3.bf16.msra.mxu1 %v8226_v20  ;;  %v8255_v20 = vld [vmem:[%s10395_s3 + $0x698] sm:$0xff]  }
 0x27c   :  { %7637 = vmatprep.subr.bf16.mxu1 %v8395_v39 }
 0x27d   :  { %v1964_v23 = vpop.f32.mrb[52].mxu1  ;;  %7618 = vmatpush3.bf16.msra.mxu0 %v8227_v21  ;;  %v8256_v21 = vld [vmem:[%s10395_s3 + $0x6d4] sm:$0xff]  }
 0x27e   :  { %v7357_v26 = vpop.f32.mrb[53].mxu1  ;;  %7619 = vmatprep.subr.bf16.mxu0 %v8395_v39 }
 0x27f   :  { %v1862_v28 = vpop.f32.mrb[52].mxu0  ;;  %v1967_v30 = vpop.f32.mrb[54].mxu1  ;;  %7638 = vmatpush3.bf16.msra.mxu1 %v8228_v19 }
 0x280   :  { %v1868_v34 = vadd.f32 %v1862_v28, %v1767_v7  ;;  %v7339_v35 = vpop.f32.mrb[53].mxu0  ;;  %v7358_v36 = vpop.f32.mrb[55].mxu1  ;;  %7639 = vmatprep.subr.bf16.mxu1 %v8395_v39  ;;  %v3750_v7 = vsel %vm627_vm0, %v8246_v0, 0  ;;  %v8258_v30 = vld [vmem:[%s10395_s3 + $0x6dc] sm:$0xff]   ;;  %v8273_v0 = vld [vmem:[%s10395_s3 + $0x710] sm:$0xff]  }
 0x281   :  { %v1865_v38 = vpop.f32.mrb[54].mxu0  ;;  %7620 = vmatpush3.bf16.msra.mxu0 %v8229_v24  ;;  %v8260_v36 = vld [vmem:[%s10395_s3 + $0x6e4] ss:$0 sps:$4 sm:$0x33]  }
 0x282   :  { %v7340_v27 = vpop.f32.mrb[55].mxu0  ;;  %7621 = vmatprep.subr.bf16.mxu0 %v8395_v39  ;;  %v1970_v49 = vadd.f32 %v1964_v23, %v1868_v34  ;;  %v8257_v23 = vld [vmem:[%s10395_s3 + $0x6a0] sm:$0xff]   ;;  %v8259_v38 = vld [vmem:[%s10395_s3 + $0x6a8] sm:$0xff]  }
 0x283   :  { %7640 = vmatpush3.bf16.msra.mxu1 %v8230_v31  ;;  %v549_v31 = vmax.f32 %v8940_v3, 0.0  ;;  %v8261_v3 = vld [vmem:[%s10395_s3 + $0x6b0] ss:$0 sps:$4 sm:$0x33]  }
 0x284   :  { %7641 = vmatprep.subr.bf16.mxu1 %v8395_v39 }
 0x285   :  { %7622 = vmatpush3.bf16.msra.mxu0 %v8231_v22  ;;  %v9860_v52 = vpack.c.bf16 %v549_v31, %v549_v31 }
 0x286   :  { %7623 = vmatprep.subr.bf16.mxu0 %v8395_v39 }
 0x287   :  { %7642 = vmatpush3.bf16.msra.mxu1 %v3548_v42  ;;  %v8262_v42 = vld [vmem:[%s10395_s3 + $0x71c] sm:$0xff]  }
 0x288   :  { %7665 = vmatprep.subr.bf16.mxu1 %v8395_v39 }
 0x289   :  { %7624 = vmatpush3.bf16.msra.mxu0 %v3446_v44  ;;  %v3909_v44 = vrot.slane %v9860_v52, 1 }
 0x28a   :  { %7644 = vmatmul.mubr.msk.bf16.vlgmr.msra.gmra.mrb[84].mxu1 %vm623_vm2, %v3504_v46  ;;  %7647 = vmatprep.subr.bf16.mxu0 %v8395_v39  ;;  %v8264_v46 = vld [vmem:[%s10395_s3 + $0x724] sm:$0xff]  }
 0x28b   :  { %7666 = vmatpush3.bf16.msra.mxu1 %v8234_v45  ;;  %7679 = vmatprep.mubr.msk.bf16.mxu1 %vm8396_vm1, %v8395_v39  ;;  %v8263_v45 = vld [vmem:[%s10395_s3 + $0x6e8] sm:$0xff]  }
 0x28c   :  { %7626 = vmatmul.mubr.msk.bf16.vlgmr.msra.gmra.mrb[84].mxu0 %vm623_vm2, %v9725_v41  ;;  %7667 = vmatprep.subr.bf16.mxu1 %v8395_v39  ;;  %v3851_v41 = vsel %vm627_vm0, %v8261_v3, 0 }
 0x28d   :  { %7648 = vmatpush3.bf16.msra.mxu0 %v8235_v47  ;;  %7661 = vmatprep.mubr.msk.bf16.mxu0 %vm8396_vm1, %v8395_v39  ;;  %v8265_v47 = vld [vmem:[%s10395_s3 + $0x6f0] sm:$0xff]  }
 0x28e   :  { %7649 = vmatprep.subr.bf16.mxu0 %v8395_v39 }
 0x28f   :  { %7668 = vmatpush3.bf16.msra.mxu1 %v8236_v48  ;;  %v8266_v48 = vld [vmem:[%s10395_s3 + $0x72c] sm:$0xff]  }
 0x290   :  { %7669 = vmatprep.subr.bf16.mxu1 %v8395_v39 }
 0x291   :  { %7650 = vmatpush3.bf16.msra.mxu0 %v8237_v50  ;;  %v8267_v50 = vld [vmem:[%s10395_s3 + $0x6f8] sm:$0xff]  }
 0x292   :  { %7651 = vmatprep.subr.bf16.mxu0 %v8395_v39 }
 0x293   :  { %7670 = vmatpush3.bf16.msra.mxu1 %v8238_v51  ;;  %v8268_v51 = vld [vmem:[%s10395_s3 + $0x734] sm:$0xff]  }
 0x294   :  { %7671 = vmatprep.subr.bf16.mxu1 %v8395_v39 }
 0x295   :  { %7652 = vmatpush3.bf16.msra.mxu0 %v8239_v53  ;;  %v8269_v53 = vld [vmem:[%s10395_s3 + $0x700] sm:$0xff]  }
 0x296   :  { %7653 = vmatprep.subr.bf16.mxu0 %v8395_v39 }
 0x297   :  { %7672 = vmatpush3.bf16.msra.mxu1 %v8240_v43  ;;  %v8270_v43 = vld [vmem:[%s10395_s3 + $0x73c] sm:$0xff]  }
 0x298   :  { %7673 = vmatprep.subr.bf16.mxu1 %v8395_v39 }
 0x299   :  { %v2166_v56 = vpop.f32.mrb[56].mxu1  ;;  %7654 = vmatpush3.bf16.msra.mxu0 %v8241_v55 }
 0x29a   :  { %v7393_v57 = vpop.f32.mrb[57].mxu1  ;;  %7655 = vmatprep.subr.bf16.mxu0 %v8395_v39 }
 0x29b   :  { %v2065_v58 = vpop.f32.mrb[56].mxu0  ;;  %v2169_v59 = vpop.f32.mrb[58].mxu1  ;;  %7674 = vmatpush3.bf16.msra.mxu1 %v8242_v4  ;;  %v8271_v4 = vld [vmem:[%s10395_s3 + $0x708] sm:$0xff]  }
 0x29c   :  { %v2071_v61 = vadd.f32 %v2065_v58, %v1970_v49  ;;  %v7375_v62 = vpop.f32.mrb[57].mxu0  ;;  %v7394_v63 = vpop.f32.mrb[59].mxu1  ;;  %7675 = vmatprep.subr.bf16.mxu1 %v8395_v39  ;;  %v3953_v49 = vsel %vm627_vm0, %v8260_v36, 0  ;;  %v8272_v58 = vld [vmem:[%s10395_s3 + $0x744] sm:$0xff]   ;;  %v8287_v36 = vld [vmem:[%s10395_s3 + $0x778] sm:$0xff]  }
 0x29d   :  { %v2068_v1 = vpop.f32.mrb[58].mxu0  ;;  %7656 = vmatpush3.bf16.msra.mxu0 %v8243_v25  ;;  %v8274_v62 = vld [vmem:[%s10395_s3 + $0x74c] ss:$0 sps:$4 sm:$0x33]  }
 0x29e   :  { %v7376_v5 = vpop.f32.mrb[59].mxu0  ;;  %7657 = vmatprep.subr.bf16.mxu0 %v8395_v39  ;;  %v2172_v6 = vadd.f32 %v2166_v56, %v2071_v61  ;;  %v4155_v40 = vsel %vm627_vm0, %v8274_v62, 0 }
 0x29f   :  { %7676 = vmatpush3.bf16.msra.mxu1 %v8244_v60 }
 0x2a0   :  { %7677 = vmatprep.subr.bf16.mxu1 %v8395_v39 }
 0x2a1   :  { %7658 = vmatpush3.bf16.msra.mxu0 %v8245_v2  ;;  %v8275_v2 = vld [vmem:[%s10395_s3 + $0x718] ss:$0 sps:$4 sm:$0x33]  }
 0x2a2   :  { %7659 = vmatprep.subr.bf16.mxu0 %v8395_v39 }
 0x2a3   :  { %7678 = vmatpush3.bf16.msra.mxu1 %v3750_v7  ;;  %v8276_v7 = vld [vmem:[%s10395_s3 + $0x784] sm:$0xff]  }
 0x2a4   :  { %7701 = vmatprep.subr.bf16.mxu1 %v8395_v39 }
 0x2a5   :  { %7660 = vmatpush3.bf16.msra.mxu0 %v3649_v9  ;;  %v4111_v9 = vrot.slane %v9860_v52, 3 }
 0x2a6   :  { %7680 = vmatmul.mubr.msk.bf16.vlgmr.msra.gmra.mrb[88].mxu1 %vm623_vm2, %v3706_v11  ;;  %7683 = vmatprep.subr.bf16.mxu0 %v8395_v39  ;;  %v4010_v11 = vrot.slane %v9860_v52, 2 }
 0x2a7   :  { %7702 = vmatpush3.bf16.msra.mxu1 %v8248_v10  ;;  %7715 = vmatprep.mubr.msk.bf16.mxu1 %vm8396_vm1, %v8395_v39  ;;  %v8277_v10 = vld [vmem:[%s10395_s3 + $0x750] sm:$0xff]  }
 0x2a8   :  { %7662 = vmatmul.mubr.msk.bf16.vlgmr.msra.gmra.mrb[88].mxu0 %vm623_vm2, %v3605_v13  ;;  %7703 = vmatprep.subr.bf16.mxu1 %v8395_v39  ;;  %v8279_v13 = vld [vmem:[%s10395_s3 + $0x758] sm:$0xff]  }
 0x2a9   :  { %7684 = vmatpush3.bf16.msra.mxu0 %v8249_v12  ;;  %7697 = vmatprep.mubr.msk.bf16.mxu0 %vm8396_vm1, %v8395_v39  ;;  %v8278_v12 = vld [vmem:[%s10395_s3 + $0x78c] sm:$0xff]  }
 0x2aa   :  { %7685 = vmatprep.subr.bf16.mxu0 %v8395_v39 }
 0x2ab   :  { %7704 = vmatpush3.bf16.msra.mxu1 %v8250_v14  ;;  %v8280_v14 = vld [vmem:[%s10395_s3 + $0x794] sm:$0xff]  }
 0x2ac   :  { %7705 = vmatprep.subr.bf16.mxu1 %v8395_v39 }
 0x2ad   :  { %7686 = vmatpush3.bf16.msra.mxu0 %v8251_v15  ;;  %v8281_v15 = vld [vmem:[%s10395_s3 + $0x760] sm:$0xff]  }
 0x2ae   :  { %7687 = vmatprep.subr.bf16.mxu0 %v8395_v39 }
 0x2af   :  { %7706 = vmatpush3.bf16.msra.mxu1 %v8252_v16  ;;  %v8282_v16 = vld [vmem:[%s10395_s3 + $0x79c] sm:$0xff]  }
 0x2b0   :  { %7707 = vmatprep.subr.bf16.mxu1 %v8395_v39 }
 0x2b1   :  { %7688 = vmatpush3.bf16.msra.mxu0 %v8253_v17  ;;  %v8283_v17 = vld [vmem:[%s10395_s3 + $0x768] sm:$0xff]  }
 0x2b2   :  { %7689 = vmatprep.subr.bf16.mxu0 %v8395_v39 }
 0x2b3   :  { %7708 = vmatpush3.bf16.msra.mxu1 %v8254_v18  ;;  %v8284_v18 = vld [vmem:[%s10395_s3 + $0x7a4] sm:$0xff]  }
 0x2b4   :  { %7709 = vmatprep.subr.bf16.mxu1 %v8395_v39 }
 0x2b5   :  { %v2369_v19 = vpop.f32.mrb[60].mxu1  ;;  %7690 = vmatpush3.bf16.msra.mxu0 %v8255_v20 }
 0x2b6   :  { %v7429_v24 = vpop.f32.mrb[61].mxu1  ;;  %7691 = vmatprep.subr.bf16.mxu0 %v8395_v39 }
 0x2b7   :  { %v2267_v26 = vpop.f32.mrb[60].mxu0  ;;  %v2372_v28 = vpop.f32.mrb[62].mxu1  ;;  %7710 = vmatpush3.bf16.msra.mxu1 %v8256_v21  ;;  %v8285_v21 = vld [vmem:[%s10395_s3 + $0x770] sm:$0xff]  }
 0x2b8   :  { %v2273_v33 = vadd.f32 %v2267_v26, %v2172_v6  ;;  %v7411_v34 = vpop.f32.mrb[61].mxu0  ;;  %v7430_v35 = vpop.f32.mrb[63].mxu1  ;;  %7711 = vmatprep.subr.bf16.mxu1 %v8395_v39  ;;  %v4054_v6 = vsel %vm627_vm0, %v8275_v2, 0  ;;  %v8286_v26 = vld [vmem:[%s10395_s3 + $0x7ac] sm:$0xff]   ;;  %v550_v28 = vmax.f32 %v8946_v8, 0.0 }
 0x2b9   :  { %v2270_v37 = vpop.f32.mrb[62].mxu0  ;;  %7692 = vmatpush3.bf16.msra.mxu0 %v8257_v23  ;;  %v8288_v34 = vld [vmem:[%s10395_s3 + $0x7b4] ss:$0 sps:$4 sm:$0x33]  }
 0x2ba   :  { %v7412_v22 = vpop.f32.mrb[63].mxu0  ;;  %7693 = vmatprep.subr.bf16.mxu0 %v8395_v39  ;;  %v2375_v27 = vadd.f32 %v2369_v19, %v2273_v33  ;;  %v8289_v8 = vld [vmem:[%s10395_s3 + $0x780] ss:$0 sps:$4 sm:$0x33]   ;;  %v4358_v3 = vsel %vm627_vm0, %v8288_v34, 0 }
 0x2bb   :  { %7712 = vmatpush3.bf16.msra.mxu1 %v8258_v30  ;;  %v9995_v22 = vpack.c.bf16 %v550_v28, %v550_v28 }
 0x2bc   :  { %7713 = vmatprep.subr.bf16.mxu1 %v8395_v39 }
 0x2bd   :  { %7694 = vmatpush3.bf16.msra.mxu0 %v8259_v38 }
 0x2be   :  { %7695 = vmatprep.subr.bf16.mxu0 %v8395_v39 }
 0x2bf   :  { %7714 = vmatpush3.bf16.msra.mxu1 %v3953_v49  ;;  %v4314_v49 = vrot.slane %v9995_v22, 1 }
 0x2c0   :  { %7737 = vmatprep.subr.bf16.mxu1 %v8395_v39 }
 0x2c1   :  { %7696 = vmatpush3.bf16.msra.mxu0 %v3851_v41  ;;  %v8291_v41 = vld [vmem:[%s10395_s3 + $0x7b8] sm:$0xff]  }
 0x2c2   :  { %7716 = vmatmul.mubr.msk.bf16.vlgmr.msra.gmra.mrb[92].mxu1 %vm623_vm2, %v3909_v44  ;;  %7719 = vmatprep.subr.bf16.mxu0 %v8395_v39  ;;  %v8293_v44 = vld [vmem:[%s10395_s3 + $0x7c0] sm:$0xff]  }
 0x2c3   :  { %7738 = vmatpush3.bf16.msra.mxu1 %v8262_v42  ;;  %7751 = vmatprep.mubr.msk.bf16.mxu1 %vm8396_vm1, %v8395_v39  ;;  %v8292_v42 = vld [vmem:[%s10395_s3 + $0x7f4] sm:$0xff]  }
 0x2c4   :  { %7698 = vmatmul.mubr.msk.bf16.vlgmr.msra.gmra.mrb[92].mxu0 %vm623_vm2, %v9860_v52  ;;  %7739 = vmatprep.subr.bf16.mxu1 %v8395_v39  ;;  %v8290_v52 = vld [vmem:[%s10395_s3 + $0x7ec] sm:$0xff]  }
 0x2c5   :  { %7720 = vmatpush3.bf16.msra.mxu0 %v8263_v45  ;;  %7733 = vmatprep.mubr.msk.bf16.mxu0 %vm8396_vm1, %v8395_v39  ;;  %v8294_v45 = vld [vmem:[%s10395_s3 + $0x7fc] sm:$0xff]  }
 0x2c6   :  { %7721 = vmatprep.subr.bf16.mxu0 %v8395_v39 }
 0x2c7   :  { %7740 = vmatpush3.bf16.msra.mxu1 %v8264_v46  ;;  %v8295_v46 = vld [vmem:[%s10395_s3 + $0x7c8] sm:$0xff]  }
 0x2c8   :  { %7741 = vmatprep.subr.bf16.mxu1 %v8395_v39 }
 0x2c9   :  { %7722 = vmatpush3.bf16.msra.mxu0 %v8265_v47  ;;  %v8296_v47 = vld [vmem:[%s10395_s3 + $0x804] sm:$0xff]  }
 0x2ca   :  { %7723 = vmatprep.subr.bf16.mxu0 %v8395_v39 }
 0x2cb   :  { %7742 = vmatpush3.bf16.msra.mxu1 %v8266_v48  ;;  %v8297_v48 = vld [vmem:[%s10395_s3 + $0x7d0] sm:$0xff]  }
 0x2cc   :  { %7743 = vmatprep.subr.bf16.mxu1 %v8395_v39 }
 0x2cd   :  { %7724 = vmatpush3.bf16.msra.mxu0 %v8267_v50  ;;  %v8298_v50 = vld [vmem:[%s10395_s3 + $0x80c] sm:$0xff]  }
 0x2ce   :  { %7725 = vmatprep.subr.bf16.mxu0 %v8395_v39 }
 0x2cf   :  { %7744 = vmatpush3.bf16.msra.mxu1 %v8268_v51 }
 0x2d0   :  { %7745 = vmatprep.subr.bf16.mxu1 %v8395_v39 }
 0x2d1   :  { %v2571_v55 = vpop.f32.mrb[64].mxu1  ;;  %7726 = vmatpush3.bf16.msra.mxu0 %v8269_v53  ;;  %v8299_v53 = vld [vmem:[%s10395_s3 + $0x7d8] sm:$0xff]  }
 0x2d2   :  { %v7465_v56 = vpop.f32.mrb[65].mxu1  ;;  %7727 = vmatprep.subr.bf16.mxu0 %v8395_v39 }
 0x2d3   :  { %v2470_v25 = vpop.f32.mrb[64].mxu0  ;;  %v2574_v57 = vpop.f32.mrb[66].mxu1  ;;  %7746 = vmatpush3.bf16.msra.mxu1 %v8270_v43  ;;  %v8300_v56 = vld [vmem:[%s10395_s3 + $0x814] sm:$0xff]  }
 0x2d4   :  { %v2476_v59 = vadd.f32 %v2470_v25, %v2375_v27  ;;  %v7447_v60 = vpop.f32.mrb[65].mxu0  ;;  %v7466_v61 = vpop.f32.mrb[67].mxu1  ;;  %7747 = vmatprep.subr.bf16.mxu1 %v8395_v39  ;;  %v4256_v27 = vsel %vm627_vm0, %v8289_v8, 0 }
 0x2d5   :  { %v2473_v63 = vpop.f32.mrb[66].mxu0  ;;  %7728 = vmatpush3.bf16.msra.mxu0 %v8271_v4  ;;  %v8301_v61 = vld [vmem:[%s10395_s3 + $0x7e0] sm:$0xff]  }
 0x2d6   :  { %v7448_v1 = vpop.f32.mrb[67].mxu0  ;;  %7729 = vmatprep.subr.bf16.mxu0 %v8395_v39  ;;  %v2577_v5 = vadd.f32 %v2571_v55, %v2476_v59  ;;  %v8302_v59 = vld [vmem:[%s10395_s3 + $0x81c] ss:$0 sps:$4 sm:$0x33]  }
 0x2d7   :  { %7748 = vmatpush3.bf16.msra.mxu1 %v8272_v58  ;;  %v8303_v63 = vld [vmem:[%s10395_s3 + $0x7e8] ss:$0 sps:$4 sm:$0x33]   ;;  %v4560_v1 = vsel %vm627_vm0, %v8302_v59, 0 }
 0x2d8   :  { %7749 = vmatprep.subr.bf16.mxu1 %v8395_v39  ;;  %v4459_v2 = vsel %vm627_vm0, %v8303_v63, 0  ;;  %v8331_v59 = vld [vmem:[%s10395_s3 + $0x8b8] ss:$0 sps:$4 sm:$0x33]   ;;  %v8332_v63 = vld [vmem:[%s10395_s3 + $0x924] sm:$0xff]  }
 0x2d9   :  { %7730 = vmatpush3.bf16.msra.mxu0 %v8273_v0 }
 0x2da   :  { %7731 = vmatprep.subr.bf16.mxu0 %v8395_v39 }
 0x2db   :  { %7750 = vmatpush3.bf16.msra.mxu1 %v4155_v40  ;;  %v4516_v40 = vrot.slane %v9995_v22, 3 }
 0x2dc   :  { %7773 = vmatprep.subr.bf16.mxu1 %v8395_v39 }
 0x2dd   :  { %7732 = vmatpush3.bf16.msra.mxu0 %v4054_v6  ;;  %v8305_v6 = vld [vmem:[%s10395_s3 + $0x820] sm:$0xff]  }
 0x2de   :  { %7752 = vmatmul.mubr.msk.bf16.vlgmr.msra.gmra.mrb[96].mxu1 %vm623_vm2, %v4111_v9  ;;  %7755 = vmatprep.subr.bf16.mxu0 %v8395_v39  ;;  %v8306_v9 = vld [vmem:[%s10395_s3 + $0x85c] sm:$0xff]  }
 0x2df   :  { %7774 = vmatpush3.bf16.msra.mxu1 %v8276_v7  ;;  %7787 = vmatprep.mubr.msk.bf16.mxu1 %vm8396_vm1, %v8395_v39  ;;  %v4415_v7 = vrot.slane %v9995_v22, 2 }
 0x2e0   :  { %7734 = vmatmul.mubr.msk.bf16.vlgmr.msra.gmra.mrb[96].mxu0 %vm623_vm2, %v4010_v11  ;;  %7775 = vmatprep.subr.bf16.mxu1 %v8395_v39  ;;  %v8308_v11 = vld [vmem:[%s10395_s3 + $0x864] sm:$0xff]  }
 0x2e1   :  { %7756 = vmatpush3.bf16.msra.mxu0 %v8277_v10  ;;  %7769 = vmatprep.mubr.msk.bf16.mxu0 %vm8396_vm1, %v8395_v39  ;;  %v8307_v10 = vld [vmem:[%s10395_s3 + $0x828] sm:$0xff]  }
 0x2e2   :  { %7757 = vmatprep.subr.bf16.mxu0 %v8395_v39 }
 0x2e3   :  { %7776 = vmatpush3.bf16.msra.mxu1 %v8278_v12  ;;  %v8309_v12 = vld [vmem:[%s10395_s3 + $0x830] sm:$0xff]  }
 0x2e4   :  { %7777 = vmatprep.subr.bf16.mxu1 %v8395_v39 }
 0x2e5   :  { %7758 = vmatpush3.bf16.msra.mxu0 %v8279_v13  ;;  %v8310_v13 = vld [vmem:[%s10395_s3 + $0x86c] sm:$0xff]  }
 0x2e6   :  { %7759 = vmatprep.subr.bf16.mxu0 %v8395_v39 }
 0x2e7   :  { %7778 = vmatpush3.bf16.msra.mxu1 %v8280_v14  ;;  %v8311_v14 = vld [vmem:[%s10395_s3 + $0x838] sm:$0xff]  }
 0x2e8   :  { %7779 = vmatprep.subr.bf16.mxu1 %v8395_v39 }
 0x2e9   :  { %7760 = vmatpush3.bf16.msra.mxu0 %v8281_v15  ;;  %v8312_v15 = vld [vmem:[%s10395_s3 + $0x874] sm:$0xff]  }
 0x2ea   :  { %7761 = vmatprep.subr.bf16.mxu0 %v8395_v39 }
 0x2eb   :  { %7780 = vmatpush3.bf16.msra.mxu1 %v8282_v16 }
 0x2ec   :  { %7781 = vmatprep.subr.bf16.mxu1 %v8395_v39 }
 0x2ed   :  { %v2774_v20 = vpop.f32.mrb[68].mxu1  ;;  %7762 = vmatpush3.bf16.msra.mxu0 %v8283_v17  ;;  %v8313_v17 = vld [vmem:[%s10395_s3 + $0x840] sm:$0xff]  }
 0x2ee   :  { %v7501_v19 = vpop.f32.mrb[69].mxu1  ;;  %7763 = vmatprep.subr.bf16.mxu0 %v8395_v39 }
 0x2ef   :  { %v2672_v23 = vpop.f32.mrb[68].mxu0  ;;  %v2777_v24 = vpop.f32.mrb[70].mxu1  ;;  %7782 = vmatpush3.bf16.msra.mxu1 %v8284_v18  ;;  %v8314_v19 = vld [vmem:[%s10395_s3 + $0x87c] sm:$0xff]  }
 0x2f0   :  { %v2678_v30 = vadd.f32 %v2672_v23, %v2577_v5  ;;  %v7483_v31 = vpop.f32.mrb[69].mxu0  ;;  %v7502_v33 = vpop.f32.mrb[71].mxu1  ;;  %7783 = vmatprep.subr.bf16.mxu1 %v8395_v39  ;;  %v8304_v5 = vld [vmem:[%s10395_s3 + $0x854] sm:$0xff]   ;;  %v551_v23 = vmax.f32 %v8965_v29, 0.0 }
 0x2f1   :  { %v2675_v35 = vpop.f32.mrb[70].mxu0  ;;  %7764 = vmatpush3.bf16.msra.mxu0 %v8285_v21  ;;  %v8315_v33 = vld [vmem:[%s10395_s3 + $0x848] sm:$0xff]   ;;  %v8317_v29 = vld [vmem:[%s10395_s3 + $0x850] ss:$0 sps:$4 sm:$0x33]  }
 0x2f2   :  { %v7484_v37 = vpop.f32.mrb[71].mxu0  ;;  %7765 = vmatprep.subr.bf16.mxu0 %v8395_v39  ;;  %v2780_v38 = vadd.f32 %v2774_v20, %v2678_v30  ;;  %v8316_v30 = vld [vmem:[%s10395_s3 + $0x884] ss:$0 sps:$4 sm:$0x33]   ;;  %v4661_v8 = vsel %vm627_vm0, %v8317_v29, 0  ;;  %v8346_v29 = vld [vmem:[%s10395_s3 + $0x98c] sm:$0xff]  }
 0x2f3   :  { %7784 = vmatpush3.bf16.msra.mxu1 %v8286_v26  ;;  %v4763_v37 = vsel %vm627_vm0, %v8316_v30, 0 }
 0x2f4   :  { %7785 = vmatprep.subr.bf16.mxu1 %v8395_v39 }
 0x2f5   :  { %7766 = vmatpush3.bf16.msra.mxu0 %v8287_v36  ;;  %v10130_v36 = vpack.c.bf16 %v551_v23, %v551_v23  ;;  %v8344_v23 = vld [vmem:[%s10395_s3 + $0x954] ss:$0 sps:$4 sm:$0x33]  }
 0x2f6   :  { %7767 = vmatprep.subr.bf16.mxu0 %v8395_v39 }
 0x2f7   :  { %7786 = vmatpush3.bf16.msra.mxu1 %v4358_v3  ;;  %v8319_v3 = vld [vmem:[%s10395_s3 + $0x888] sm:$0xff]  }
 0x2f8   :  { %7809 = vmatprep.subr.bf16.mxu1 %v8395_v39 }
 0x2f9   :  { %7768 = vmatpush3.bf16.msra.mxu0 %v4256_v27  ;;  %v8320_v27 = vld [vmem:[%s10395_s3 + $0x8c4] sm:$0xff]  }
 0x2fa   :  { %7788 = vmatmul.mubr.msk.bf16.vlgmr.msra.gmra.mrb[100].mxu1 %vm623_vm2, %v4314_v49  ;;  %7791 = vmatprep.subr.bf16.mxu0 %v8395_v39  ;;  %v8322_v49 = vld [vmem:[%s10395_s3 + $0x8cc] sm:$0xff]  }
 0x2fb   :  { %7810 = vmatpush3.bf16.msra.mxu1 %v8290_v52  ;;  %7823 = vmatprep.mubr.msk.bf16.mxu1 %vm8396_vm1, %v8395_v39  ;;  %v8321_v52 = vld [vmem:[%s10395_s3 + $0x890] sm:$0xff]  }
 0x2fc   :  { %7770 = vmatmul.mubr.msk.bf16.vlgmr.msra.gmra.mrb[100].mxu0 %vm623_vm2, %v9995_v22  ;;  %7811 = vmatprep.subr.bf16.mxu1 %v8395_v39  ;;  %v4719_v22 = vrot.slane %v10130_v36, 1 }
 0x2fd   :  { %7792 = vmatpush3.bf16.msra.mxu0 %v8291_v41  ;;  %7805 = vmatprep.mubr.msk.bf16.mxu0 %vm8396_vm1, %v8395_v39  ;;  %v8323_v41 = vld [vmem:[%s10395_s3 + $0x898] sm:$0xff]  }
 0x2fe   :  { %7793 = vmatprep.subr.bf16.mxu0 %v8395_v39 }
 0x2ff   :  { %7812 = vmatpush3.bf16.msra.mxu1 %v8292_v42  ;;  %v8324_v42 = vld [vmem:[%s10395_s3 + $0x8d4] sm:$0xff]  }
 0x300   :  { %7813 = vmatprep.subr.bf16.mxu1 %v8395_v39 }
 0x301   :  { %7794 = vmatpush3.bf16.msra.mxu0 %v8293_v44  ;;  %v8325_v44 = vld [vmem:[%s10395_s3 + $0x8a0] sm:$0xff]  }
 0x302   :  { %7795 = vmatprep.subr.bf16.mxu0 %v8395_v39 }
 0x303   :  { %7814 = vmatpush3.bf16.msra.mxu1 %v8294_v45  ;;  %v8326_v45 = vld [vmem:[%s10395_s3 + $0x8dc] sm:$0xff]  }
 0x304   :  { %7815 = vmatprep.subr.bf16.mxu1 %v8395_v39 }
 0x305   :  { %7796 = vmatpush3.bf16.msra.mxu0 %v8295_v46 }
 0x306   :  { %7797 = vmatprep.subr.bf16.mxu0 %v8395_v39 }
 0x307   :  { %7816 = vmatpush3.bf16.msra.mxu1 %v8296_v47  ;;  %v8327_v47 = vld [vmem:[%s10395_s3 + $0x8a8] sm:$0xff]  }
 0x308   :  { %7817 = vmatprep.subr.bf16.mxu1 %v8395_v39 }
 0x309   :  { %v2976_v51 = vpop.f32.mrb[72].mxu1  ;;  %7798 = vmatpush3.bf16.msra.mxu0 %v8297_v48 }
 0x30a   :  { %v7537_v43 = vpop.f32.mrb[73].mxu1  ;;  %7799 = vmatprep.subr.bf16.mxu0 %v8395_v39 }
 0x30b   :  { %v2875_v55 = vpop.f32.mrb[72].mxu0  ;;  %v2979_v4 = vpop.f32.mrb[74].mxu1  ;;  %7818 = vmatpush3.bf16.msra.mxu1 %v8298_v50 }
 0x30c   :  { %v2881_v25 = vadd.f32 %v2875_v55, %v2780_v38  ;;  %v7519_v57 = vpop.f32.mrb[73].mxu0  ;;  %v7538_v58 = vpop.f32.mrb[75].mxu1  ;;  %7819 = vmatprep.subr.bf16.mxu1 %v8395_v39  ;;  %v8318_v38 = vld [vmem:[%s10395_s3 + $0x8bc] sm:$0xff]  }
 0x30d   :  { %v2878_v60 = vpop.f32.mrb[74].mxu0  ;;  %7800 = vmatpush3.bf16.msra.mxu0 %v8299_v53  ;;  %v8328_v53 = vld [vmem:[%s10395_s3 + $0x8e4] sm:$0xff]   ;;  %v8329_v57 = vld [vmem:[%s10395_s3 + $0x8b0] sm:$0xff]  }
 0x30e   :  { %v7520_v62 = vpop.f32.mrb[75].mxu0  ;;  %7801 = vmatprep.subr.bf16.mxu0 %v8395_v39  ;;  %v2982_v0 = vadd.f32 %v2976_v51, %v2881_v25 }
 0x30f   :  { %7820 = vmatpush3.bf16.msra.mxu1 %v8300_v56  ;;  %v8330_v56 = vld [vmem:[%s10395_s3 + $0x8ec] ss:$0 sps:$4 sm:$0x33]   ;;  %v4864_v62 = vsel %vm627_vm0, %v8331_v59, 0  ;;  %v8360_v59 = vld [vmem:[%s10395_s3 + $0x9c0] sm:$0xff]  }
 0x310   :  { %7821 = vmatprep.subr.bf16.mxu1 %v8395_v39 }
 0x311   :  { %7802 = vmatpush3.bf16.msra.mxu0 %v8301_v61  ;;  %v4965_v61 = vsel %vm627_vm0, %v8330_v56, 0 }
 0x312   :  { %7803 = vmatprep.subr.bf16.mxu0 %v8395_v39 }
 0x313   :  { %7822 = vmatpush3.bf16.msra.mxu1 %v4560_v1  ;;  %v8333_v1 = vld [vmem:[%s10395_s3 + $0x8f0] sm:$0xff]  }
 0x314   :  { %7845 = vmatprep.subr.bf16.mxu1 %v8395_v39 }
 0x315   :  { %7804 = vmatpush3.bf16.msra.mxu0 %v4459_v2  ;;  %v4820_v2 = vrot.slane %v10130_v36, 2 }
 0x316   :  { %7824 = vmatmul.mubr.msk.bf16.vlgmr.msra.gmra.mrb[104].mxu1 %vm623_vm2, %v4516_v40  ;;  %7827 = vmatprep.subr.bf16.mxu0 %v8395_v39  ;;  %v8335_v40 = vld [vmem:[%s10395_s3 + $0x8f8] sm:$0xff]  }
 0x317   :  { %7846 = vmatpush3.bf16.msra.mxu1 %v8304_v5  ;;  %7859 = vmatprep.mubr.msk.bf16.mxu1 %vm8396_vm1, %v8395_v39  ;;  %v8334_v5 = vld [vmem:[%s10395_s3 + $0x92c] sm:$0xff]  }
 0x318   :  { %7806 = vmatmul.mubr.msk.bf16.vlgmr.msra.gmra.mrb[104].mxu0 %vm623_vm2, %v4415_v7  ;;  %7847 = vmatprep.subr.bf16.mxu1 %v8395_v39  ;;  %v8337_v7 = vld [vmem:[%s10395_s3 + $0x900] sm:$0xff]  }
 0x319   :  { %7828 = vmatpush3.bf16.msra.mxu0 %v8305_v6  ;;  %7841 = vmatprep.mubr.msk.bf16.mxu0 %vm8396_vm1, %v8395_v39  ;;  %v8336_v6 = vld [vmem:[%s10395_s3 + $0x934] sm:$0xff]  }
 0x31a   :  { %7829 = vmatprep.subr.bf16.mxu0 %v8395_v39 }
 0x31b   :  { %7848 = vmatpush3.bf16.msra.mxu1 %v8306_v9  ;;  %v8338_v9 = vld [vmem:[%s10395_s3 + $0x93c] sm:$0xff]  }
 0x31c   :  { %7849 = vmatprep.subr.bf16.mxu1 %v8395_v39 }
 0x31d   :  { %7830 = vmatpush3.bf16.msra.mxu0 %v8307_v10  ;;  %v8339_v10 = vld [vmem:[%s10395_s3 + $0x908] sm:$0xff]  }
 0x31e   :  { %7831 = vmatprep.subr.bf16.mxu0 %v8395_v39 }
 0x31f   :  { %7850 = vmatpush3.bf16.msra.mxu1 %v8308_v11  ;;  %v8340_v11 = vld [vmem:[%s10395_s3 + $0x944] sm:$0xff]  }
 0x320   :  { %7851 = vmatprep.subr.bf16.mxu1 %v8395_v39 }
 0x321   :  { %7832 = vmatpush3.bf16.msra.mxu0 %v8309_v12 }
 0x322   :  { %7833 = vmatprep.subr.bf16.mxu0 %v8395_v39 }
 0x323   :  { %7852 = vmatpush3.bf16.msra.mxu1 %v8310_v13  ;;  %v8341_v13 = vld [vmem:[%s10395_s3 + $0x910] sm:$0xff]  }
 0x324   :  { %7853 = vmatprep.subr.bf16.mxu1 %v8395_v39 }
 0x325   :  { %v3179_v16 = vpop.f32.mrb[76].mxu1  ;;  %7834 = vmatpush3.bf16.msra.mxu0 %v8311_v14 }
 0x326   :  { %v7573_v18 = vpop.f32.mrb[77].mxu1  ;;  %7835 = vmatprep.subr.bf16.mxu0 %v8395_v39 }
 0x327   :  { %v3077_v20 = vpop.f32.mrb[76].mxu0  ;;  %v3182_v21 = vpop.f32.mrb[78].mxu1  ;;  %7854 = vmatpush3.bf16.msra.mxu1 %v8312_v15  ;;  %v552_v18 = vmax.f32 %v8974_v32, 0.0  ;;  %v8345_v32 = vld [vmem:[%s10395_s3 + $0x920] ss:$0 sps:$4 sm:$0x33]  }
 0x328   :  { %v3083_v24 = vadd.f32 %v3077_v20, %v2982_v0  ;;  %v7555_v26 = vpop.f32.mrb[77].mxu0  ;;  %v7574_v28 = vpop.f32.mrb[79].mxu1  ;;  %7855 = vmatprep.subr.bf16.mxu1 %v8395_v39  ;;  %v4921_v0 = vrot.slane %v10130_v36, 3 }
 0x329   :  { %v3080_v31 = vpop.f32.mrb[78].mxu0  ;;  %7836 = vmatpush3.bf16.msra.mxu0 %v8313_v17  ;;  %v8342_v17 = vld [vmem:[%s10395_s3 + $0x94c] sm:$0xff]   ;;  %v8343_v26 = vld [vmem:[%s10395_s3 + $0x918] sm:$0xff]  }
 0x32a   :  { %v7556_v34 = vpop.f32.mrb[79].mxu0  ;;  %7837 = vmatprep.subr.bf16.mxu0 %v8395_v39  ;;  %v3185_v35 = vadd.f32 %v3179_v16, %v3083_v24  ;;  %v10265_v31 = vpack.c.bf16 %v552_v18, %v552_v18 }
 0x32b   :  { %7856 = vmatpush3.bf16.msra.mxu1 %v8314_v19  ;;  %v5066_v34 = vsel %vm627_vm0, %v8345_v32, 0 }
 0x32c   :  { %7857 = vmatprep.subr.bf16.mxu1 %v8395_v39 }
 0x32d   :  { %7838 = vmatpush3.bf16.msra.mxu0 %v8315_v33  ;;  %v5168_v33 = vsel %vm627_vm0, %v8344_v23, 0 }
 0x32e   :  { %7839 = vmatprep.subr.bf16.mxu0 %v8395_v39 }
 0x32f   :  { %7858 = vmatpush3.bf16.msra.mxu1 %v4763_v37  ;;  %v8348_v37 = vld [vmem:[%s10395_s3 + $0x994] sm:$0xff]  }
 0x330   :  { %7881 = vmatprep.subr.bf16.mxu1 %v8395_v39 }
 0x331   :  { %7840 = vmatpush3.bf16.msra.mxu0 %v4661_v8  ;;  %v8349_v8 = vld [vmem:[%s10395_s3 + $0x960] sm:$0xff]  }
 0x332   :  { %7860 = vmatmul.mubr.msk.bf16.vlgmr.msra.gmra.mrb[108].mxu1 %vm623_vm2, %v4719_v22  ;;  %7863 = vmatprep.subr.bf16.mxu0 %v8395_v39  ;;  %v8351_v22 = vld [vmem:[%s10395_s3 + $0x968] sm:$0xff]  }
 0x333   :  { %7882 = vmatpush3.bf16.msra.mxu1 %v8318_v38  ;;  %7895 = vmatprep.mubr.msk.bf16.mxu1 %vm8396_vm1, %v8395_v39  ;;  %v8350_v38 = vld [vmem:[%s10395_s3 + $0x99c] sm:$0xff]  }
 0x334   :  { %7842 = vmatmul.mubr.msk.bf16.vlgmr.msra.gmra.mrb[108].mxu0 %vm623_vm2, %v10130_v36  ;;  %7883 = vmatprep.subr.bf16.mxu1 %v8395_v39  ;;  %v8347_v36 = vld [vmem:[%s10395_s3 + $0x958] sm:$0xff]  }
 0x335   :  { %7864 = vmatpush3.bf16.msra.mxu0 %v8319_v3  ;;  %7877 = vmatprep.mubr.msk.bf16.mxu0 %vm8396_vm1, %v8395_v39  ;;  %v8352_v3 = vld [vmem:[%s10395_s3 + $0x9a4] sm:$0xff]  }
 0x336   :  { %7865 = vmatprep.subr.bf16.mxu0 %v8395_v39 }
 0x337   :  { %7884 = vmatpush3.bf16.msra.mxu1 %v8320_v27  ;;  %v8353_v27 = vld [vmem:[%s10395_s3 + $0x970] sm:$0xff]  }
 0x338   :  { %7885 = vmatprep.subr.bf16.mxu1 %v8395_v39 }
 0x339   :  { %7866 = vmatpush3.bf16.msra.mxu0 %v8321_v52  ;;  %v8354_v52 = vld [vmem:[%s10395_s3 + $0x9ac] sm:$0xff]  }
 0x33a   :  { %7867 = vmatprep.subr.bf16.mxu0 %v8395_v39 }
 0x33b   :  { %7886 = vmatpush3.bf16.msra.mxu1 %v8322_v49 }
 0x33c   :  { %7887 = vmatprep.subr.bf16.mxu1 %v8395_v39 }
 0x33d   :  { %7868 = vmatpush3.bf16.msra.mxu0 %v8323_v41  ;;  %v8355_v41 = vld [vmem:[%s10395_s3 + $0x978] sm:$0xff]  }
 0x33e   :  { %7869 = vmatprep.subr.bf16.mxu0 %v8395_v39 }
 0x33f   :  { %7888 = vmatpush3.bf16.msra.mxu1 %v8324_v42 }
 0x340   :  { %7889 = vmatprep.subr.bf16.mxu1 %v8395_v39 }
 0x341   :  { %v3381_v46 = vpop.f32.mrb[80].mxu1  ;;  %7870 = vmatpush3.bf16.msra.mxu0 %v8325_v44 }
 0x342   :  { %v7609_v48 = vpop.f32.mrb[81].mxu1  ;;  %7871 = vmatprep.subr.bf16.mxu0 %v8395_v39 }
 0x343   :  { %v3280_v50 = vpop.f32.mrb[80].mxu0  ;;  %v3384_v51 = vpop.f32.mrb[82].mxu1  ;;  %7890 = vmatpush3.bf16.msra.mxu1 %v8326_v45 }
 0x344   :  { %v3286_v43 = vadd.f32 %v3280_v50, %v3185_v35  ;;  %v7591_v55 = vpop.f32.mrb[81].mxu0  ;;  %v7610_v4 = vpop.f32.mrb[83].mxu1  ;;  %7891 = vmatprep.subr.bf16.mxu1 %v8395_v39  ;;  %v5124_v35 = vrot.slane %v10265_v31, 1  ;;  %v8358_v51 = vld [vmem:[%s10395_s3 + $0x9bc] ss:$0 sps:$4 sm:$0x33]  }
 0x345   :  { %v3283_v25 = vpop.f32.mrb[82].mxu0  ;;  %7872 = vmatpush3.bf16.msra.mxu0 %v8327_v47  ;;  %v8359_v4 = vld [vmem:[%s10395_s3 + $0x988] ss:$0 sps:$4 sm:$0x33]  }
 0x346   :  { %v7592_v58 = vpop.f32.mrb[83].mxu0  ;;  %7873 = vmatprep.subr.bf16.mxu0 %v8395_v39  ;;  %v3387_v60 = vadd.f32 %v3381_v46, %v3286_v43  ;;  %v8356_v46 = vld [vmem:[%s10395_s3 + $0x9b4] sm:$0xff]   ;;  %v8357_v43 = vld [vmem:[%s10395_s3 + $0x980] sm:$0xff]   ;;  %v5370_v25 = vsel %vm627_vm0, %v8358_v51, 0 }
 0x347   :  { %7892 = vmatpush3.bf16.msra.mxu1 %v8328_v53  ;;  %v5326_v58 = vrot.slane %v10265_v31, 3 }
 0x348   :  { %7893 = vmatprep.subr.bf16.mxu1 %v8395_v39 }
 0x349   :  { %7874 = vmatpush3.bf16.msra.mxu0 %v8329_v57  ;;  %v5269_v57 = vsel %vm627_vm0, %v8359_v4, 0 }
 0x34a   :  { %7875 = vmatprep.subr.bf16.mxu0 %v8395_v39 }
 0x34b   :  { %7894 = vmatpush3.bf16.msra.mxu1 %v4965_v61  ;;  %v8361_v61 = vld [vmem:[%s10395_s3 + $0x9c8] sm:$0xff]  }
 0x34c   :  { %7917 = vmatprep.subr.bf16.mxu1 %v8395_v39 }
 0x34d   :  { %7876 = vmatpush3.bf16.msra.mxu0 %v4864_v62  ;;  %v8362_v62 = vld [vmem:[%s10395_s3 + $0x9d0] sm:$0xff]  }
 0x34e   :  { %7896 = vmatmul.mubr.msk.bf16.vlgmr.msra.gmra.mrb[112].mxu1 %vm623_vm2, %v4921_v0  ;;  %7899 = vmatprep.subr.bf16.mxu0 %v8395_v39 }
 0x34f   :  { %7918 = vmatpush3.bf16.msra.mxu1 %v8332_v63  ;;  %7931 = vmatprep.mubr.msk.bf16.mxu1 %vm8396_vm1, %v8395_v39  ;;  %v8363_v63 = vld [vmem:[%s10395_s3 + $0x9d8] sm:$0xff]  }
 0x350   :  { %7878 = vmatmul.mubr.msk.bf16.vlgmr.msra.gmra.mrb[112].mxu0 %vm623_vm2, %v4820_v2  ;;  %7919 = vmatprep.subr.bf16.mxu1 %v8395_v39 }
 0x351   :  { %7900 = vmatpush3.bf16.msra.mxu0 %v8333_v1  ;;  %7913 = vmatprep.mubr.msk.bf16.mxu0 %vm8396_vm1, %v8395_v39  ;;  %v8364_v1 = vld [vmem:[%s10395_s3 + $0x9e0] sm:$0xff]  }
 0x352   :  { %7901 = vmatprep.subr.bf16.mxu0 %v8395_v39 }
 0x353   :  { %7920 = vmatpush3.bf16.msra.mxu1 %v8334_v5 }
 0x354   :  { %7921 = vmatprep.subr.bf16.mxu1 %v8395_v39 }
 0x355   :  { %7902 = vmatpush3.bf16.msra.mxu0 %v8335_v40 }
 0x356   :  { %7903 = vmatprep.subr.bf16.mxu0 %v8395_v39 }
 0x357   :  { %7922 = vmatpush3.bf16.msra.mxu1 %v8336_v6 }
 0x358   :  { %7923 = vmatprep.subr.bf16.mxu1 %v8395_v39 }
 0x359   :  { %7904 = vmatpush3.bf16.msra.mxu0 %v8337_v7 }
 0x35a   :  { %7905 = vmatprep.subr.bf16.mxu0 %v8395_v39 }
 0x35b   :  { %7924 = vmatpush3.bf16.msra.mxu1 %v8338_v9 }
 0x35c   :  { %7925 = vmatprep.subr.bf16.mxu1 %v8395_v39 }
 0x35d   :  { %v3584_v12 = vpop.f32.mrb[84].mxu1  ;;  %7906 = vmatpush3.bf16.msra.mxu0 %v8339_v10 }
 0x35e   :  { %v7645_v14 = vpop.f32.mrb[85].mxu1  ;;  %7907 = vmatprep.subr.bf16.mxu0 %v8395_v39 }
 0x35f   :  { %v3482_v15 = vpop.f32.mrb[84].mxu0  ;;  %v3587_v16 = vpop.f32.mrb[86].mxu1  ;;  %7926 = vmatpush3.bf16.msra.mxu1 %v8340_v11  ;;  %v8365_v11 = vld [vmem:[%s10395_s3 + $0x9e8] sm:$0xff]  }
 0x360   :  { %v3488_v20 = vadd.f32 %v3482_v15, %v3387_v60  ;;  %v7627_v21 = vpop.f32.mrb[85].mxu0  ;;  %v7646_v19 = vpop.f32.mrb[87].mxu1  ;;  %7927 = vmatprep.subr.bf16.mxu1 %v8395_v39  ;;  %v5225_v60 = vrot.slane %v10265_v31, 2  ;;  %v553_v15 = vmax.f32 %v8990_v54, 0.0 }
 0x361   :  { %v3485_v24 = vpop.f32.mrb[86].mxu0  ;;  %7908 = vmatpush3.bf16.msra.mxu0 %v8341_v13  ;;  %v8366_v13 = vld [vmem:[%s10395_s3 + $0x9f0] ss:$0 sps:$4 sm:$0x33]  }
 0x362   :  { %v7628_v28 = vpop.f32.mrb[87].mxu0  ;;  %7909 = vmatprep.subr.bf16.mxu0 %v8395_v39  ;;  %v3590_v30 = vadd.f32 %v3584_v12, %v3488_v20  ;;  %v5471_v16 = vsel %vm627_vm0, %v8366_v13, 0 }
 0x363   :  { %7928 = vmatpush3.bf16.msra.mxu1 %v8342_v17  ;;  %v5413_v17 = vpack.c.bf16 %v553_v15, %v553_v15 }
 0x364   :  { %7929 = vmatprep.subr.bf16.mxu1 %v8395_v39 }
 0x365   :  { %7910 = vmatpush3.bf16.msra.mxu0 %v8343_v26 }
 0x366   :  { %7911 = vmatprep.subr.bf16.mxu0 %v8395_v39 }
 0x367   :  { %7930 = vmatpush3.bf16.msra.mxu1 %v5168_v33 }
 0x368   :  { %7953 = vmatprep.subr.bf16.mxu1 %v8395_v39 }
 0x369   :  { %7912 = vmatpush3.bf16.msra.mxu0 %v5066_v34 }
 0x36a   :  { %7932 = vmatmul.mubr.msk.bf16.vlgmr.msra.gmra.mrb[116].mxu1 %vm623_vm2, %v5124_v35  ;;  %7935 = vmatprep.subr.bf16.mxu0 %v8395_v39 }
 0x36b   :  { %7954 = vmatpush3.bf16.msra.mxu1 %v8346_v29  ;;  %7967 = vmatprep.mubr.msk.bf16.mxu1 %vm8396_vm1, %v8395_v39 }
 0x36c   :  { %7914 = vmatmul.mubr.msk.bf16.vlgmr.msra.gmra.mrb[116].mxu0 %vm623_vm2, %v10265_v31  ;;  %7955 = vmatprep.subr.bf16.mxu1 %v8395_v39 }
 0x36d   :  { %7936 = vmatpush3.bf16.msra.mxu0 %v8347_v36  ;;  %7949 = vmatprep.mubr.msk.bf16.mxu0 %vm8396_vm1, %v8395_v39 }
 0x36e   :  { %7937 = vmatprep.subr.bf16.mxu0 %v8395_v39 }
 0x36f   :  { %7956 = vmatpush3.bf16.msra.mxu1 %v8348_v37 }
 0x370   :  { %7957 = vmatprep.subr.bf16.mxu1 %v8395_v39 }
 0x371   :  { %7938 = vmatpush3.bf16.msra.mxu0 %v8349_v8 }
 0x372   :  { %7939 = vmatprep.subr.bf16.mxu0 %v8395_v39 }
 0x373   :  { %7958 = vmatpush3.bf16.msra.mxu1 %v8350_v38 }
 0x374   :  { %7959 = vmatprep.subr.bf16.mxu1 %v8395_v39 }
 0x375   :  { %7940 = vmatpush3.bf16.msra.mxu0 %v8351_v22 }
 0x376   :  { %7941 = vmatprep.subr.bf16.mxu0 %v8395_v39 }
 0x377   :  { %7960 = vmatpush3.bf16.msra.mxu1 %v8352_v3 }
 0x378   :  { %7961 = vmatprep.subr.bf16.mxu1 %v8395_v39 }
 0x379   :  { %v3786_v49 = vpop.f32.mrb[88].mxu1  ;;  %7942 = vmatpush3.bf16.msra.mxu0 %v8353_v27 }
 0x37a   :  { %v7681_v42 = vpop.f32.mrb[89].mxu1  ;;  %7943 = vmatprep.subr.bf16.mxu0 %v8395_v39 }
 0x37b   :  { %v3685_v44 = vpop.f32.mrb[88].mxu0  ;;  %v3789_v45 = vpop.f32.mrb[90].mxu1  ;;  %7962 = vmatpush3.bf16.msra.mxu1 %v8354_v52 }
 0x37c   :  { %v3691_v47 = vadd.f32 %v3685_v44, %v3590_v30  ;;  %v7663_v48 = vpop.f32.mrb[89].mxu0  ;;  %v7682_v50 = vpop.f32.mrb[91].mxu1  ;;  %7963 = vmatprep.subr.bf16.mxu1 %v8395_v39 }
 0x37d   :  { %v3688_v53 = vpop.f32.mrb[90].mxu0  ;;  %7944 = vmatpush3.bf16.msra.mxu0 %v8355_v41 }
 0x37e   :  { %v7664_v55 = vpop.f32.mrb[91].mxu0  ;;  %7945 = vmatprep.subr.bf16.mxu0 %v8395_v39  ;;  %v3792_v56 = vadd.f32 %v3786_v49, %v3691_v47 }
 0x37f   :  { %7964 = vmatpush3.bf16.msra.mxu1 %v8356_v46 }
 0x380   :  { %7965 = vmatprep.subr.bf16.mxu1 %v8395_v39 }
 0x381   :  { %7946 = vmatpush3.bf16.msra.mxu0 %v8357_v43 }
 0x382   :  { %7947 = vmatprep.subr.bf16.mxu0 %v8395_v39 }
 0x383   :  { %7966 = vmatpush3.bf16.msra.mxu1 %v5370_v25 }
 0x385   :  { %7948 = vmatpush3.bf16.msra.mxu0 %v5269_v57 }
 0x386   :  { %7968 = vmatmul.mubr.msk.bf16.vlgmr.msra.gmra.mrb[120].mxu1 %vm623_vm2, %v5326_v58  ;;  %7971 = vmatprep.subr.bf16.mxu0 %v8395_v39 }
 0x388   :  { %7950 = vmatmul.mubr.msk.bf16.vlgmr.msra.gmra.mrb[120].mxu0 %vm623_vm2, %v5225_v60 }
 0x389   :  { %7972 = vmatpush3.bf16.msra.mxu0 %v8360_v59  ;;  %7985 = vmatprep.mubr.msk.bf16.mxu0 %vm8396_vm1, %v8395_v39 }
 0x38a   :  { %7973 = vmatprep.subr.bf16.mxu0 %v8395_v39 }
 0x38d   :  { %7974 = vmatpush3.bf16.msra.mxu0 %v8361_v61 }
 0x38e   :  { %7975 = vmatprep.subr.bf16.mxu0 %v8395_v39 }
 0x391   :  { %7976 = vmatpush3.bf16.msra.mxu0 %v8362_v62 }
 0x392   :  { %7977 = vmatprep.subr.bf16.mxu0 %v8395_v39 }
 0x395   :  { %v3989_v0 = vpop.f32.mrb[92].mxu1  ;;  %7978 = vmatpush3.bf16.msra.mxu0 %v8363_v63 }
 0x396   :  { %v7717_v2 = vpop.f32.mrb[93].mxu1  ;;  %7979 = vmatprep.subr.bf16.mxu0 %v8395_v39 }
 0x397   :  { %v3887_v5 = vpop.f32.mrb[92].mxu0  ;;  %v3992_v40 = vpop.f32.mrb[94].mxu1 }
 0x398   :  { %v3893_v6 = vadd.f32 %v3887_v5, %v3792_v56  ;;  %v7699_v7 = vpop.f32.mrb[93].mxu0  ;;  %v7718_v9 = vpop.f32.mrb[95].mxu1 }
 0x399   :  { %v3890_v10 = vpop.f32.mrb[94].mxu0  ;;  %7980 = vmatpush3.bf16.msra.mxu0 %v8364_v1 }
 0x39a   :  { %v7700_v12 = vpop.f32.mrb[95].mxu0  ;;  %7981 = vmatprep.subr.bf16.mxu0 %v8395_v39  ;;  %v3995_v14 = vadd.f32 %v3989_v0, %v3893_v6 }
 0x39d   :  { %7982 = vmatpush3.bf16.msra.mxu0 %v8365_v11 }
 0x39e   :  { %7983 = vmatprep.subr.bf16.mxu0 %v8395_v39 }
 0x3a1   :  { %7984 = vmatpush3.bf16.msra.mxu0 %v5471_v16 }
 0x3a4   :  { %7986 = vmatmul.mubr.msk.bf16.vlgmr.msra.gmra.mrb[124].mxu0 %vm623_vm2, %v5413_v17 }
 0x3b1   :  { %v4191_v18 = vpop.f32.mrb[96].mxu1 }
 0x3b2   :  { %v7753_v20 = vpop.f32.mrb[97].mxu1 }
 0x3b3   :  { %v4090_v21 = vpop.f32.mrb[96].mxu0  ;;  %v4194_v19 = vpop.f32.mrb[98].mxu1 }
 0x3b4   :  { %v4096_v23 = vadd.f32 %v4090_v21, %v3995_v14  ;;  %v7735_v24 = vpop.f32.mrb[97].mxu0  ;;  %v7754_v26 = vpop.f32.mrb[99].mxu1 }
 0x3b5   :  { %v4093_v28 = vpop.f32.mrb[98].mxu0 }
 0x3b6   :  { %v7736_v32 = vpop.f32.mrb[99].mxu0  ;;  %v4197_v30 = vadd.f32 %v4191_v18, %v4096_v23  ;;  %v6598_v28 = vld [vmem:[%s10396_s4] ss:$0 sm:$0xff]  ;;  %s8397_s4 = smov [#allocation2]  }
 0x3b7   :  { %s5541_s23 = sshll.u32 %s8397_s4, 4  ;;  %s5542_s23 = int_to_ptr.vmem [resolvable:$true] %s5541_s23 }
 0x3b8   :  { %s8371_s24 = scalar_lea.vmem %s5542_s23, 32  ;;  %p8376_p1 = scmp.lt.s32.totalorder %s5542_s23, %s5542_s23 }
 0x3b9   :  { %p8372_p0 = scmp.ne.s32.totalorder %s5542_s23, %s8371_s24  ;;  %p8377_p2 = scmp.lt.s32.totalorder %s8371_s24, %s8371_s24 }
 0x3bb   :  { %p8378_p3 = por %p8377_p2, %p8376_p1 }
 0x3bd   :  { %p8379_p4 = pnand %p8378_p3, %p8372_p0 }
 0x3cd   :  { %v4394_v31 = vpop.f32.mrb[100].mxu1 }
 0x3ce   :  { %v7789_v54 = vpop.f32.mrb[101].mxu1 }
 0x3cf   :  { %v4292_v33 = vpop.f32.mrb[100].mxu0  ;;  %v4397_v39 = vpop.f32.mrb[102].mxu1 }
 0x3d0   :  { %v4298_v34 = vadd.f32 %v4292_v33, %v4197_v30  ;;  %v7771_v29 = vpop.f32.mrb[101].mxu0  ;;  %v7790_v35 = vpop.f32.mrb[103].mxu1 }
 0x3d1   :  { %v4295_v36 = vpop.f32.mrb[102].mxu0 }
 0x3d2   :  { %v7772_v37 = vpop.f32.mrb[103].mxu0  ;;  %v4400_v8 = vadd.f32 %v4394_v31, %v4298_v34 }
 0x3e9   :  { %v4596_v38 = vpop.f32.mrb[104].mxu1 }
 0x3ea   :  { %v7825_v22 = vpop.f32.mrb[105].mxu1 }
 0x3eb   :  { %v4495_v3 = vpop.f32.mrb[104].mxu0  ;;  %v4599_v27 = vpop.f32.mrb[106].mxu1 }
 0x3ec   :  { %v4501_v52 = vadd.f32 %v4495_v3, %v4400_v8  ;;  %v7807_v49 = vpop.f32.mrb[105].mxu0  ;;  %v7826_v41 = vpop.f32.mrb[107].mxu1 }
 0x3ed   :  { %v4498_v42 = vpop.f32.mrb[106].mxu0 }
 0x3ee   :  { %v7808_v44 = vpop.f32.mrb[107].mxu0  ;;  %v4602_v45 = vadd.f32 %v4596_v38, %v4501_v52 }
 0x405   :  { %v4799_v46 = vpop.f32.mrb[108].mxu1 }
 0x406   :  { %v7861_v47 = vpop.f32.mrb[109].mxu1 }
 0x407   :  { %v4697_v48 = vpop.f32.mrb[108].mxu0  ;;  %v4802_v50 = vpop.f32.mrb[110].mxu1 }
 0x408   :  { %v4703_v51 = vadd.f32 %v4697_v48, %v4602_v45  ;;  %v7843_v53 = vpop.f32.mrb[109].mxu0  ;;  %v7862_v43 = vpop.f32.mrb[111].mxu1 }
 0x409   :  { %v4700_v55 = vpop.f32.mrb[110].mxu0 }
 0x40a   :  { %v7844_v4 = vpop.f32.mrb[111].mxu0  ;;  %v4805_v56 = vadd.f32 %v4799_v46, %v4703_v51 }
 0x421   :  { %v5001_v25 = vpop.f32.mrb[112].mxu1 }
 0x422   :  { %v7897_v57 = vpop.f32.mrb[113].mxu1 }
 0x423   :  { %v4900_v58 = vpop.f32.mrb[112].mxu0  ;;  %v5004_v59 = vpop.f32.mrb[114].mxu1 }
 0x424   :  { %v4906_v60 = vadd.f32 %v4900_v58, %v4805_v56  ;;  %v7879_v61 = vpop.f32.mrb[113].mxu0  ;;  %v7898_v62 = vpop.f32.mrb[115].mxu1 }
 0x425   :  { %v4903_v63 = vpop.f32.mrb[114].mxu0 }
 0x426   :  { %v7880_v0 = vpop.f32.mrb[115].mxu0  ;;  %v5007_v1 = vadd.f32 %v5001_v25, %v4906_v60 }
 0x43d   :  { %v5204_v2 = vpop.f32.mrb[116].mxu1 }
 0x43e   :  { %v7933_v5 = vpop.f32.mrb[117].mxu1 }
 0x43f   :  { %v5102_v40 = vpop.f32.mrb[116].mxu0  ;;  %v5207_v6 = vpop.f32.mrb[118].mxu1 }
 0x440   :  { %v5108_v7 = vadd.f32 %v5102_v40, %v5007_v1  ;;  %v7915_v9 = vpop.f32.mrb[117].mxu0  ;;  %v7934_v10 = vpop.f32.mrb[119].mxu1 }
 0x441   :  { %v5105_v11 = vpop.f32.mrb[118].mxu0 }
 0x442   :  { %v7916_v12 = vpop.f32.mrb[119].mxu0  ;;  %v5210_v13 = vadd.f32 %v5204_v2, %v5108_v7 }
 0x459   :  { %v5406_v14 = vpop.f32.mrb[120].mxu1 }
 0x45a   :  { %v7969_v15 = vpop.f32.mrb[121].mxu1 }
 0x45b   :  { %v5305_v16 = vpop.f32.mrb[120].mxu0  ;;  %v5409_v17 = vpop.f32.mrb[122].mxu1 }
 0x45c   :  { %v5311_v18 = vadd.f32 %v5305_v16, %v5210_v13  ;;  %v7951_v20 = vpop.f32.mrb[121].mxu0  ;;  %v7970_v21 = vpop.f32.mrb[123].mxu1 }
 0x45d   :  { %v5308_v19 = vpop.f32.mrb[122].mxu0 }
 0x45e   :  { %v7952_v23 = vpop.f32.mrb[123].mxu0  ;;  %v5412_v24 = vadd.f32 %v5406_v14, %v5311_v18 }
 0x477   :  { %v5507_v26 = vpop.f32.mrb[124].mxu0 }
 0x478   :  { %v5513_v32 = vadd.f32 %v5507_v26, %v5412_v24  ;;  %v7987_v30 = vpop.f32.mrb[125].mxu0 }
 0x479   :  { %v5510_v31 = vpop.f32.mrb[126].mxu0 }
 0x47a   :  { %v7988_v54 = vpop.f32.mrb[127].mxu0  ;;  %v5521_v33 = vadd.f32 %v6598_v28, %v5513_v32 }
 0x47c   :  { %v5523_v39 = vsel %vm5522_vm3, %v5521_v33, -inf }
 0x47d   :  { %5524 = vmax.xlane.f32.xlu0 %v5523_v39 }
 0x50a   :  { %v5525_v34 = vpop.xlane.xlu0 %5524 }
 0x50b   :  { %v5526_v29 = vsub.f32 %v5521_v33, %v5525_v34 }
 0x50d   :  { %v5527_v35 = vmul.f32 1.442695, %v5526_v29 }
 0x50f   :  { %8367 = vpow2.f32 %v5527_v35 }
 0x519   :  { %v8368_v36 = vpop.eup %8367 }
 0x51a   :  { %v5529_v37 = vsel %vm5522_vm3, %v8368_v36, 0.0 }
 0x51b   :  { %5530 = vadd.xlane.f32.xlu0 %v5529_v37 }
 0x5a8   :  { %v5531_v8 = vpop.xlane.xlu0 %5530 }
 0x5a9   :  { %8369 = vrcp.f32 %v5531_v8 }
 0x5b3   :  { %v8370_v38 = vpop.eup %8369 }
 0x5b4   :  { %v5533_v22 = vmul.f32 %v8370_v38, %v8368_v36 }
 0x5b6   :  { %5534 = vst.msk [vmem:[#allocation2] sm:$0x3] %vm5522_vm3, %v5533_v22 }
 0x5b7   :  { %8382 = shalt.err (!%p8379_p4)
}
 0x5b8   :  { %s8383_s27 = scalar_lea.hbm %s10397_s5, 32 }
 0x5b9   :  { %p8384_p5 = scmp.ne.s32.totalorder %s10397_s5, %s8383_s27  ;;  %p8387_p6 = scmp.lt.u32.totalorder %s8383_s27, %s10397_s5 }
 0x5bb   :  { %p8389_p7 = pnand %p8387_p6, %p8384_p5 }
 0x5bd   :  { %8392 = shalt.err (!%p8389_p7)
}
 0x5be   :  { %5544 = dma.vmem_to_hbm [thread:$0]  %s5542_s23, 32, %s10397_s5, [#allocation3]  }
 0x5bf   :  { %8393 = dma.done.wait [#allocation3], 32  }
 0x5c0   :  { %8394 = vsyncadd [#allocation3], 4294967264 }
 0x5c1   :  { %5548 = vsyncpa [#allocation3], 1 }

</bundles_post_ra>
